<compile_context>
chip_gen: v7x
topology: tpu7x:2x2x1
jax: 0.10.0
libtpu: 0.0.40
codegen_flags: <defaults>
</compile_context>

<pallas_src>
import jax
import jax.numpy as jnp
import numpy as np
from jax import lax
from jax.experimental import pallas as pl
from jax.experimental.pallas import tpu as pltpu

# Scoped-VMEM cap: ~3/4 of physical VMEM so long sequences stay resident
# before T-chunking is needed, while leaving headroom for compiler scratch.
try:
    _VMEM_LIMIT = int(pltpu.get_tpu_info().vmem_capacity_bytes) * 3 // 4
except Exception:  # conservative fallback if the query is unavailable
    _VMEM_LIMIT = 32 * 1024 * 1024
_VMEM_LIMIT = max(32 * 1024 * 1024, min(_VMEM_LIMIT, 100 * 1024 * 1024))


def _vmem_spec():
    return pl.BlockSpec(memory_space=pltpu.MemorySpace.VMEM)


# --------------------------------------------------------------------------
# Kernel 1: one full bidirectional GRU layer over the whole sequence.
#   inputs : x parts (T*B, d_p), per-direction W_ih^T blocks (d_p, 3H),
#            dense W_hh^T (H, 3H) per direction, folded biases (1, 3H),
#            n-gate hidden biases (1, H).
#   outputs: out_fwd (T, B, H), out_bwd (T, B, H)   [time order]
#   scratch: gi_fwd / gi_bwd (T*B, 3H) precomputed input projections.
# --------------------------------------------------------------------------
def _make_gru_layer_kernel(T, B, H, n_parts):
    H3 = 3 * H

    def kernel(*args):
        xs = args[:n_parts]                     # (T*B, d_p) feature blocks
        wfs = args[n_parts:2 * n_parts]         # forward W_ih^T blocks
        wbs = args[2 * n_parts:3 * n_parts]     # backward W_ih^T blocks
        (whhf_ref, whhb_ref, bf_ref, bb_ref, bnf_ref, bnb_ref,
         outf_ref, outb_ref, gif_scr, gib_scr) = args[3 * n_parts:]

        # --- Phase 1: whole-sequence input projection, one MXU matmul per
        # direction per input part.  x is pre-flattened and gi stays 2D, so
        # the largest buffers are never relayouted inside the kernel.
        gf = jnp.dot(xs[0][...], wfs[0][...], preferred_element_type=jnp.float32)
        gb = jnp.dot(xs[0][...], wbs[0][...], preferred_element_type=jnp.float32)
        for p in range(1, n_parts):
            gf = gf + jnp.dot(xs[p][...], wfs[p][...],
                              preferred_element_type=jnp.float32)
            gb = gb + jnp.dot(xs[p][...], wbs[p][...],
                              preferred_element_type=jnp.float32)
        gif_scr[...] = gf + bf_ref[...]     # b_ih + b_hh(r,z) folded in
        gib_scr[...] = gb + bb_ref[...]

        # --- Phase 2: sequential recurrence, fwd + bwd fused in one loop.
        # Dense per-direction W_hh (no block-diagonal zero-FLOP waste); the
        # hidden state is the fori_loop carry, i.e. stays in vregs.
        whh_f = whhf_ref[...]
        whh_b = whhb_ref[...]
        # Hoist the n-gate hidden-bias broadcasts out of the unrolled loop
        # (JAX does not CSE broadcast_in_dim).
        bn_f = jnp.broadcast_to(bnf_ref[...], (B, H))
        bn_b = jnp.broadcast_to(bnb_ref[...], (B, H))

        def step(t, carry):
            h_f, h_b = carry
            gh_f = jnp.dot(h_f, whh_f, preferred_element_type=jnp.float32)  # (B,3H)
            gh_b = jnp.dot(h_b, whh_b, preferred_element_type=jnp.float32)
            off_f = pl.multiple_of(t * B, B)
            off_b = pl.multiple_of((T - 1 - t) * B, B)
            gi_f = gif_scr[pl.ds(off_f, B), :]          # fwd uses x_t
            gi_b = gib_scr[pl.ds(off_b, B), :]          # bwd uses x_{T-1-t}

            # PyTorch gate order (r, z, n); b_hh_{r,z} already folded in gi.
            # TODO(synk): for H < 128 these gate slices start at sub-vreg lane
            # offsets; pad gate boundaries to 128 lanes for large models.
            r_f = jax.nn.sigmoid(gi_f[:, 0:H] + gh_f[:, 0:H])
            z_f = jax.nn.sigmoid(gi_f[:, H:2 * H] + gh_f[:, H:2 * H])
            n_f = jnp.tanh(gi_f[:, 2 * H:H3] + r_f * (gh_f[:, 2 * H:H3] + bn_f))
            h_f_new = (1.0 - z_f) * n_f + z_f * h_f

            r_b = jax.nn.sigmoid(gi_b[:, 0:H] + gh_b[:, 0:H])
            z_b = jax.nn.sigmoid(gi_b[:, H:2 * H] + gh_b[:, H:2 * H])
            n_b = jnp.tanh(gi_b[:, 2 * H:H3] + r_b * (gh_b[:, 2 * H:H3] + bn_b))
            h_b_new = (1.0 - z_b) * n_b + z_b * h_b

            # Per-direction outputs: full-width stores starting at lane 0.
            outf_ref[t] = h_f_new.astype(outf_ref.dtype)
            outb_ref[T - 1 - t] = h_b_new.astype(outb_ref.dtype)
            return (h_f_new, h_b_new)

        h0 = jnp.zeros((B, H), jnp.float32)
        lax.fori_loop(0, T, step, (h0, h0), unroll=True if T <= 32 else 8)

    return kernel


def _fold_bias(b_ih, b_hh, H):
    # r/z hidden biases commute inside the sigmoid argument -> fold them into
    # the precomputed input projection.  The n-gate hidden bias must stay
    # inside the r * (.) term, so it is passed separately.
    return b_ih + jnp.concatenate([b_hh[:2 * H], jnp.zeros((H,), jnp.float32)])


def run_gru_layer(x_parts, fwd_p, bwd_p, T, B):
    """x_parts: list of (T*B, d_p) time-major feature blocks.
       Returns (out_fwd, out_bwd), each (T, B, H)."""
    H = fwd_p["w_hh"].shape[1]
    n_parts = len(x_parts)

    def split_wih(w_ih):                       # torch (3H, Din) -> [(d_p, 3H)]
        wt = w_ih.T
        blocks, off = [], 0
        for xp in x_parts:
            d = xp.shape[1]
            blocks.append(wt[off:off + d, :])
            off += d
        return blocks

    wf_parts = split_wih(fwd_p["w_ih"])
    wb_parts = split_wih(bwd_p["w_ih"])
    whhf = fwd_p["w_hh"].T                     # (H, 3H) dense per direction
    whhb = bwd_p["w_hh"].T
    bf = _fold_bias(fwd_p["b_ih"], fwd_p["b_hh"], H).reshape(1, 3 * H)
    bb = _fold_bias(bwd_p["b_ih"], bwd_p["b_hh"], H).reshape(1, 3 * H)
    bnf = fwd_p["b_hh"][2 * H:].reshape(1, H)
    bnb = bwd_p["b_hh"][2 * H:].reshape(1, H)

    # TODO(synk): chunk T with a grid axis / pltpu.emit_pipeline (h carried in
    # scratch) for long sequences so tiles fit v7x's 64 MiB VMEM and the x DMA
    # overlaps the Phase-1 matmul (also helps v5e's lower HBM bandwidth).
    # TODO(synk): shard the two directions across v7x's two TensorCores
    # (grid=(2,) parallel / core_map) — they are independent until the output.
    # TODO(synk): bf16 weights / gi scratch (f32 accumulation) for v6e/v7x.
    kernel = _make_gru_layer_kernel(T, B, H, n_parts)
    n_in = 3 * n_parts + 6
    return pl.pallas_call(
        kernel,
        out_shape=(jax.ShapeDtypeStruct((T, B, H), jnp.float32),
                   jax.ShapeDtypeStruct((T, B, H), jnp.float32)),
        in_specs=[_vmem_spec()] * n_in,
        out_specs=(_vmem_spec(), _vmem_spec()),
        scratch_shapes=[pltpu.VMEM((T * B, 3 * H), jnp.float32),
                        pltpu.VMEM((T * B, 3 * H), jnp.float32)],
        compiler_params=pltpu.CompilerParams(vmem_limit_bytes=_VMEM_LIMIT),
    )(*x_parts, *wf_parts, *wb_parts, whhf, whhb, bf, bb, bnf, bnb)


# --------------------------------------------------------------------------
# Kernel 2: attention (Linear -> tanh -> Linear -> softmax over time),
# context = sum_t(attn * h), final fc.  The 2H-wide Linears are split into
# per-direction halves so fwd/bwd are never concatenated.
# --------------------------------------------------------------------------
def _make_attn_fc_kernel(T, B):
    def kernel(hf_ref, hb_ref, w1f_ref, w1b_ref, b1_ref, w2_ref, b2_ref,
               wfcf_ref, wfcb_ref, bfc_ref, out_ref, attn_ref):
        _, H = hf_ref.shape
        # Attention layer 1 over all T*B rows at once (pre-flattened inputs).
        a1 = jnp.tanh(
            jnp.dot(hf_ref[...], w1f_ref[...], preferred_element_type=jnp.float32)
            + jnp.dot(hb_ref[...], w1b_ref[...], preferred_element_type=jnp.float32)
            + b1_ref[...])
        # Scores via VPU multiply + lane reduce (no degenerate N=1 matmul).
        s = jnp.sum(a1 * w2_ref[...], axis=1, keepdims=True) + b2_ref[...]  # (T*B,1)
        s3 = s.reshape(T, B, 1)
        # Softmax over time.
        m = jnp.max(s3, axis=0, keepdims=True)
        e = jnp.exp(s3 - m)
        attn3 = e / jnp.sum(e, axis=0, keepdims=True)                       # (T,B,1)
        attn_ref[...] = attn3          # no in-kernel transpose; wrapper transposes
        # Context: the time-grouped reduction needs one (T*B,H)->(T,B,H)
        # regroup per direction (layout-free when B % 8 == 0).
        ctx_f = jnp.sum(attn3 * hf_ref[...].reshape(T, B, H), axis=0)       # (B,H)
        ctx_b = jnp.sum(attn3 * hb_ref[...].reshape(T, B, H), axis=0)
        out_ref[...] = (
            jnp.dot(ctx_f, wfcf_ref[...], preferred_element_type=jnp.float32)
            + jnp.dot(ctx_b, wfcb_ref[...], preferred_element_type=jnp.float32)
            + bfc_ref[...])
    return kernel


def run_attention_fc(hf_flat, hb_flat, params, T, B):
    H = params["attn_w1"].shape[0]
    out_dim = params["fc_w"].shape[0]
    w1t = params["attn_w1"].T                  # (2H, H) -> split halves
    w1f, w1b = w1t[:H, :], w1t[H:, :]
    b1 = params["attn_b1"].reshape(1, H)
    w2 = params["attn_w2"].reshape(1, H)
    b2 = params["attn_b2"].reshape(1, 1)
    wfct = params["fc_w"].T                    # (2H, out_dim) -> split halves
    wfcf, wfcb = wfct[:H, :], wfct[H:, :]
    bfc = params["fc_b"].reshape(1, out_dim)
    return pl.pallas_call(
        _make_attn_fc_kernel(T, B),
        out_shape=(jax.ShapeDtypeStruct((B, out_dim), jnp.float32),
                   jax.ShapeDtypeStruct((T, B, 1), jnp.float32)),
        in_specs=[_vmem_spec()] * 10,
        out_specs=(_vmem_spec(), _vmem_spec()),
        compiler_params=pltpu.CompilerParams(vmem_limit_bytes=_VMEM_LIMIT),
    )(hf_flat, hb_flat, w1f, w1b, b1, w2, b2, wfcf, wfcb, bfc)


# --------------------------------------------------------------------------
# Parameter init (xavier_uniform weights, zero biases — as in the module)
# --------------------------------------------------------------------------
def xavier_uniform(key, shape):
    fan_out, fan_in = shape  # torch 2D weight layout: (out_features, in_features)
    limit = float(np.sqrt(6.0 / (fan_in + fan_out)))
    return jax.random.uniform(key, shape, jnp.float32, -limit, limit)


def init_params(key, input_dim, hidden_dim, num_layers, output_dim):
    H = hidden_dim
    params = {"gru": []}
    for layer in range(num_layers):
        in_dim = input_dim if layer == 0 else 2 * H
        dirs = []
        for _d in range(2):  # forward, backward
            key, k1, k2 = jax.random.split(key, 3)
            dirs.append(dict(
                w_ih=xavier_uniform(k1, (3 * H, in_dim)),
                w_hh=xavier_uniform(k2, (3 * H, H)),
                b_ih=jnp.zeros((3 * H,), jnp.float32),
                b_hh=jnp.zeros((3 * H,), jnp.float32),
            ))
        params["gru"].append(dirs)
    key, k1, k2, k3 = jax.random.split(key, 4)
    params["attn_w1"] = xavier_uniform(k1, (H, 2 * H))
    params["attn_b1"] = jnp.zeros((H,), jnp.float32)
    params["attn_w2"] = xavier_uniform(k2, (1, H))
    params["attn_b2"] = jnp.zeros((1,), jnp.float32)
    params["fc_w"] = xavier_uniform(k3, (output_dim, 2 * H))
    params["fc_b"] = jnp.zeros((output_dim,), jnp.float32)
    return params


# --------------------------------------------------------------------------
# Pallas-backed forward (matches GRUAttentionModel.forward semantics)
# --------------------------------------------------------------------------
def gru_attention_forward(params, x_btf):
    """x_btf: (B, T, input_dim) -> (output (B, out_dim), attn (B, T, 1))."""
    Bsz, T, F = x_btf.shape
    # Time-major flatten done wrapper-side (layout plumbing, free in XLA).
    parts = [jnp.transpose(x_btf, (1, 0, 2)).reshape(T * Bsz, F)]
    for fwd_p, bwd_p in params["gru"]:
        out_f, out_b = run_gru_layer(parts, fwd_p, bwd_p, T, Bsz)
        # Feed the next consumer as two feature blocks with split weights:
        # fwd/bwd halves are never concatenated in HBM.
        parts = [out_f.reshape(T * Bsz, -1), out_b.reshape(T * Bsz, -1)]
        # nn.GRU inter-layer dropout is identity at inference time; omitted.
    out, attn_tb1 = run_attention_fc(parts[0], parts[1], params, T, Bsz)
    return out, jnp.transpose(attn_tb1, (1, 0, 2))  # (B, T, 1)


# --------------------------------------------------------------------------
# Pure-JAX reference (for correctness check only)
# --------------------------------------------------------------------------
def reference_forward(params, x_btf):
    def gru_dir(x_tbf, p):
        H = p["w_hh"].shape[1]
        B = x_tbf.shape[1]

        def step(h, xt):
            gi = xt @ p["w_ih"].T + p["b_ih"]
            gh = h @ p["w_hh"].T + p["b_hh"]
            r = jax.nn.sigmoid(gi[:, :H] + gh[:, :H])
            z = jax.nn.sigmoid(gi[:, H:2 * H] + gh[:, H:2 * H])
            n = jnp.tanh(gi[:, 2 * H:] + r * gh[:, 2 * H:])
            h_new = (1.0 - z) * n + z * h
            return h_new, h_new

        _, hs = lax.scan(step, jnp.zeros((B, H), jnp.float32), x_tbf)
        return hs

    h = jnp.transpose(x_btf, (1, 0, 2))
    for fwd_p, bwd_p in params["gru"]:
        h_fwd = gru_dir(h, fwd_p)
        h_bwd = jnp.flip(gru_dir(jnp.flip(h, 0), bwd_p), 0)
        h = jnp.concatenate([h_fwd, h_bwd], -1)
    scores = (jnp.tanh(h @ params["attn_w1"].T + params["attn_b1"])
              @ params["attn_w2"].T + params["attn_b2"])
    attn = jax.nn.softmax(scores, axis=0)
    context = jnp.sum(attn * h, axis=0)
    out = context @ params["fc_w"].T + params["fc_b"]
    return out, jnp.transpose(attn, (1, 0, 2))


if __name__ == "__main__":
    B, T, IN, H, L, OUT = 2, 8, 4, 32, 2, 3
    key = jax.random.PRNGKey(0)
    key, kx, kp = jax.random.split(key, 3)
    x = jax.random.normal(kx, (B, T, IN), jnp.float32)
    params = init_params(kp, IN, H, L, OUT)

    fwd = jax.jit(gru_attention_forward)
    out, attn = jax.block_until_ready(fwd(params, x))
    assert out.shape == (B, OUT) and attn.shape == (B, T, 1)

    ref_out, ref_attn = reference_forward(params, x)
    np.testing.assert_allclose(np.asarray(out), np.asarray(ref_out), rtol=2e-3, atol=2e-3)
    np.testing.assert_allclose(np.asarray(attn), np.asarray(ref_attn), rtol=2e-3, atol=2e-3)

    print("KERNEL_OK")
</pallas_src>

<mosaic_0001>
module attributes {stable_mosaic.version = 11 : i64} {
  func.func @kernel(%arg0: memref<16x4xf32, #tpu.memory_space<vmem>>, %arg1: memref<4x96xf32, #tpu.memory_space<vmem>>, %arg2: memref<4x96xf32, #tpu.memory_space<vmem>>, %arg3: memref<32x96xf32, #tpu.memory_space<vmem>>, %arg4: memref<32x96xf32, #tpu.memory_space<vmem>>, %arg5: memref<1x96xf32, #tpu.memory_space<vmem>>, %arg6: memref<1x96xf32, #tpu.memory_space<vmem>>, %arg7: memref<1x32xf32, #tpu.memory_space<vmem>>, %arg8: memref<1x32xf32, #tpu.memory_space<vmem>>, %arg9: memref<8x2x32xf32, #tpu.memory_space<vmem>>, %arg10: memref<8x2x32xf32, #tpu.memory_space<vmem>>, %arg11: memref<16x96xf32, #tpu.memory_space<vmem>>, %arg12: memref<16x96xf32, #tpu.memory_space<vmem>>) attributes {dimension_semantics = [], scalar_prefetch = 0 : i64, scratch_operands = 2 : i64, tpu.core_type = #tpu.core_type<tc>} {
    %c0 = arith.constant 0 : index
    %c0_0 = arith.constant 0 : index
    %0 = vector.load %arg0[%c0, %c0_0] : memref<16x4xf32, #tpu.memory_space<vmem>>, vector<16x4xf32>
    %c0_1 = arith.constant 0 : index
    %c0_2 = arith.constant 0 : index
    %1 = vector.load %arg1[%c0_1, %c0_2] : memref<4x96xf32, #tpu.memory_space<vmem>>, vector<4x96xf32>
    %cst = arith.constant dense<0.000000e+00> : vector<16x96xf32>
    %2 = tpu.matmul %0, %1, %cst {dimension_numbers = #tpu.dot_dimension_numbers<[1], [0], [0], [1], [0, 0, 1, 1], [], []>} : vector<16x4xf32>, vector<4x96xf32>, vector<16x96xf32> -> vector<16x96xf32>
    %c0_3 = arith.constant 0 : index
    %c0_4 = arith.constant 0 : index
    %3 = vector.load %arg0[%c0_3, %c0_4] : memref<16x4xf32, #tpu.memory_space<vmem>>, vector<16x4xf32>
    %c0_5 = arith.constant 0 : index
    %c0_6 = arith.constant 0 : index
    %4 = vector.load %arg2[%c0_5, %c0_6] : memref<4x96xf32, #tpu.memory_space<vmem>>, vector<4x96xf32>
    %cst_7 = arith.constant dense<0.000000e+00> : vector<16x96xf32>
    %5 = tpu.matmul %3, %4, %cst_7 {dimension_numbers = #tpu.dot_dimension_numbers<[1], [0], [0], [1], [0, 0, 1, 1], [], []>} : vector<16x4xf32>, vector<4x96xf32>, vector<16x96xf32> -> vector<16x96xf32>
    %c0_8 = arith.constant 0 : index
    %c0_9 = arith.constant 0 : index
    %6 = vector.load %arg5[%c0_8, %c0_9] : memref<1x96xf32, #tpu.memory_space<vmem>>, vector<1x96xf32>
    %7 = vector.broadcast %6 : vector<1x96xf32> to vector<16x96xf32>
    %8 = arith.addf %2, %7 : vector<16x96xf32>
    %c0_10 = arith.constant 0 : index
    %c0_11 = arith.constant 0 : index
    %9 = vector.load %arg11[%c0_10, %c0_11] : memref<16x96xf32, #tpu.memory_space<vmem>>, vector<16x96xf32>
    tpu.vector_store %arg11[%c0_10, %c0_11], %8 {strides = array<i32>} : memref<16x96xf32, #tpu.memory_space<vmem>>, vector<16x96xf32>,
    %c0_12 = arith.constant 0 : index
    %c0_13 = arith.constant 0 : index
    %10 = vector.load %arg6[%c0_12, %c0_13] : memref<1x96xf32, #tpu.memory_space<vmem>>, vector<1x96xf32>
    %11 = vector.broadcast %10 : vector<1x96xf32> to vector<16x96xf32>
    %12 = arith.addf %5, %11 : vector<16x96xf32>
    %c0_14 = arith.constant 0 : index
    %c0_15 = arith.constant 0 : index
    %13 = vector.load %arg12[%c0_14, %c0_15] : memref<16x96xf32, #tpu.memory_space<vmem>>, vector<16x96xf32>
    tpu.vector_store %arg12[%c0_14, %c0_15], %12 {strides = array<i32>} : memref<16x96xf32, #tpu.memory_space<vmem>>, vector<16x96xf32>,
    %c0_16 = arith.constant 0 : index
    %c0_17 = arith.constant 0 : index
    %14 = vector.load %arg3[%c0_16, %c0_17] : memref<32x96xf32, #tpu.memory_space<vmem>>, vector<32x96xf32>
    %c0_18 = arith.constant 0 : index
    %c0_19 = arith.constant 0 : index
    %15 = vector.load %arg4[%c0_18, %c0_19] : memref<32x96xf32, #tpu.memory_space<vmem>>, vector<32x96xf32>
    %c0_20 = arith.constant 0 : index
    %c0_21 = arith.constant 0 : index
    %16 = vector.load %arg7[%c0_20, %c0_21] : memref<1x32xf32, #tpu.memory_space<vmem>>, vector<1x32xf32>
    %17 = vector.shape_cast %16 : vector<1x32xf32> to vector<1x32xf32>
    %18 = vector.broadcast %17 : vector<1x32xf32> to vector<2x32xf32>
    %c0_22 = arith.constant 0 : index
    %c0_23 = arith.constant 0 : index
    %19 = vector.load %arg8[%c0_22, %c0_23] : memref<1x32xf32, #tpu.memory_space<vmem>>, vector<1x32xf32>
    %20 = vector.shape_cast %19 : vector<1x32xf32> to vector<1x32xf32>
    %21 = vector.broadcast %20 : vector<1x32xf32> to vector<2x32xf32>
    %cst_24 = arith.constant 0.000000e+00 : f32
    %22 = vector.broadcast %cst_24 : f32 to vector<2x32xf32>
    %c0_i32 = arith.constant 0 : i32
    %cst_25 = arith.constant dense<0.000000e+00> : vector<2x96xf32>
    %23 = tpu.matmul %22, %14, %cst_25 {dimension_numbers = #tpu.dot_dimension_numbers<[1], [0], [0], [1], [0, 0, 1, 1], [], []>} : vector<2x32xf32>, vector<32x96xf32>, vector<2x96xf32> -> vector<2x96xf32>
    %cst_26 = arith.constant dense<0.000000e+00> : vector<2x96xf32>
    %24 = tpu.matmul %22, %15, %cst_26 {dimension_numbers = #tpu.dot_dimension_numbers<[1], [0], [0], [1], [0, 0, 1, 1], [], []>} : vector<2x32xf32>, vector<32x96xf32>, vector<2x96xf32> -> vector<2x96xf32>
    %c2_i32 = arith.constant 2 : i32
    %25 = arith.muli %c0_i32, %c2_i32 : i32
    %26 = tpu.assume_multiple %25, 2 : i32
    %c7_i32 = arith.constant 7 : i32
    %27 = arith.subi %c7_i32, %c0_i32 : i32
    %c2_i32_27 = arith.constant 2 : i32
    %28 = arith.muli %27, %c2_i32_27 : i32
    %29 = tpu.assume_multiple %28, 2 : i32
    %30 = arith.index_cast %26 : i32 to index
    %c0_28 = arith.constant 0 : index
    %31 = vector.load %arg11[%30, %c0_28] : memref<16x96xf32, #tpu.memory_space<vmem>>, vector<2x96xf32>
    %32 = arith.index_cast %29 : i32 to index
    %c0_29 = arith.constant 0 : index
    %33 = vector.load %arg12[%32, %c0_29] : memref<16x96xf32, #tpu.memory_space<vmem>>, vector<2x96xf32>
    %34 = vector.extract_strided_slice %31 {offsets = [0, 0], sizes = [2, 32], strides = [1, 1]} : vector<2x96xf32> to vector<2x32xf32>
    %35 = vector.extract_strided_slice %23 {offsets = [0, 0], sizes = [2, 32], strides = [1, 1]} : vector<2x96xf32> to vector<2x32xf32>
    %36 = arith.addf %34, %35 : vector<2x32xf32>
    %37 = arith.negf %36 : vector<2x32xf32>
    %38 = math.exp %37 : vector<2x32xf32>
    %cst_30 = arith.constant 1.000000e+00 : f32
    %39 = vector.broadcast %cst_30 : f32 to vector<2x32xf32>
    %40 = arith.addf %39, %38 : vector<2x32xf32>
    %41 = arith.divf %39, %40 : vector<2x32xf32>
    %42 = vector.extract_strided_slice %31 {offsets = [0, 32], sizes = [2, 32], strides = [1, 1]} : vector<2x96xf32> to vector<2x32xf32>
    %43 = vector.extract_strided_slice %23 {offsets = [0, 32], sizes = [2, 32], strides = [1, 1]} : vector<2x96xf32> to vector<2x32xf32>
    %44 = arith.addf %42, %43 : vector<2x32xf32>
    %45 = arith.negf %44 : vector<2x32xf32>
    %46 = math.exp %45 : vector<2x32xf32>
    %cst_31 = arith.constant 1.000000e+00 : f32
    %47 = vector.broadcast %cst_31 : f32 to vector<2x32xf32>
    %48 = arith.addf %47, %46 : vector<2x32xf32>
    %49 = arith.divf %47, %48 : vector<2x32xf32>
    %50 = vector.extract_strided_slice %31 {offsets = [0, 64], sizes = [2, 32], strides = [1, 1]} : vector<2x96xf32> to vector<2x32xf32>
    %51 = vector.extract_strided_slice %23 {offsets = [0, 64], sizes = [2, 32], strides = [1, 1]} : vector<2x96xf32> to vector<2x32xf32>
    %52 = arith.addf %51, %18 : vector<2x32xf32>
    %53 = arith.mulf %41, %52 : vector<2x32xf32>
    %54 = arith.addf %50, %53 : vector<2x32xf32>
    %55 = math.tanh %54 : vector<2x32xf32>
    %cst_32 = arith.constant 1.000000e+00 : f32
    %56 = vector.broadcast %cst_32 : f32 to vector<2x32xf32>
    %57 = arith.subf %56, %49 : vector<2x32xf32>
    %58 = arith.mulf %57, %55 : vector<2x32xf32>
    %59 = arith.mulf %49, %22 : vector<2x32xf32>
    %60 = arith.addf %58, %59 : vector<2x32xf32>
    %61 = vector.extract_strided_slice %33 {offsets = [0, 0], sizes = [2, 32], strides = [1, 1]} : vector<2x96xf32> to vector<2x32xf32>
    %62 = vector.extract_strided_slice %24 {offsets = [0, 0], sizes = [2, 32], strides = [1, 1]} : vector<2x96xf32> to vector<2x32xf32>
    %63 = arith.addf %61, %62 : vector<2x32xf32>
    %64 = arith.negf %63 : vector<2x32xf32>
    %65 = math.exp %64 : vector<2x32xf32>
    %cst_33 = arith.constant 1.000000e+00 : f32
    %66 = vector.broadcast %cst_33 : f32 to vector<2x32xf32>
    %67 = arith.addf %66, %65 : vector<2x32xf32>
    %68 = arith.divf %66, %67 : vector<2x32xf32>
    %69 = vector.extract_strided_slice %33 {offsets = [0, 32], sizes = [2, 32], strides = [1, 1]} : vector<2x96xf32> to vector<2x32xf32>
    %70 = vector.extract_strided_slice %24 {offsets = [0, 32], sizes = [2, 32], strides = [1, 1]} : vector<2x96xf32> to vector<2x32xf32>
    %71 = arith.addf %69, %70 : vector<2x32xf32>
    %72 = arith.negf %71 : vector<2x32xf32>
    %73 = math.exp %72 : vector<2x32xf32>
    %cst_34 = arith.constant 1.000000e+00 : f32
    %74 = vector.broadcast %cst_34 : f32 to vector<2x32xf32>
    %75 = arith.addf %74, %73 : vector<2x32xf32>
    %76 = arith.divf %74, %75 : vector<2x32xf32>
    %77 = vector.extract_strided_slice %33 {offsets = [0, 64], sizes = [2, 32], strides = [1, 1]} : vector<2x96xf32> to vector<2x32xf32>
    %78 = vector.extract_strided_slice %24 {offsets = [0, 64], sizes = [2, 32], strides = [1, 1]} : vector<2x96xf32> to vector<2x32xf32>
    %79 = arith.addf %78, %21 : vector<2x32xf32>
    %80 = arith.mulf %68, %79 : vector<2x32xf32>
    %81 = arith.addf %77, %80 : vector<2x32xf32>
    %82 = math.tanh %81 : vector<2x32xf32>
    %cst_35 = arith.constant 1.000000e+00 : f32
    %83 = vector.broadcast %cst_35 : f32 to vector<2x32xf32>
    %84 = arith.subf %83, %76 : vector<2x32xf32>
    %85 = arith.mulf %84, %82 : vector<2x32xf32>
    %86 = arith.mulf %76, %22 : vector<2x32xf32>
    %87 = arith.addf %85, %86 : vector<2x32xf32>
    %88 = arith.index_cast %c0_i32 : i32 to index
    %c0_36 = arith.constant 0 : index
    %c0_37 = arith.constant 0 : index
    %89 = vector.load %arg9[%88, %c0_36, %c0_37] : memref<8x2x32xf32, #tpu.memory_space<vmem>>, vector<1x2x32xf32>
    %90 = vector.shape_cast %89 : vector<1x2x32xf32> to vector<2x32xf32>
    %91 = vector.shape_cast %60 : vector<2x32xf32> to vector<1x2x32xf32>
    tpu.vector_store %arg9[%88, %c0_36, %c0_37], %91 {strides = array<i32>} : memref<8x2x32xf32, #tpu.memory_space<vmem>>, vector<1x2x32xf32>,
    %c7_i32_38 = arith.constant 7 : i32
    %92 = arith.subi %c7_i32_38, %c0_i32 : i32
    %93 = arith.index_cast %92 : i32 to index
    %c0_39 = arith.constant 0 : index
    %c0_40 = arith.constant 0 : index
    %94 = vector.load %arg10[%93, %c0_39, %c0_40] : memref<8x2x32xf32, #tpu.memory_space<vmem>>, vector<1x2x32xf32>
    %95 = vector.shape_cast %94 : vector<1x2x32xf32> to vector<2x32xf32>
    %96 = vector.shape_cast %87 : vector<2x32xf32> to vector<1x2x32xf32>
    tpu.vector_store %arg10[%93, %c0_39, %c0_40], %96 {strides = array<i32>} : memref<8x2x32xf32, #tpu.memory_space<vmem>>, vector<1x2x32xf32>,
    %c1_i32 = arith.constant 1 : i32
    %cst_41 = arith.constant dense<0.000000e+00> : vector<2x96xf32>
    %97 = tpu.matmul %60, %14, %cst_41 {dimension_numbers = #tpu.dot_dimension_numbers<[1], [0], [0], [1], [0, 0, 1, 1], [], []>} : vector<2x32xf32>, vector<32x96xf32>, vector<2x96xf32> -> vector<2x96xf32>
    %cst_42 = arith.constant dense<0.000000e+00> : vector<2x96xf32>
    %98 = tpu.matmul %87, %15, %cst_42 {dimension_numbers = #tpu.dot_dimension_numbers<[1], [0], [0], [1], [0, 0, 1, 1], [], []>} : vector<2x32xf32>, vector<32x96xf32>, vector<2x96xf32> -> vector<2x96xf32>
    %c2_i32_43 = arith.constant 2 : i32
    %99 = arith.muli %c1_i32, %c2_i32_43 : i32
    %100 = tpu.assume_multiple %99, 2 : i32
    %c7_i32_44 = arith.constant 7 : i32
    %101 = arith.subi %c7_i32_44, %c1_i32 : i32
    %c2_i32_45 = arith.constant 2 : i32
    %102 = arith.muli %101, %c2_i32_45 : i32
    %103 = tpu.assume_multiple %102, 2 : i32
    %104 = arith.index_cast %100 : i32 to index
    %c0_46 = arith.constant 0 : index
    %105 = vector.load %arg11[%104, %c0_46] : memref<16x96xf32, #tpu.memory_space<vmem>>, vector<2x96xf32>
    %106 = arith.index_cast %103 : i32 to index
    %c0_47 = arith.constant 0 : index
    %107 = vector.load %arg12[%106, %c0_47] : memref<16x96xf32, #tpu.memory_space<vmem>>, vector<2x96xf32>
    %108 = vector.extract_strided_slice %105 {offsets = [0, 0], sizes = [2, 32], strides = [1, 1]} : vector<2x96xf32> to vector<2x32xf32>
    %109 = vector.extract_strided_slice %97 {offsets = [0, 0], sizes = [2, 32], strides = [1, 1]} : vector<2x96xf32> to vector<2x32xf32>
    %110 = arith.addf %108, %109 : vector<2x32xf32>
    %111 = arith.negf %110 : vector<2x32xf32>
    %112 = math.exp %111 : vector<2x32xf32>
    %cst_48 = arith.constant 1.000000e+00 : f32
    %113 = vector.broadcast %cst_48 : f32 to vector<2x32xf32>
    %114 = arith.addf %113, %112 : vector<2x32xf32>
    %115 = arith.divf %113, %114 : vector<2x32xf32>
    %116 = vector.extract_strided_slice %105 {offsets = [0, 32], sizes = [2, 32], strides = [1, 1]} : vector<2x96xf32> to vector<2x32xf32>
    %117 = vector.extract_strided_slice %97 {offsets = [0, 32], sizes = [2, 32], strides = [1, 1]} : vector<2x96xf32> to vector<2x32xf32>
    %118 = arith.addf %116, %117 : vector<2x32xf32>
    %119 = arith.negf %118 : vector<2x32xf32>
    %120 = math.exp %119 : vector<2x32xf32>
    %cst_49 = arith.constant 1.000000e+00 : f32
    %121 = vector.broadcast %cst_49 : f32 to vector<2x32xf32>
    %122 = arith.addf %121, %120 : vector<2x32xf32>
    %123 = arith.divf %121, %122 : vector<2x32xf32>
    %124 = vector.extract_strided_slice %105 {offsets = [0, 64], sizes = [2, 32], strides = [1, 1]} : vector<2x96xf32> to vector<2x32xf32>
    %125 = vector.extract_strided_slice %97 {offsets = [0, 64], sizes = [2, 32], strides = [1, 1]} : vector<2x96xf32> to vector<2x32xf32>
    %126 = arith.addf %125, %18 : vector<2x32xf32>
    %127 = arith.mulf %115, %126 : vector<2x32xf32>
    %128 = arith.addf %124, %127 : vector<2x32xf32>
    %129 = math.tanh %128 : vector<2x32xf32>
    %cst_50 = arith.constant 1.000000e+00 : f32
    %130 = vector.broadcast %cst_50 : f32 to vector<2x32xf32>
    %131 = arith.subf %130, %123 : vector<2x32xf32>
    %132 = arith.mulf %131, %129 : vector<2x32xf32>
    %133 = arith.mulf %123, %60 : vector<2x32xf32>
    %134 = arith.addf %132, %133 : vector<2x32xf32>
    %135 = vector.extract_strided_slice %107 {offsets = [0, 0], sizes = [2, 32], strides = [1, 1]} : vector<2x96xf32> to vector<2x32xf32>
    %136 = vector.extract_strided_slice %98 {offsets = [0, 0], sizes = [2, 32], strides = [1, 1]} : vector<2x96xf32> to vector<2x32xf32>
    %137 = arith.addf %135, %136 : vector<2x32xf32>
    %138 = arith.negf %137 : vector<2x32xf32>
    %139 = math.exp %138 : vector<2x32xf32>
    %cst_51 = arith.constant 1.000000e+00 : f32
    %140 = vector.broadcast %cst_51 : f32 to vector<2x32xf32>
    %141 = arith.addf %140, %139 : vector<2x32xf32>
    %142 = arith.divf %140, %141 : vector<2x32xf32>
    %143 = vector.extract_strided_slice %107 {offsets = [0, 32], sizes = [2, 32], strides = [1, 1]} : vector<2x96xf32> to vector<2x32xf32>
    %144 = vector.extract_strided_slice %98 {offsets = [0, 32], sizes = [2, 32], strides = [1, 1]} : vector<2x96xf32> to vector<2x32xf32>
    %145 = arith.addf %143, %144 : vector<2x32xf32>
    %146 = arith.negf %145 : vector<2x32xf32>
    %147 = math.exp %146 : vector<2x32xf32>
    %cst_52 = arith.constant 1.000000e+00 : f32
    %148 = vector.broadcast %cst_52 : f32 to vector<2x32xf32>
    %149 = arith.addf %148, %147 : vector<2x32xf32>
    %150 = arith.divf %148, %149 : vector<2x32xf32>
    %151 = vector.extract_strided_slice %107 {offsets = [0, 64], sizes = [2, 32], strides = [1, 1]} : vector<2x96xf32> to vector<2x32xf32>
    %152 = vector.extract_strided_slice %98 {offsets = [0, 64], sizes = [2, 32], strides = [1, 1]} : vector<2x96xf32> to vector<2x32xf32>
    %153 = arith.addf %152, %21 : vector<2x32xf32>
    %154 = arith.mulf %142, %153 : vector<2x32xf32>
    %155 = arith.addf %151, %154 : vector<2x32xf32>
    %156 = math.tanh %155 : vector<2x32xf32>
    %cst_53 = arith.constant 1.000000e+00 : f32
    %157 = vector.broadcast %cst_53 : f32 to vector<2x32xf32>
    %158 = arith.subf %157, %150 : vector<2x32xf32>
    %159 = arith.mulf %158, %156 : vector<2x32xf32>
    %160 = arith.mulf %150, %87 : vector<2x32xf32>
    %161 = arith.addf %159, %160 : vector<2x32xf32>
    %162 = arith.index_cast %c1_i32 : i32 to index
    %c0_54 = arith.constant 0 : index
    %c0_55 = arith.constant 0 : index
    %163 = vector.load %arg9[%162, %c0_54, %c0_55] : memref<8x2x32xf32, #tpu.memory_space<vmem>>, vector<1x2x32xf32>
    %164 = vector.shape_cast %163 : vector<1x2x32xf32> to vector<2x32xf32>
    %165 = vector.shape_cast %134 : vector<2x32xf32> to vector<1x2x32xf32>
    tpu.vector_store %arg9[%162, %c0_54, %c0_55], %165 {strides = array<i32>} : memref<8x2x32xf32, #tpu.memory_space<vmem>>, vector<1x2x32xf32>,
    %c7_i32_56 = arith.constant 7 : i32
    %166 = arith.subi %c7_i32_56, %c1_i32 : i32
    %167 = arith.index_cast %166 : i32 to index
    %c0_57 = arith.constant 0 : index
    %c0_58 = arith.constant 0 : index
    %168 = vector.load %arg10[%167, %c0_57, %c0_58] : memref<8x2x32xf32, #tpu.memory_space<vmem>>, vector<1x2x32xf32>
    %169 = vector.shape_cast %168 : vector<1x2x32xf32> to vector<2x32xf32>
    %170 = vector.shape_cast %161 : vector<2x32xf32> to vector<1x2x32xf32>
    tpu.vector_store %arg10[%167, %c0_57, %c0_58], %170 {strides = array<i32>} : memref<8x2x32xf32, #tpu.memory_space<vmem>>, vector<1x2x32xf32>,
    %c2_i32_59 = arith.constant 2 : i32
    %cst_60 = arith.constant dense<0.000000e+00> : vector<2x96xf32>
    %171 = tpu.matmul %134, %14, %cst_60 {dimension_numbers = #tpu.dot_dimension_numbers<[1], [0], [0], [1], [0, 0, 1, 1], [], []>} : vector<2x32xf32>, vector<32x96xf32>, vector<2x96xf32> -> vector<2x96xf32>
    %cst_61 = arith.constant dense<0.000000e+00> : vector<2x96xf32>
    %172 = tpu.matmul %161, %15, %cst_61 {dimension_numbers = #tpu.dot_dimension_numbers<[1], [0], [0], [1], [0, 0, 1, 1], [], []>} : vector<2x32xf32>, vector<32x96xf32>, vector<2x96xf32> -> vector<2x96xf32>
    %c2_i32_62 = arith.constant 2 : i32
    %173 = arith.muli %c2_i32_59, %c2_i32_62 : i32
    %174 = tpu.assume_multiple %173, 2 : i32
    %c7_i32_63 = arith.constant 7 : i32
    %175 = arith.subi %c7_i32_63, %c2_i32_59 : i32
    %c2_i32_64 = arith.constant 2 : i32
    %176 = arith.muli %175, %c2_i32_64 : i32
    %177 = tpu.assume_multiple %176, 2 : i32
    %178 = arith.index_cast %174 : i32 to index
    %c0_65 = arith.constant 0 : index
    %179 = vector.load %arg11[%178, %c0_65] : memref<16x96xf32, #tpu.memory_space<vmem>>, vector<2x96xf32>
    %180 = arith.index_cast %177 : i32 to index
    %c0_66 = arith.constant 0 : index
    %181 = vector.load %arg12[%180, %c0_66] : memref<16x96xf32, #tpu.memory_space<vmem>>, vector<2x96xf32>
    %182 = vector.extract_strided_slice %179 {offsets = [0, 0], sizes = [2, 32], strides = [1, 1]} : vector<2x96xf32> to vector<2x32xf32>
    %183 = vector.extract_strided_slice %171 {offsets = [0, 0], sizes = [2, 32], strides = [1, 1]} : vector<2x96xf32> to vector<2x32xf32>
    %184 = arith.addf %182, %183 : vector<2x32xf32>
    %185 = arith.negf %184 : vector<2x32xf32>
    %186 = math.exp %185 : vector<2x32xf32>
    %cst_67 = arith.constant 1.000000e+00 : f32
    %187 = vector.broadcast %cst_67 : f32 to vector<2x32xf32>
    %188 = arith.addf %187, %186 : vector<2x32xf32>
    %189 = arith.divf %187, %188 : vector<2x32xf32>
    %190 = vector.extract_strided_slice %179 {offsets = [0, 32], sizes = [2, 32], strides = [1, 1]} : vector<2x96xf32> to vector<2x32xf32>
    %191 = vector.extract_strided_slice %171 {offsets = [0, 32], sizes = [2, 32], strides = [1, 1]} : vector<2x96xf32> to vector<2x32xf32>
    %192 = arith.addf %190, %191 : vector<2x32xf32>
    %193 = arith.negf %192 : vector<2x32xf32>
    %194 = math.exp %193 : vector<2x32xf32>
    %cst_68 = arith.constant 1.000000e+00 : f32
    %195 = vector.broadcast %cst_68 : f32 to vector<2x32xf32>
    %196 = arith.addf %195, %194 : vector<2x32xf32>
    %197 = arith.divf %195, %196 : vector<2x32xf32>
    %198 = vector.extract_strided_slice %179 {offsets = [0, 64], sizes = [2, 32], strides = [1, 1]} : vector<2x96xf32> to vector<2x32xf32>
    %199 = vector.extract_strided_slice %171 {offsets = [0, 64], sizes = [2, 32], strides = [1, 1]} : vector<2x96xf32> to vector<2x32xf32>
    %200 = arith.addf %199, %18 : vector<2x32xf32>
    %201 = arith.mulf %189, %200 : vector<2x32xf32>
    %202 = arith.addf %198, %201 : vector<2x32xf32>
    %203 = math.tanh %202 : vector<2x32xf32>
    %cst_69 = arith.constant 1.000000e+00 : f32
    %204 = vector.broadcast %cst_69 : f32 to vector<2x32xf32>
    %205 = arith.subf %204, %197 : vector<2x32xf32>
    %206 = arith.mulf %205, %203 : vector<2x32xf32>
    %207 = arith.mulf %197, %134 : vector<2x32xf32>
    %208 = arith.addf %206, %207 : vector<2x32xf32>
    %209 = vector.extract_strided_slice %181 {offsets = [0, 0], sizes = [2, 32], strides = [1, 1]} : vector<2x96xf32> to vector<2x32xf32>
    %210 = vector.extract_strided_slice %172 {offsets = [0, 0], sizes = [2, 32], strides = [1, 1]} : vector<2x96xf32> to vector<2x32xf32>
    %211 = arith.addf %209, %210 : vector<2x32xf32>
    %212 = arith.negf %211 : vector<2x32xf32>
    %213 = math.exp %212 : vector<2x32xf32>
    %cst_70 = arith.constant 1.000000e+00 : f32
    %214 = vector.broadcast %cst_70 : f32 to vector<2x32xf32>
    %215 = arith.addf %214, %213 : vector<2x32xf32>
    %216 = arith.divf %214, %215 : vector<2x32xf32>
    %217 = vector.extract_strided_slice %181 {offsets = [0, 32], sizes = [2, 32], strides = [1, 1]} : vector<2x96xf32> to vector<2x32xf32>
    %218 = vector.extract_strided_slice %172 {offsets = [0, 32], sizes = [2, 32], strides = [1, 1]} : vector<2x96xf32> to vector<2x32xf32>
    %219 = arith.addf %217, %218 : vector<2x32xf32>
    %220 = arith.negf %219 : vector<2x32xf32>
    %221 = math.exp %220 : vector<2x32xf32>
    %cst_71 = arith.constant 1.000000e+00 : f32
    %222 = vector.broadcast %cst_71 : f32 to vector<2x32xf32>
    %223 = arith.addf %222, %221 : vector<2x32xf32>
    %224 = arith.divf %222, %223 : vector<2x32xf32>
    %225 = vector.extract_strided_slice %181 {offsets = [0, 64], sizes = [2, 32], strides = [1, 1]} : vector<2x96xf32> to vector<2x32xf32>
    %226 = vector.extract_strided_slice %172 {offsets = [0, 64], sizes = [2, 32], strides = [1, 1]} : vector<2x96xf32> to vector<2x32xf32>
    %227 = arith.addf %226, %21 : vector<2x32xf32>
    %228 = arith.mulf %216, %227 : vector<2x32xf32>
    %229 = arith.addf %225, %228 : vector<2x32xf32>
    %230 = math.tanh %229 : vector<2x32xf32>
    %cst_72 = arith.constant 1.000000e+00 : f32
    %231 = vector.broadcast %cst_72 : f32 to vector<2x32xf32>
    %232 = arith.subf %231, %224 : vector<2x32xf32>
    %233 = arith.mulf %232, %230 : vector<2x32xf32>
    %234 = arith.mulf %224, %161 : vector<2x32xf32>
    %235 = arith.addf %233, %234 : vector<2x32xf32>
    %236 = arith.index_cast %c2_i32_59 : i32 to index
    %c0_73 = arith.constant 0 : index
    %c0_74 = arith.constant 0 : index
    %237 = vector.load %arg9[%236, %c0_73, %c0_74] : memref<8x2x32xf32, #tpu.memory_space<vmem>>, vector<1x2x32xf32>
    %238 = vector.shape_cast %237 : vector<1x2x32xf32> to vector<2x32xf32>
    %239 = vector.shape_cast %208 : vector<2x32xf32> to vector<1x2x32xf32>
    tpu.vector_store %arg9[%236, %c0_73, %c0_74], %239 {strides = array<i32>} : memref<8x2x32xf32, #tpu.memory_space<vmem>>, vector<1x2x32xf32>,
    %c7_i32_75 = arith.constant 7 : i32
    %240 = arith.subi %c7_i32_75, %c2_i32_59 : i32
    %241 = arith.index_cast %240 : i32 to index
    %c0_76 = arith.constant 0 : index
    %c0_77 = arith.constant 0 : index
    %242 = vector.load %arg10[%241, %c0_76, %c0_77] : memref<8x2x32xf32, #tpu.memory_space<vmem>>, vector<1x2x32xf32>
    %243 = vector.shape_cast %242 : vector<1x2x32xf32> to vector<2x32xf32>
    %244 = vector.shape_cast %235 : vector<2x32xf32> to vector<1x2x32xf32>
    tpu.vector_store %arg10[%241, %c0_76, %c0_77], %244 {strides = array<i32>} : memref<8x2x32xf32, #tpu.memory_space<vmem>>, vector<1x2x32xf32>,
    %c3_i32 = arith.constant 3 : i32
    %cst_78 = arith.constant dense<0.000000e+00> : vector<2x96xf32>
    %245 = tpu.matmul %208, %14, %cst_78 {dimension_numbers = #tpu.dot_dimension_numbers<[1], [0], [0], [1], [0, 0, 1, 1], [], []>} : vector<2x32xf32>, vector<32x96xf32>, vector<2x96xf32> -> vector<2x96xf32>
    %cst_79 = arith.constant dense<0.000000e+00> : vector<2x96xf32>
    %246 = tpu.matmul %235, %15, %cst_79 {dimension_numbers = #tpu.dot_dimension_numbers<[1], [0], [0], [1], [0, 0, 1, 1], [], []>} : vector<2x32xf32>, vector<32x96xf32>, vector<2x96xf32> -> vector<2x96xf32>
    %c2_i32_80 = arith.constant 2 : i32
    %247 = arith.muli %c3_i32, %c2_i32_80 : i32
    %248 = tpu.assume_multiple %247, 2 : i32
    %c7_i32_81 = arith.constant 7 : i32
    %249 = arith.subi %c7_i32_81, %c3_i32 : i32
    %c2_i32_82 = arith.constant 2 : i32
    %250 = arith.muli %249, %c2_i32_82 : i32
    %251 = tpu.assume_multiple %250, 2 : i32
    %252 = arith.index_cast %248 : i32 to index
    %c0_83 = arith.constant 0 : index
    %253 = vector.load %arg11[%252, %c0_83] : memref<16x96xf32, #tpu.memory_space<vmem>>, vector<2x96xf32>
    %254 = arith.index_cast %251 : i32 to index
    %c0_84 = arith.constant 0 : index
    %255 = vector.load %arg12[%254, %c0_84] : memref<16x96xf32, #tpu.memory_space<vmem>>, vector<2x96xf32>
    %256 = vector.extract_strided_slice %253 {offsets = [0, 0], sizes = [2, 32], strides = [1, 1]} : vector<2x96xf32> to vector<2x32xf32>
    %257 = vector.extract_strided_slice %245 {offsets = [0, 0], sizes = [2, 32], strides = [1, 1]} : vector<2x96xf32> to vector<2x32xf32>
    %258 = arith.addf %256, %257 : vector<2x32xf32>
    %259 = arith.negf %258 : vector<2x32xf32>
    %260 = math.exp %259 : vector<2x32xf32>
    %cst_85 = arith.constant 1.000000e+00 : f32
    %261 = vector.broadcast %cst_85 : f32 to vector<2x32xf32>
    %262 = arith.addf %261, %260 : vector<2x32xf32>
    %263 = arith.divf %261, %262 : vector<2x32xf32>
    %264 = vector.extract_strided_slice %253 {offsets = [0, 32], sizes = [2, 32], strides = [1, 1]} : vector<2x96xf32> to vector<2x32xf32>
    %265 = vector.extract_strided_slice %245 {offsets = [0, 32], sizes = [2, 32], strides = [1, 1]} : vector<2x96xf32> to vector<2x32xf32>
    %266 = arith.addf %264, %265 : vector<2x32xf32>
    %267 = arith.negf %266 : vector<2x32xf32>
    %268 = math.exp %267 : vector<2x32xf32>
    %cst_86 = arith.constant 1.000000e+00 : f32
    %269 = vector.broadcast %cst_86 : f32 to vector<2x32xf32>
    %270 = arith.addf %269, %268 : vector<2x32xf32>
    %271 = arith.divf %269, %270 : vector<2x32xf32>
    %272 = vector.extract_strided_slice %253 {offsets = [0, 64], sizes = [2, 32], strides = [1, 1]} : vector<2x96xf32> to vector<2x32xf32>
    %273 = vector.extract_strided_slice %245 {offsets = [0, 64], sizes = [2, 32], strides = [1, 1]} : vector<2x96xf32> to vector<2x32xf32>
    %274 = arith.addf %273, %18 : vector<2x32xf32>
    %275 = arith.mulf %263, %274 : vector<2x32xf32>
    %276 = arith.addf %272, %275 : vector<2x32xf32>
    %277 = math.tanh %276 : vector<2x32xf32>
    %cst_87 = arith.constant 1.000000e+00 : f32
    %278 = vector.broadcast %cst_87 : f32 to vector<2x32xf32>
    %279 = arith.subf %278, %271 : vector<2x32xf32>
    %280 = arith.mulf %279, %277 : vector<2x32xf32>
    %281 = arith.mulf %271, %208 : vector<2x32xf32>
    %282 = arith.addf %280, %281 : vector<2x32xf32>
    %283 = vector.extract_strided_slice %255 {offsets = [0, 0], sizes = [2, 32], strides = [1, 1]} : vector<2x96xf32> to vector<2x32xf32>
    %284 = vector.extract_strided_slice %246 {offsets = [0, 0], sizes = [2, 32], strides = [1, 1]} : vector<2x96xf32> to vector<2x32xf32>
    %285 = arith.addf %283, %284 : vector<2x32xf32>
    %286 = arith.negf %285 : vector<2x32xf32>
    %287 = math.exp %286 : vector<2x32xf32>
    %cst_88 = arith.constant 1.000000e+00 : f32
    %288 = vector.broadcast %cst_88 : f32 to vector<2x32xf32>
    %289 = arith.addf %288, %287 : vector<2x32xf32>
    %290 = arith.divf %288, %289 : vector<2x32xf32>
    %291 = vector.extract_strided_slice %255 {offsets = [0, 32], sizes = [2, 32], strides = [1, 1]} : vector<2x96xf32> to vector<2x32xf32>
    %292 = vector.extract_strided_slice %246 {offsets = [0, 32], sizes = [2, 32], strides = [1, 1]} : vector<2x96xf32> to vector<2x32xf32>
    %293 = arith.addf %291, %292 : vector<2x32xf32>
    %294 = arith.negf %293 : vector<2x32xf32>
    %295 = math.exp %294 : vector<2x32xf32>
    %cst_89 = arith.constant 1.000000e+00 : f32
    %296 = vector.broadcast %cst_89 : f32 to vector<2x32xf32>
    %297 = arith.addf %296, %295 : vector<2x32xf32>
    %298 = arith.divf %296, %297 : vector<2x32xf32>
    %299 = vector.extract_strided_slice %255 {offsets = [0, 64], sizes = [2, 32], strides = [1, 1]} : vector<2x96xf32> to vector<2x32xf32>
    %300 = vector.extract_strided_slice %246 {offsets = [0, 64], sizes = [2, 32], strides = [1, 1]} : vector<2x96xf32> to vector<2x32xf32>
    %301 = arith.addf %300, %21 : vector<2x32xf32>
    %302 = arith.mulf %290, %301 : vector<2x32xf32>
    %303 = arith.addf %299, %302 : vector<2x32xf32>
    %304 = math.tanh %303 : vector<2x32xf32>
    %cst_90 = arith.constant 1.000000e+00 : f32
    %305 = vector.broadcast %cst_90 : f32 to vector<2x32xf32>
    %306 = arith.subf %305, %298 : vector<2x32xf32>
    %307 = arith.mulf %306, %304 : vector<2x32xf32>
    %308 = arith.mulf %298, %235 : vector<2x32xf32>
    %309 = arith.addf %307, %308 : vector<2x32xf32>
    %310 = arith.index_cast %c3_i32 : i32 to index
    %c0_91 = arith.constant 0 : index
    %c0_92 = arith.constant 0 : index
    %311 = vector.load %arg9[%310, %c0_91, %c0_92] : memref<8x2x32xf32, #tpu.memory_space<vmem>>, vector<1x2x32xf32>
    %312 = vector.shape_cast %311 : vector<1x2x32xf32> to vector<2x32xf32>
    %313 = vector.shape_cast %282 : vector<2x32xf32> to vector<1x2x32xf32>
    tpu.vector_store %arg9[%310, %c0_91, %c0_92], %313 {strides = array<i32>} : memref<8x2x32xf32, #tpu.memory_space<vmem>>, vector<1x2x32xf32>,
    %c7_i32_93 = arith.constant 7 : i32
    %314 = arith.subi %c7_i32_93, %c3_i32 : i32
    %315 = arith.index_cast %314 : i32 to index
    %c0_94 = arith.constant 0 : index
    %c0_95 = arith.constant 0 : index
    %316 = vector.load %arg10[%315, %c0_94, %c0_95] : memref<8x2x32xf32, #tpu.memory_space<vmem>>, vector<1x2x32xf32>
    %317 = vector.shape_cast %316 : vector<1x2x32xf32> to vector<2x32xf32>
    %318 = vector.shape_cast %309 : vector<2x32xf32> to vector<1x2x32xf32>
    tpu.vector_store %arg10[%315, %c0_94, %c0_95], %318 {strides = array<i32>} : memref<8x2x32xf32, #tpu.memory_space<vmem>>, vector<1x2x32xf32>,
    %c4_i32 = arith.constant 4 : i32
    %cst_96 = arith.constant dense<0.000000e+00> : vector<2x96xf32>
    %319 = tpu.matmul %282, %14, %cst_96 {dimension_numbers = #tpu.dot_dimension_numbers<[1], [0], [0], [1], [0, 0, 1, 1], [], []>} : vector<2x32xf32>, vector<32x96xf32>, vector<2x96xf32> -> vector<2x96xf32>
    %cst_97 = arith.constant dense<0.000000e+00> : vector<2x96xf32>
    %320 = tpu.matmul %309, %15, %cst_97 {dimension_numbers = #tpu.dot_dimension_numbers<[1], [0], [0], [1], [0, 0, 1, 1], [], []>} : vector<2x32xf32>, vector<32x96xf32>, vector<2x96xf32> -> vector<2x96xf32>
    %c2_i32_98 = arith.constant 2 : i32
    %321 = arith.muli %c4_i32, %c2_i32_98 : i32
    %322 = tpu.assume_multiple %321, 2 : i32
    %c7_i32_99 = arith.constant 7 : i32
    %323 = arith.subi %c7_i32_99, %c4_i32 : i32
    %c2_i32_100 = arith.constant 2 : i32
    %324 = arith.muli %323, %c2_i32_100 : i32
    %325 = tpu.assume_multiple %324, 2 : i32
    %326 = arith.index_cast %322 : i32 to index
    %c0_101 = arith.constant 0 : index
    %327 = vector.load %arg11[%326, %c0_101] : memref<16x96xf32, #tpu.memory_space<vmem>>, vector<2x96xf32>
    %328 = arith.index_cast %325 : i32 to index
    %c0_102 = arith.constant 0 : index
    %329 = vector.load %arg12[%328, %c0_102] : memref<16x96xf32, #tpu.memory_space<vmem>>, vector<2x96xf32>
    %330 = vector.extract_strided_slice %327 {offsets = [0, 0], sizes = [2, 32], strides = [1, 1]} : vector<2x96xf32> to vector<2x32xf32>
    %331 = vector.extract_strided_slice %319 {offsets = [0, 0], sizes = [2, 32], strides = [1, 1]} : vector<2x96xf32> to vector<2x32xf32>
    %332 = arith.addf %330, %331 : vector<2x32xf32>
    %333 = arith.negf %332 : vector<2x32xf32>
    %334 = math.exp %333 : vector<2x32xf32>
    %cst_103 = arith.constant 1.000000e+00 : f32
    %335 = vector.broadcast %cst_103 : f32 to vector<2x32xf32>
    %336 = arith.addf %335, %334 : vector<2x32xf32>
    %337 = arith.divf %335, %336 : vector<2x32xf32>
    %338 = vector.extract_strided_slice %327 {offsets = [0, 32], sizes = [2, 32], strides = [1, 1]} : vector<2x96xf32> to vector<2x32xf32>
    %339 = vector.extract_strided_slice %319 {offsets = [0, 32], sizes = [2, 32], strides = [1, 1]} : vector<2x96xf32> to vector<2x32xf32>
    %340 = arith.addf %338, %339 : vector<2x32xf32>
    %341 = arith.negf %340 : vector<2x32xf32>
    %342 = math.exp %341 : vector<2x32xf32>
    %cst_104 = arith.constant 1.000000e+00 : f32
    %343 = vector.broadcast %cst_104 : f32 to vector<2x32xf32>
    %344 = arith.addf %343, %342 : vector<2x32xf32>
    %345 = arith.divf %343, %344 : vector<2x32xf32>
    %346 = vector.extract_strided_slice %327 {offsets = [0, 64], sizes = [2, 32], strides = [1, 1]} : vector<2x96xf32> to vector<2x32xf32>
    %347 = vector.extract_strided_slice %319 {offsets = [0, 64], sizes = [2, 32], strides = [1, 1]} : vector<2x96xf32> to vector<2x32xf32>
    %348 = arith.addf %347, %18 : vector<2x32xf32>
    %349 = arith.mulf %337, %348 : vector<2x32xf32>
    %350 = arith.addf %346, %349 : vector<2x32xf32>
    %351 = math.tanh %350 : vector<2x32xf32>
    %cst_105 = arith.constant 1.000000e+00 : f32
    %352 = vector.broadcast %cst_105 : f32 to vector<2x32xf32>
    %353 = arith.subf %352, %345 : vector<2x32xf32>
    %354 = arith.mulf %353, %351 : vector<2x32xf32>
    %355 = arith.mulf %345, %282 : vector<2x32xf32>
    %356 = arith.addf %354, %355 : vector<2x32xf32>
    %357 = vector.extract_strided_slice %329 {offsets = [0, 0], sizes = [2, 32], strides = [1, 1]} : vector<2x96xf32> to vector<2x32xf32>
    %358 = vector.extract_strided_slice %320 {offsets = [0, 0], sizes = [2, 32], strides = [1, 1]} : vector<2x96xf32> to vector<2x32xf32>
    %359 = arith.addf %357, %358 : vector<2x32xf32>
    %360 = arith.negf %359 : vector<2x32xf32>
    %361 = math.exp %360 : vector<2x32xf32>
    %cst_106 = arith.constant 1.000000e+00 : f32
    %362 = vector.broadcast %cst_106 : f32 to vector<2x32xf32>
    %363 = arith.addf %362, %361 : vector<2x32xf32>
    %364 = arith.divf %362, %363 : vector<2x32xf32>
    %365 = vector.extract_strided_slice %329 {offsets = [0, 32], sizes = [2, 32], strides = [1, 1]} : vector<2x96xf32> to vector<2x32xf32>
    %366 = vector.extract_strided_slice %320 {offsets = [0, 32], sizes = [2, 32], strides = [1, 1]} : vector<2x96xf32> to vector<2x32xf32>
    %367 = arith.addf %365, %366 : vector<2x32xf32>
    %368 = arith.negf %367 : vector<2x32xf32>
    %369 = math.exp %368 : vector<2x32xf32>
    %cst_107 = arith.constant 1.000000e+00 : f32
    %370 = vector.broadcast %cst_107 : f32 to vector<2x32xf32>
    %371 = arith.addf %370, %369 : vector<2x32xf32>
    %372 = arith.divf %370, %371 : vector<2x32xf32>
    %373 = vector.extract_strided_slice %329 {offsets = [0, 64], sizes = [2, 32], strides = [1, 1]} : vector<2x96xf32> to vector<2x32xf32>
    %374 = vector.extract_strided_slice %320 {offsets = [0, 64], sizes = [2, 32], strides = [1, 1]} : vector<2x96xf32> to vector<2x32xf32>
    %375 = arith.addf %374, %21 : vector<2x32xf32>
    %376 = arith.mulf %364, %375 : vector<2x32xf32>
    %377 = arith.addf %373, %376 : vector<2x32xf32>
    %378 = math.tanh %377 : vector<2x32xf32>
    %cst_108 = arith.constant 1.000000e+00 : f32
    %379 = vector.broadcast %cst_108 : f32 to vector<2x32xf32>
    %380 = arith.subf %379, %372 : vector<2x32xf32>
    %381 = arith.mulf %380, %378 : vector<2x32xf32>
    %382 = arith.mulf %372, %309 : vector<2x32xf32>
    %383 = arith.addf %381, %382 : vector<2x32xf32>
    %384 = arith.index_cast %c4_i32 : i32 to index
    %c0_109 = arith.constant 0 : index
    %c0_110 = arith.constant 0 : index
    %385 = vector.load %arg9[%384, %c0_109, %c0_110] : memref<8x2x32xf32, #tpu.memory_space<vmem>>, vector<1x2x32xf32>
    %386 = vector.shape_cast %385 : vector<1x2x32xf32> to vector<2x32xf32>
    %387 = vector.shape_cast %356 : vector<2x32xf32> to vector<1x2x32xf32>
    tpu.vector_store %arg9[%384, %c0_109, %c0_110], %387 {strides = array<i32>} : memref<8x2x32xf32, #tpu.memory_space<vmem>>, vector<1x2x32xf32>,
    %c7_i32_111 = arith.constant 7 : i32
    %388 = arith.subi %c7_i32_111, %c4_i32 : i32
    %389 = arith.index_cast %388 : i32 to index
    %c0_112 = arith.constant 0 : index
    %c0_113 = arith.constant 0 : index
    %390 = vector.load %arg10[%389, %c0_112, %c0_113] : memref<8x2x32xf32, #tpu.memory_space<vmem>>, vector<1x2x32xf32>
    %391 = vector.shape_cast %390 : vector<1x2x32xf32> to vector<2x32xf32>
    %392 = vector.shape_cast %383 : vector<2x32xf32> to vector<1x2x32xf32>
    tpu.vector_store %arg10[%389, %c0_112, %c0_113], %392 {strides = array<i32>} : memref<8x2x32xf32, #tpu.memory_space<vmem>>, vector<1x2x32xf32>,
    %c5_i32 = arith.constant 5 : i32
    %cst_114 = arith.constant dense<0.000000e+00> : vector<2x96xf32>
    %393 = tpu.matmul %356, %14, %cst_114 {dimension_numbers = #tpu.dot_dimension_numbers<[1], [0], [0], [1], [0, 0, 1, 1], [], []>} : vector<2x32xf32>, vector<32x96xf32>, vector<2x96xf32> -> vector<2x96xf32>
    %cst_115 = arith.constant dense<0.000000e+00> : vector<2x96xf32>
    %394 = tpu.matmul %383, %15, %cst_115 {dimension_numbers = #tpu.dot_dimension_numbers<[1], [0], [0], [1], [0, 0, 1, 1], [], []>} : vector<2x32xf32>, vector<32x96xf32>, vector<2x96xf32> -> vector<2x96xf32>
    %c2_i32_116 = arith.constant 2 : i32
    %395 = arith.muli %c5_i32, %c2_i32_116 : i32
    %396 = tpu.assume_multiple %395, 2 : i32
    %c7_i32_117 = arith.constant 7 : i32
    %397 = arith.subi %c7_i32_117, %c5_i32 : i32
    %c2_i32_118 = arith.constant 2 : i32
    %398 = arith.muli %397, %c2_i32_118 : i32
    %399 = tpu.assume_multiple %398, 2 : i32
    %400 = arith.index_cast %396 : i32 to index
    %c0_119 = arith.constant 0 : index
    %401 = vector.load %arg11[%400, %c0_119] : memref<16x96xf32, #tpu.memory_space<vmem>>, vector<2x96xf32>
    %402 = arith.index_cast %399 : i32 to index
    %c0_120 = arith.constant 0 : index
    %403 = vector.load %arg12[%402, %c0_120] : memref<16x96xf32, #tpu.memory_space<vmem>>, vector<2x96xf32>
    %404 = vector.extract_strided_slice %401 {offsets = [0, 0], sizes = [2, 32], strides = [1, 1]} : vector<2x96xf32> to vector<2x32xf32>
    %405 = vector.extract_strided_slice %393 {offsets = [0, 0], sizes = [2, 32], strides = [1, 1]} : vector<2x96xf32> to vector<2x32xf32>
    %406 = arith.addf %404, %405 : vector<2x32xf32>
    %407 = arith.negf %406 : vector<2x32xf32>
    %408 = math.exp %407 : vector<2x32xf32>
    %cst_121 = arith.constant 1.000000e+00 : f32
    %409 = vector.broadcast %cst_121 : f32 to vector<2x32xf32>
    %410 = arith.addf %409, %408 : vector<2x32xf32>
    %411 = arith.divf %409, %410 : vector<2x32xf32>
    %412 = vector.extract_strided_slice %401 {offsets = [0, 32], sizes = [2, 32], strides = [1, 1]} : vector<2x96xf32> to vector<2x32xf32>
    %413 = vector.extract_strided_slice %393 {offsets = [0, 32], sizes = [2, 32], strides = [1, 1]} : vector<2x96xf32> to vector<2x32xf32>
    %414 = arith.addf %412, %413 : vector<2x32xf32>
    %415 = arith.negf %414 : vector<2x32xf32>
    %416 = math.exp %415 : vector<2x32xf32>
    %cst_122 = arith.constant 1.000000e+00 : f32
    %417 = vector.broadcast %cst_122 : f32 to vector<2x32xf32>
    %418 = arith.addf %417, %416 : vector<2x32xf32>
    %419 = arith.divf %417, %418 : vector<2x32xf32>
    %420 = vector.extract_strided_slice %401 {offsets = [0, 64], sizes = [2, 32], strides = [1, 1]} : vector<2x96xf32> to vector<2x32xf32>
    %421 = vector.extract_strided_slice %393 {offsets = [0, 64], sizes = [2, 32], strides = [1, 1]} : vector<2x96xf32> to vector<2x32xf32>
    %422 = arith.addf %421, %18 : vector<2x32xf32>
    %423 = arith.mulf %411, %422 : vector<2x32xf32>
    %424 = arith.addf %420, %423 : vector<2x32xf32>
    %425 = math.tanh %424 : vector<2x32xf32>
    %cst_123 = arith.constant 1.000000e+00 : f32
    %426 = vector.broadcast %cst_123 : f32 to vector<2x32xf32>
    %427 = arith.subf %426, %419 : vector<2x32xf32>
    %428 = arith.mulf %427, %425 : vector<2x32xf32>
    %429 = arith.mulf %419, %356 : vector<2x32xf32>
    %430 = arith.addf %428, %429 : vector<2x32xf32>
    %431 = vector.extract_strided_slice %403 {offsets = [0, 0], sizes = [2, 32], strides = [1, 1]} : vector<2x96xf32> to vector<2x32xf32>
    %432 = vector.extract_strided_slice %394 {offsets = [0, 0], sizes = [2, 32], strides = [1, 1]} : vector<2x96xf32> to vector<2x32xf32>
    %433 = arith.addf %431, %432 : vector<2x32xf32>
    %434 = arith.negf %433 : vector<2x32xf32>
    %435 = math.exp %434 : vector<2x32xf32>
    %cst_124 = arith.constant 1.000000e+00 : f32
    %436 = vector.broadcast %cst_124 : f32 to vector<2x32xf32>
    %437 = arith.addf %436, %435 : vector<2x32xf32>
    %438 = arith.divf %436, %437 : vector<2x32xf32>
    %439 = vector.extract_strided_slice %403 {offsets = [0, 32], sizes = [2, 32], strides = [1, 1]} : vector<2x96xf32> to vector<2x32xf32>
    %440 = vector.extract_strided_slice %394 {offsets = [0, 32], sizes = [2, 32], strides = [1, 1]} : vector<2x96xf32> to vector<2x32xf32>
    %441 = arith.addf %439, %440 : vector<2x32xf32>
    %442 = arith.negf %441 : vector<2x32xf32>
    %443 = math.exp %442 : vector<2x32xf32>
    %cst_125 = arith.constant 1.000000e+00 : f32
    %444 = vector.broadcast %cst_125 : f32 to vector<2x32xf32>
    %445 = arith.addf %444, %443 : vector<2x32xf32>
    %446 = arith.divf %444, %445 : vector<2x32xf32>
    %447 = vector.extract_strided_slice %403 {offsets = [0, 64], sizes = [2, 32], strides = [1, 1]} : vector<2x96xf32> to vector<2x32xf32>
    %448 = vector.extract_strided_slice %394 {offsets = [0, 64], sizes = [2, 32], strides = [1, 1]} : vector<2x96xf32> to vector<2x32xf32>
    %449 = arith.addf %448, %21 : vector<2x32xf32>
    %450 = arith.mulf %438, %449 : vector<2x32xf32>
    %451 = arith.addf %447, %450 : vector<2x32xf32>
    %452 = math.tanh %451 : vector<2x32xf32>
    %cst_126 = arith.constant 1.000000e+00 : f32
    %453 = vector.broadcast %cst_126 : f32 to vector<2x32xf32>
    %454 = arith.subf %453, %446 : vector<2x32xf32>
    %455 = arith.mulf %454, %452 : vector<2x32xf32>
    %456 = arith.mulf %446, %383 : vector<2x32xf32>
    %457 = arith.addf %455, %456 : vector<2x32xf32>
    %458 = arith.index_cast %c5_i32 : i32 to index
    %c0_127 = arith.constant 0 : index
    %c0_128 = arith.constant 0 : index
    %459 = vector.load %arg9[%458, %c0_127, %c0_128] : memref<8x2x32xf32, #tpu.memory_space<vmem>>, vector<1x2x32xf32>
    %460 = vector.shape_cast %459 : vector<1x2x32xf32> to vector<2x32xf32>
    %461 = vector.shape_cast %430 : vector<2x32xf32> to vector<1x2x32xf32>
    tpu.vector_store %arg9[%458, %c0_127, %c0_128], %461 {strides = array<i32>} : memref<8x2x32xf32, #tpu.memory_space<vmem>>, vector<1x2x32xf32>,
    %c7_i32_129 = arith.constant 7 : i32
    %462 = arith.subi %c7_i32_129, %c5_i32 : i32
    %463 = arith.index_cast %462 : i32 to index
    %c0_130 = arith.constant 0 : index
    %c0_131 = arith.constant 0 : index
    %464 = vector.load %arg10[%463, %c0_130, %c0_131] : memref<8x2x32xf32, #tpu.memory_space<vmem>>, vector<1x2x32xf32>
    %465 = vector.shape_cast %464 : vector<1x2x32xf32> to vector<2x32xf32>
    %466 = vector.shape_cast %457 : vector<2x32xf32> to vector<1x2x32xf32>
    tpu.vector_store %arg10[%463, %c0_130, %c0_131], %466 {strides = array<i32>} : memref<8x2x32xf32, #tpu.memory_space<vmem>>, vector<1x2x32xf32>,
    %c6_i32 = arith.constant 6 : i32
    %cst_132 = arith.constant dense<0.000000e+00> : vector<2x96xf32>
    %467 = tpu.matmul %430, %14, %cst_132 {dimension_numbers = #tpu.dot_dimension_numbers<[1], [0], [0], [1], [0, 0, 1, 1], [], []>} : vector<2x32xf32>, vector<32x96xf32>, vector<2x96xf32> -> vector<2x96xf32>
    %cst_133 = arith.constant dense<0.000000e+00> : vector<2x96xf32>
    %468 = tpu.matmul %457, %15, %cst_133 {dimension_numbers = #tpu.dot_dimension_numbers<[1], [0], [0], [1], [0, 0, 1, 1], [], []>} : vector<2x32xf32>, vector<32x96xf32>, vector<2x96xf32> -> vector<2x96xf32>
    %c2_i32_134 = arith.constant 2 : i32
    %469 = arith.muli %c6_i32, %c2_i32_134 : i32
    %470 = tpu.assume_multiple %469, 2 : i32
    %c7_i32_135 = arith.constant 7 : i32
    %471 = arith.subi %c7_i32_135, %c6_i32 : i32
    %c2_i32_136 = arith.constant 2 : i32
    %472 = arith.muli %471, %c2_i32_136 : i32
    %473 = tpu.assume_multiple %472, 2 : i32
    %474 = arith.index_cast %470 : i32 to index
    %c0_137 = arith.constant 0 : index
    %475 = vector.load %arg11[%474, %c0_137] : memref<16x96xf32, #tpu.memory_space<vmem>>, vector<2x96xf32>
    %476 = arith.index_cast %473 : i32 to index
    %c0_138 = arith.constant 0 : index
    %477 = vector.load %arg12[%476, %c0_138] : memref<16x96xf32, #tpu.memory_space<vmem>>, vector<2x96xf32>
    %478 = vector.extract_strided_slice %475 {offsets = [0, 0], sizes = [2, 32], strides = [1, 1]} : vector<2x96xf32> to vector<2x32xf32>
    %479 = vector.extract_strided_slice %467 {offsets = [0, 0], sizes = [2, 32], strides = [1, 1]} : vector<2x96xf32> to vector<2x32xf32>
    %480 = arith.addf %478, %479 : vector<2x32xf32>
    %481 = arith.negf %480 : vector<2x32xf32>
    %482 = math.exp %481 : vector<2x32xf32>
    %cst_139 = arith.constant 1.000000e+00 : f32
    %483 = vector.broadcast %cst_139 : f32 to vector<2x32xf32>
    %484 = arith.addf %483, %482 : vector<2x32xf32>
    %485 = arith.divf %483, %484 : vector<2x32xf32>
    %486 = vector.extract_strided_slice %475 {offsets = [0, 32], sizes = [2, 32], strides = [1, 1]} : vector<2x96xf32> to vector<2x32xf32>
    %487 = vector.extract_strided_slice %467 {offsets = [0, 32], sizes = [2, 32], strides = [1, 1]} : vector<2x96xf32> to vector<2x32xf32>
    %488 = arith.addf %486, %487 : vector<2x32xf32>
    %489 = arith.negf %488 : vector<2x32xf32>
    %490 = math.exp %489 : vector<2x32xf32>
    %cst_140 = arith.constant 1.000000e+00 : f32
    %491 = vector.broadcast %cst_140 : f32 to vector<2x32xf32>
    %492 = arith.addf %491, %490 : vector<2x32xf32>
    %493 = arith.divf %491, %492 : vector<2x32xf32>
    %494 = vector.extract_strided_slice %475 {offsets = [0, 64], sizes = [2, 32], strides = [1, 1]} : vector<2x96xf32> to vector<2x32xf32>
    %495 = vector.extract_strided_slice %467 {offsets = [0, 64], sizes = [2, 32], strides = [1, 1]} : vector<2x96xf32> to vector<2x32xf32>
    %496 = arith.addf %495, %18 : vector<2x32xf32>
    %497 = arith.mulf %485, %496 : vector<2x32xf32>
    %498 = arith.addf %494, %497 : vector<2x32xf32>
    %499 = math.tanh %498 : vector<2x32xf32>
    %cst_141 = arith.constant 1.000000e+00 : f32
    %500 = vector.broadcast %cst_141 : f32 to vector<2x32xf32>
    %501 = arith.subf %500, %493 : vector<2x32xf32>
    %502 = arith.mulf %501, %499 : vector<2x32xf32>
    %503 = arith.mulf %493, %430 : vector<2x32xf32>
    %504 = arith.addf %502, %503 : vector<2x32xf32>
    %505 = vector.extract_strided_slice %477 {offsets = [0, 0], sizes = [2, 32], strides = [1, 1]} : vector<2x96xf32> to vector<2x32xf32>
    %506 = vector.extract_strided_slice %468 {offsets = [0, 0], sizes = [2, 32], strides = [1, 1]} : vector<2x96xf32> to vector<2x32xf32>
    %507 = arith.addf %505, %506 : vector<2x32xf32>
    %508 = arith.negf %507 : vector<2x32xf32>
    %509 = math.exp %508 : vector<2x32xf32>
    %cst_142 = arith.constant 1.000000e+00 : f32
    %510 = vector.broadcast %cst_142 : f32 to vector<2x32xf32>
    %511 = arith.addf %510, %509 : vector<2x32xf32>
    %512 = arith.divf %510, %511 : vector<2x32xf32>
    %513 = vector.extract_strided_slice %477 {offsets = [0, 32], sizes = [2, 32], strides = [1, 1]} : vector<2x96xf32> to vector<2x32xf32>
    %514 = vector.extract_strided_slice %468 {offsets = [0, 32], sizes = [2, 32], strides = [1, 1]} : vector<2x96xf32> to vector<2x32xf32>
    %515 = arith.addf %513, %514 : vector<2x32xf32>
    %516 = arith.negf %515 : vector<2x32xf32>
    %517 = math.exp %516 : vector<2x32xf32>
    %cst_143 = arith.constant 1.000000e+00 : f32
    %518 = vector.broadcast %cst_143 : f32 to vector<2x32xf32>
    %519 = arith.addf %518, %517 : vector<2x32xf32>
    %520 = arith.divf %518, %519 : vector<2x32xf32>
    %521 = vector.extract_strided_slice %477 {offsets = [0, 64], sizes = [2, 32], strides = [1, 1]} : vector<2x96xf32> to vector<2x32xf32>
    %522 = vector.extract_strided_slice %468 {offsets = [0, 64], sizes = [2, 32], strides = [1, 1]} : vector<2x96xf32> to vector<2x32xf32>
    %523 = arith.addf %522, %21 : vector<2x32xf32>
    %524 = arith.mulf %512, %523 : vector<2x32xf32>
    %525 = arith.addf %521, %524 : vector<2x32xf32>
    %526 = math.tanh %525 : vector<2x32xf32>
    %cst_144 = arith.constant 1.000000e+00 : f32
    %527 = vector.broadcast %cst_144 : f32 to vector<2x32xf32>
    %528 = arith.subf %527, %520 : vector<2x32xf32>
    %529 = arith.mulf %528, %526 : vector<2x32xf32>
    %530 = arith.mulf %520, %457 : vector<2x32xf32>
    %531 = arith.addf %529, %530 : vector<2x32xf32>
    %532 = arith.index_cast %c6_i32 : i32 to index
    %c0_145 = arith.constant 0 : index
    %c0_146 = arith.constant 0 : index
    %533 = vector.load %arg9[%532, %c0_145, %c0_146] : memref<8x2x32xf32, #tpu.memory_space<vmem>>, vector<1x2x32xf32>
    %534 = vector.shape_cast %533 : vector<1x2x32xf32> to vector<2x32xf32>
    %535 = vector.shape_cast %504 : vector<2x32xf32> to vector<1x2x32xf32>
    tpu.vector_store %arg9[%532, %c0_145, %c0_146], %535 {strides = array<i32>} : memref<8x2x32xf32, #tpu.memory_space<vmem>>, vector<1x2x32xf32>,
    %c7_i32_147 = arith.constant 7 : i32
    %536 = arith.subi %c7_i32_147, %c6_i32 : i32
    %537 = arith.index_cast %536 : i32 to index
    %c0_148 = arith.constant 0 : index
    %c0_149 = arith.constant 0 : index
    %538 = vector.load %arg10[%537, %c0_148, %c0_149] : memref<8x2x32xf32, #tpu.memory_space<vmem>>, vector<1x2x32xf32>
    %539 = vector.shape_cast %538 : vector<1x2x32xf32> to vector<2x32xf32>
    %540 = vector.shape_cast %531 : vector<2x32xf32> to vector<1x2x32xf32>
    tpu.vector_store %arg10[%537, %c0_148, %c0_149], %540 {strides = array<i32>} : memref<8x2x32xf32, #tpu.memory_space<vmem>>, vector<1x2x32xf32>,
    %c7_i32_150 = arith.constant 7 : i32
    %cst_151 = arith.constant dense<0.000000e+00> : vector<2x96xf32>
    %541 = tpu.matmul %504, %14, %cst_151 {dimension_numbers = #tpu.dot_dimension_numbers<[1], [0], [0], [1], [0, 0, 1, 1], [], []>} : vector<2x32xf32>, vector<32x96xf32>, vector<2x96xf32> -> vector<2x96xf32>
    %cst_152 = arith.constant dense<0.000000e+00> : vector<2x96xf32>
    %542 = tpu.matmul %531, %15, %cst_152 {dimension_numbers = #tpu.dot_dimension_numbers<[1], [0], [0], [1], [0, 0, 1, 1], [], []>} : vector<2x32xf32>, vector<32x96xf32>, vector<2x96xf32> -> vector<2x96xf32>
    %c2_i32_153 = arith.constant 2 : i32
    %543 = arith.muli %c7_i32_150, %c2_i32_153 : i32
    %544 = tpu.assume_multiple %543, 2 : i32
    %c7_i32_154 = arith.constant 7 : i32
    %545 = arith.subi %c7_i32_154, %c7_i32_150 : i32
    %c2_i32_155 = arith.constant 2 : i32
    %546 = arith.muli %545, %c2_i32_155 : i32
    %547 = tpu.assume_multiple %546, 2 : i32
    %548 = arith.index_cast %544 : i32 to index
    %c0_156 = arith.constant 0 : index
    %549 = vector.load %arg11[%548, %c0_156] : memref<16x96xf32, #tpu.memory_space<vmem>>, vector<2x96xf32>
    %550 = arith.index_cast %547 : i32 to index
    %c0_157 = arith.constant 0 : index
    %551 = vector.load %arg12[%550, %c0_157] : memref<16x96xf32, #tpu.memory_space<vmem>>, vector<2x96xf32>
    %552 = vector.extract_strided_slice %549 {offsets = [0, 0], sizes = [2, 32], strides = [1, 1]} : vector<2x96xf32> to vector<2x32xf32>
    %553 = vector.extract_strided_slice %541 {offsets = [0, 0], sizes = [2, 32], strides = [1, 1]} : vector<2x96xf32> to vector<2x32xf32>
    %554 = arith.addf %552, %553 : vector<2x32xf32>
    %555 = arith.negf %554 : vector<2x32xf32>
    %556 = math.exp %555 : vector<2x32xf32>
    %cst_158 = arith.constant 1.000000e+00 : f32
    %557 = vector.broadcast %cst_158 : f32 to vector<2x32xf32>
    %558 = arith.addf %557, %556 : vector<2x32xf32>
    %559 = arith.divf %557, %558 : vector<2x32xf32>
    %560 = vector.extract_strided_slice %549 {offsets = [0, 32], sizes = [2, 32], strides = [1, 1]} : vector<2x96xf32> to vector<2x32xf32>
    %561 = vector.extract_strided_slice %541 {offsets = [0, 32], sizes = [2, 32], strides = [1, 1]} : vector<2x96xf32> to vector<2x32xf32>
    %562 = arith.addf %560, %561 : vector<2x32xf32>
    %563 = arith.negf %562 : vector<2x32xf32>
    %564 = math.exp %563 : vector<2x32xf32>
    %cst_159 = arith.constant 1.000000e+00 : f32
    %565 = vector.broadcast %cst_159 : f32 to vector<2x32xf32>
    %566 = arith.addf %565, %564 : vector<2x32xf32>
    %567 = arith.divf %565, %566 : vector<2x32xf32>
    %568 = vector.extract_strided_slice %549 {offsets = [0, 64], sizes = [2, 32], strides = [1, 1]} : vector<2x96xf32> to vector<2x32xf32>
    %569 = vector.extract_strided_slice %541 {offsets = [0, 64], sizes = [2, 32], strides = [1, 1]} : vector<2x96xf32> to vector<2x32xf32>
    %570 = arith.addf %569, %18 : vector<2x32xf32>
    %571 = arith.mulf %559, %570 : vector<2x32xf32>
    %572 = arith.addf %568, %571 : vector<2x32xf32>
    %573 = math.tanh %572 : vector<2x32xf32>
    %cst_160 = arith.constant 1.000000e+00 : f32
    %574 = vector.broadcast %cst_160 : f32 to vector<2x32xf32>
    %575 = arith.subf %574, %567 : vector<2x32xf32>
    %576 = arith.mulf %575, %573 : vector<2x32xf32>
    %577 = arith.mulf %567, %504 : vector<2x32xf32>
    %578 = arith.addf %576, %577 : vector<2x32xf32>
    %579 = vector.extract_strided_slice %551 {offsets = [0, 0], sizes = [2, 32], strides = [1, 1]} : vector<2x96xf32> to vector<2x32xf32>
    %580 = vector.extract_strided_slice %542 {offsets = [0, 0], sizes = [2, 32], strides = [1, 1]} : vector<2x96xf32> to vector<2x32xf32>
    %581 = arith.addf %579, %580 : vector<2x32xf32>
    %582 = arith.negf %581 : vector<2x32xf32>
    %583 = math.exp %582 : vector<2x32xf32>
    %cst_161 = arith.constant 1.000000e+00 : f32
    %584 = vector.broadcast %cst_161 : f32 to vector<2x32xf32>
    %585 = arith.addf %584, %583 : vector<2x32xf32>
    %586 = arith.divf %584, %585 : vector<2x32xf32>
    %587 = vector.extract_strided_slice %551 {offsets = [0, 32], sizes = [2, 32], strides = [1, 1]} : vector<2x96xf32> to vector<2x32xf32>
    %588 = vector.extract_strided_slice %542 {offsets = [0, 32], sizes = [2, 32], strides = [1, 1]} : vector<2x96xf32> to vector<2x32xf32>
    %589 = arith.addf %587, %588 : vector<2x32xf32>
    %590 = arith.negf %589 : vector<2x32xf32>
    %591 = math.exp %590 : vector<2x32xf32>
    %cst_162 = arith.constant 1.000000e+00 : f32
    %592 = vector.broadcast %cst_162 : f32 to vector<2x32xf32>
    %593 = arith.addf %592, %591 : vector<2x32xf32>
    %594 = arith.divf %592, %593 : vector<2x32xf32>
    %595 = vector.extract_strided_slice %551 {offsets = [0, 64], sizes = [2, 32], strides = [1, 1]} : vector<2x96xf32> to vector<2x32xf32>
    %596 = vector.extract_strided_slice %542 {offsets = [0, 64], sizes = [2, 32], strides = [1, 1]} : vector<2x96xf32> to vector<2x32xf32>
    %597 = arith.addf %596, %21 : vector<2x32xf32>
    %598 = arith.mulf %586, %597 : vector<2x32xf32>
    %599 = arith.addf %595, %598 : vector<2x32xf32>
    %600 = math.tanh %599 : vector<2x32xf32>
    %cst_163 = arith.constant 1.000000e+00 : f32
    %601 = vector.broadcast %cst_163 : f32 to vector<2x32xf32>
    %602 = arith.subf %601, %594 : vector<2x32xf32>
    %603 = arith.mulf %602, %600 : vector<2x32xf32>
    %604 = arith.mulf %594, %531 : vector<2x32xf32>
    %605 = arith.addf %603, %604 : vector<2x32xf32>
    %606 = arith.index_cast %c7_i32_150 : i32 to index
    %c0_164 = arith.constant 0 : index
    %c0_165 = arith.constant 0 : index
    %607 = vector.load %arg9[%606, %c0_164, %c0_165] : memref<8x2x32xf32, #tpu.memory_space<vmem>>, vector<1x2x32xf32>
    %608 = vector.shape_cast %607 : vector<1x2x32xf32> to vector<2x32xf32>
    %609 = vector.shape_cast %578 : vector<2x32xf32> to vector<1x2x32xf32>
    tpu.vector_store %arg9[%606, %c0_164, %c0_165], %609 {strides = array<i32>} : memref<8x2x32xf32, #tpu.memory_space<vmem>>, vector<1x2x32xf32>,
    %c7_i32_166 = arith.constant 7 : i32
    %610 = arith.subi %c7_i32_166, %c7_i32_150 : i32
    %611 = arith.index_cast %610 : i32 to index
    %c0_167 = arith.constant 0 : index
    %c0_168 = arith.constant 0 : index
    %612 = vector.load %arg10[%611, %c0_167, %c0_168] : memref<8x2x32xf32, #tpu.memory_space<vmem>>, vector<1x2x32xf32>
    %613 = vector.shape_cast %612 : vector<1x2x32xf32> to vector<2x32xf32>
    %614 = vector.shape_cast %605 : vector<2x32xf32> to vector<1x2x32xf32>
    tpu.vector_store %arg10[%611, %c0_167, %c0_168], %614 {strides = array<i32>} : memref<8x2x32xf32, #tpu.memory_space<vmem>>, vector<1x2x32xf32>,
    %c8_i32 = arith.constant 8 : i32
    return
  }
}

module attributes {stable_mosaic.version = 11 : i64} {
  func.func @kernel(%arg0: memref<16x32xf32, #tpu.memory_space<vmem>>, %arg1: memref<16x32xf32, #tpu.memory_space<vmem>>, %arg2: memref<32x96xf32, #tpu.memory_space<vmem>>, %arg3: memref<32x96xf32, #tpu.memory_space<vmem>>, %arg4: memref<32x96xf32, #tpu.memory_space<vmem>>, %arg5: memref<32x96xf32, #tpu.memory_space<vmem>>, %arg6: memref<32x96xf32, #tpu.memory_space<vmem>>, %arg7: memref<32x96xf32, #tpu.memory_space<vmem>>, %arg8: memref<1x96xf32, #tpu.memory_space<vmem>>, %arg9: memref<1x96xf32, #tpu.memory_space<vmem>>, %arg10: memref<1x32xf32, #tpu.memory_space<vmem>>, %arg11: memref<1x32xf32, #tpu.memory_space<vmem>>, %arg12: memref<8x2x32xf32, #tpu.memory_space<vmem>>, %arg13: memref<8x2x32xf32, #tpu.memory_space<vmem>>, %arg14: memref<16x96xf32, #tpu.memory_space<vmem>>, %arg15: memref<16x96xf32, #tpu.memory_space<vmem>>) attributes {dimension_semantics = [], scalar_prefetch = 0 : i64, scratch_operands = 2 : i64, tpu.core_type = #tpu.core_type<tc>} {
    %c0 = arith.constant 0 : index
    %c0_0 = arith.constant 0 : index
    %0 = vector.load %arg0[%c0, %c0_0] : memref<16x32xf32, #tpu.memory_space<vmem>>, vector<16x32xf32>
    %c0_1 = arith.constant 0 : index
    %c0_2 = arith.constant 0 : index
    %1 = vector.load %arg2[%c0_1, %c0_2] : memref<32x96xf32, #tpu.memory_space<vmem>>, vector<32x96xf32>
    %cst = arith.constant dense<0.000000e+00> : vector<16x96xf32>
    %2 = tpu.matmul %0, %1, %cst {dimension_numbers = #tpu.dot_dimension_numbers<[1], [0], [0], [1], [0, 0, 1, 1], [], []>} : vector<16x32xf32>, vector<32x96xf32>, vector<16x96xf32> -> vector<16x96xf32>
    %c0_3 = arith.constant 0 : index
    %c0_4 = arith.constant 0 : index
    %3 = vector.load %arg0[%c0_3, %c0_4] : memref<16x32xf32, #tpu.memory_space<vmem>>, vector<16x32xf32>
    %c0_5 = arith.constant 0 : index
    %c0_6 = arith.constant 0 : index
    %4 = vector.load %arg4[%c0_5, %c0_6] : memref<32x96xf32, #tpu.memory_space<vmem>>, vector<32x96xf32>
    %cst_7 = arith.constant dense<0.000000e+00> : vector<16x96xf32>
    %5 = tpu.matmul %3, %4, %cst_7 {dimension_numbers = #tpu.dot_dimension_numbers<[1], [0], [0], [1], [0, 0, 1, 1], [], []>} : vector<16x32xf32>, vector<32x96xf32>, vector<16x96xf32> -> vector<16x96xf32>
    %c0_8 = arith.constant 0 : index
    %c0_9 = arith.constant 0 : index
    %6 = vector.load %arg1[%c0_8, %c0_9] : memref<16x32xf32, #tpu.memory_space<vmem>>, vector<16x32xf32>
    %c0_10 = arith.constant 0 : index
    %c0_11 = arith.constant 0 : index
    %7 = vector.load %arg3[%c0_10, %c0_11] : memref<32x96xf32, #tpu.memory_space<vmem>>, vector<32x96xf32>
    %cst_12 = arith.constant dense<0.000000e+00> : vector<16x96xf32>
    %8 = tpu.matmul %6, %7, %cst_12 {dimension_numbers = #tpu.dot_dimension_numbers<[1], [0], [0], [1], [0, 0, 1, 1], [], []>} : vector<16x32xf32>, vector<32x96xf32>, vector<16x96xf32> -> vector<16x96xf32>
    %9 = arith.addf %2, %8 : vector<16x96xf32>
    %c0_13 = arith.constant 0 : index
    %c0_14 = arith.constant 0 : index
    %10 = vector.load %arg1[%c0_13, %c0_14] : memref<16x32xf32, #tpu.memory_space<vmem>>, vector<16x32xf32>
    %c0_15 = arith.constant 0 : index
    %c0_16 = arith.constant 0 : index
    %11 = vector.load %arg5[%c0_15, %c0_16] : memref<32x96xf32, #tpu.memory_space<vmem>>, vector<32x96xf32>
    %cst_17 = arith.constant dense<0.000000e+00> : vector<16x96xf32>
    %12 = tpu.matmul %10, %11, %cst_17 {dimension_numbers = #tpu.dot_dimension_numbers<[1], [0], [0], [1], [0, 0, 1, 1], [], []>} : vector<16x32xf32>, vector<32x96xf32>, vector<16x96xf32> -> vector<16x96xf32>
    %13 = arith.addf %5, %12 : vector<16x96xf32>
    %c0_18 = arith.constant 0 : index
    %c0_19 = arith.constant 0 : index
    %14 = vector.load %arg8[%c0_18, %c0_19] : memref<1x96xf32, #tpu.memory_space<vmem>>, vector<1x96xf32>
    %15 = vector.broadcast %14 : vector<1x96xf32> to vector<16x96xf32>
    %16 = arith.addf %9, %15 : vector<16x96xf32>
    %c0_20 = arith.constant 0 : index
    %c0_21 = arith.constant 0 : index
    %17 = vector.load %arg14[%c0_20, %c0_21] : memref<16x96xf32, #tpu.memory_space<vmem>>, vector<16x96xf32>
    tpu.vector_store %arg14[%c0_20, %c0_21], %16 {strides = array<i32>} : memref<16x96xf32, #tpu.memory_space<vmem>>, vector<16x96xf32>,
    %c0_22 = arith.constant 0 : index
    %c0_23 = arith.constant 0 : index
    %18 = vector.load %arg9[%c0_22, %c0_23] : memref<1x96xf32, #tpu.memory_space<vmem>>, vector<1x96xf32>
    %19 = vector.broadcast %18 : vector<1x96xf32> to vector<16x96xf32>
    %20 = arith.addf %13, %19 : vector<16x96xf32>
    %c0_24 = arith.constant 0 : index
    %c0_25 = arith.constant 0 : index
    %21 = vector.load %arg15[%c0_24, %c0_25] : memref<16x96xf32, #tpu.memory_space<vmem>>, vector<16x96xf32>
    tpu.vector_store %arg15[%c0_24, %c0_25], %20 {strides = array<i32>} : memref<16x96xf32, #tpu.memory_space<vmem>>, vector<16x96xf32>,
    %c0_26 = arith.constant 0 : index
    %c0_27 = arith.constant 0 : index
    %22 = vector.load %arg6[%c0_26, %c0_27] : memref<32x96xf32, #tpu.memory_space<vmem>>, vector<32x96xf32>
    %c0_28 = arith.constant 0 : index
    %c0_29 = arith.constant 0 : index
    %23 = vector.load %arg7[%c0_28, %c0_29] : memref<32x96xf32, #tpu.memory_space<vmem>>, vector<32x96xf32>
    %c0_30 = arith.constant 0 : index
    %c0_31 = arith.constant 0 : index
    %24 = vector.load %arg10[%c0_30, %c0_31] : memref<1x32xf32, #tpu.memory_space<vmem>>, vector<1x32xf32>
    %25 = vector.shape_cast %24 : vector<1x32xf32> to vector<1x32xf32>
    %26 = vector.broadcast %25 : vector<1x32xf32> to vector<2x32xf32>
    %c0_32 = arith.constant 0 : index
    %c0_33 = arith.constant 0 : index
    %27 = vector.load %arg11[%c0_32, %c0_33] : memref<1x32xf32, #tpu.memory_space<vmem>>, vector<1x32xf32>
    %28 = vector.shape_cast %27 : vector<1x32xf32> to vector<1x32xf32>
    %29 = vector.broadcast %28 : vector<1x32xf32> to vector<2x32xf32>
    %cst_34 = arith.constant 0.000000e+00 : f32
    %30 = vector.broadcast %cst_34 : f32 to vector<2x32xf32>
    %c0_i32 = arith.constant 0 : i32
    %cst_35 = arith.constant dense<0.000000e+00> : vector<2x96xf32>
    %31 = tpu.matmul %30, %22, %cst_35 {dimension_numbers = #tpu.dot_dimension_numbers<[1], [0], [0], [1], [0, 0, 1, 1], [], []>} : vector<2x32xf32>, vector<32x96xf32>, vector<2x96xf32> -> vector<2x96xf32>
    %cst_36 = arith.constant dense<0.000000e+00> : vector<2x96xf32>
    %32 = tpu.matmul %30, %23, %cst_36 {dimension_numbers = #tpu.dot_dimension_numbers<[1], [0], [0], [1], [0, 0, 1, 1], [], []>} : vector<2x32xf32>, vector<32x96xf32>, vector<2x96xf32> -> vector<2x96xf32>
    %c2_i32 = arith.constant 2 : i32
    %33 = arith.muli %c0_i32, %c2_i32 : i32
    %34 = tpu.assume_multiple %33, 2 : i32
    %c7_i32 = arith.constant 7 : i32
    %35 = arith.subi %c7_i32, %c0_i32 : i32
    %c2_i32_37 = arith.constant 2 : i32
    %36 = arith.muli %35, %c2_i32_37 : i32
    %37 = tpu.assume_multiple %36, 2 : i32
    %38 = arith.index_cast %34 : i32 to index
    %c0_38 = arith.constant 0 : index
    %39 = vector.load %arg14[%38, %c0_38] : memref<16x96xf32, #tpu.memory_space<vmem>>, vector<2x96xf32>
    %40 = arith.index_cast %37 : i32 to index
    %c0_39 = arith.constant 0 : index
    %41 = vector.load %arg15[%40, %c0_39] : memref<16x96xf32, #tpu.memory_space<vmem>>, vector<2x96xf32>
    %42 = vector.extract_strided_slice %39 {offsets = [0, 0], sizes = [2, 32], strides = [1, 1]} : vector<2x96xf32> to vector<2x32xf32>
    %43 = vector.extract_strided_slice %31 {offsets = [0, 0], sizes = [2, 32], strides = [1, 1]} : vector<2x96xf32> to vector<2x32xf32>
    %44 = arith.addf %42, %43 : vector<2x32xf32>
    %45 = arith.negf %44 : vector<2x32xf32>
    %46 = math.exp %45 : vector<2x32xf32>
    %cst_40 = arith.constant 1.000000e+00 : f32
    %47 = vector.broadcast %cst_40 : f32 to vector<2x32xf32>
    %48 = arith.addf %47, %46 : vector<2x32xf32>
    %49 = arith.divf %47, %48 : vector<2x32xf32>
    %50 = vector.extract_strided_slice %39 {offsets = [0, 32], sizes = [2, 32], strides = [1, 1]} : vector<2x96xf32> to vector<2x32xf32>
    %51 = vector.extract_strided_slice %31 {offsets = [0, 32], sizes = [2, 32], strides = [1, 1]} : vector<2x96xf32> to vector<2x32xf32>
    %52 = arith.addf %50, %51 : vector<2x32xf32>
    %53 = arith.negf %52 : vector<2x32xf32>
    %54 = math.exp %53 : vector<2x32xf32>
    %cst_41 = arith.constant 1.000000e+00 : f32
    %55 = vector.broadcast %cst_41 : f32 to vector<2x32xf32>
    %56 = arith.addf %55, %54 : vector<2x32xf32>
    %57 = arith.divf %55, %56 : vector<2x32xf32>
    %58 = vector.extract_strided_slice %39 {offsets = [0, 64], sizes = [2, 32], strides = [1, 1]} : vector<2x96xf32> to vector<2x32xf32>
    %59 = vector.extract_strided_slice %31 {offsets = [0, 64], sizes = [2, 32], strides = [1, 1]} : vector<2x96xf32> to vector<2x32xf32>
    %60 = arith.addf %59, %26 : vector<2x32xf32>
    %61 = arith.mulf %49, %60 : vector<2x32xf32>
    %62 = arith.addf %58, %61 : vector<2x32xf32>
    %63 = math.tanh %62 : vector<2x32xf32>
    %cst_42 = arith.constant 1.000000e+00 : f32
    %64 = vector.broadcast %cst_42 : f32 to vector<2x32xf32>
    %65 = arith.subf %64, %57 : vector<2x32xf32>
    %66 = arith.mulf %65, %63 : vector<2x32xf32>
    %67 = arith.mulf %57, %30 : vector<2x32xf32>
    %68 = arith.addf %66, %67 : vector<2x32xf32>
    %69 = vector.extract_strided_slice %41 {offsets = [0, 0], sizes = [2, 32], strides = [1, 1]} : vector<2x96xf32> to vector<2x32xf32>
    %70 = vector.extract_strided_slice %32 {offsets = [0, 0], sizes = [2, 32], strides = [1, 1]} : vector<2x96xf32> to vector<2x32xf32>
    %71 = arith.addf %69, %70 : vector<2x32xf32>
    %72 = arith.negf %71 : vector<2x32xf32>
    %73 = math.exp %72 : vector<2x32xf32>
    %cst_43 = arith.constant 1.000000e+00 : f32
    %74 = vector.broadcast %cst_43 : f32 to vector<2x32xf32>
    %75 = arith.addf %74, %73 : vector<2x32xf32>
    %76 = arith.divf %74, %75 : vector<2x32xf32>
    %77 = vector.extract_strided_slice %41 {offsets = [0, 32], sizes = [2, 32], strides = [1, 1]} : vector<2x96xf32> to vector<2x32xf32>
    %78 = vector.extract_strided_slice %32 {offsets = [0, 32], sizes = [2, 32], strides = [1, 1]} : vector<2x96xf32> to vector<2x32xf32>
    %79 = arith.addf %77, %78 : vector<2x32xf32>
    %80 = arith.negf %79 : vector<2x32xf32>
    %81 = math.exp %80 : vector<2x32xf32>
    %cst_44 = arith.constant 1.000000e+00 : f32
    %82 = vector.broadcast %cst_44 : f32 to vector<2x32xf32>
    %83 = arith.addf %82, %81 : vector<2x32xf32>
    %84 = arith.divf %82, %83 : vector<2x32xf32>
    %85 = vector.extract_strided_slice %41 {offsets = [0, 64], sizes = [2, 32], strides = [1, 1]} : vector<2x96xf32> to vector<2x32xf32>
    %86 = vector.extract_strided_slice %32 {offsets = [0, 64], sizes = [2, 32], strides = [1, 1]} : vector<2x96xf32> to vector<2x32xf32>
    %87 = arith.addf %86, %29 : vector<2x32xf32>
    %88 = arith.mulf %76, %87 : vector<2x32xf32>
    %89 = arith.addf %85, %88 : vector<2x32xf32>
    %90 = math.tanh %89 : vector<2x32xf32>
    %cst_45 = arith.constant 1.000000e+00 : f32
    %91 = vector.broadcast %cst_45 : f32 to vector<2x32xf32>
    %92 = arith.subf %91, %84 : vector<2x32xf32>
    %93 = arith.mulf %92, %90 : vector<2x32xf32>
    %94 = arith.mulf %84, %30 : vector<2x32xf32>
    %95 = arith.addf %93, %94 : vector<2x32xf32>
    %96 = arith.index_cast %c0_i32 : i32 to index
    %c0_46 = arith.constant 0 : index
    %c0_47 = arith.constant 0 : index
    %97 = vector.load %arg12[%96, %c0_46, %c0_47] : memref<8x2x32xf32, #tpu.memory_space<vmem>>, vector<1x2x32xf32>
    %98 = vector.shape_cast %97 : vector<1x2x32xf32> to vector<2x32xf32>
    %99 = vector.shape_cast %68 : vector<2x32xf32> to vector<1x2x32xf32>
    tpu.vector_store %arg12[%96, %c0_46, %c0_47], %99 {strides = array<i32>} : memref<8x2x32xf32, #tpu.memory_space<vmem>>, vector<1x2x32xf32>,
    %c7_i32_48 = arith.constant 7 : i32
    %100 = arith.subi %c7_i32_48, %c0_i32 : i32
    %101 = arith.index_cast %100 : i32 to index
    %c0_49 = arith.constant 0 : index
    %c0_50 = arith.constant 0 : index
    %102 = vector.load %arg13[%101, %c0_49, %c0_50] : memref<8x2x32xf32, #tpu.memory_space<vmem>>, vector<1x2x32xf32>
    %103 = vector.shape_cast %102 : vector<1x2x32xf32> to vector<2x32xf32>
    %104 = vector.shape_cast %95 : vector<2x32xf32> to vector<1x2x32xf32>
    tpu.vector_store %arg13[%101, %c0_49, %c0_50], %104 {strides = array<i32>} : memref<8x2x32xf32, #tpu.memory_space<vmem>>, vector<1x2x32xf32>,
    %c1_i32 = arith.constant 1 : i32
    %cst_51 = arith.constant dense<0.000000e+00> : vector<2x96xf32>
    %105 = tpu.matmul %68, %22, %cst_51 {dimension_numbers = #tpu.dot_dimension_numbers<[1], [0], [0], [1], [0, 0, 1, 1], [], []>} : vector<2x32xf32>, vector<32x96xf32>, vector<2x96xf32> -> vector<2x96xf32>
    %cst_52 = arith.constant dense<0.000000e+00> : vector<2x96xf32>
    %106 = tpu.matmul %95, %23, %cst_52 {dimension_numbers = #tpu.dot_dimension_numbers<[1], [0], [0], [1], [0, 0, 1, 1], [], []>} : vector<2x32xf32>, vector<32x96xf32>, vector<2x96xf32> -> vector<2x96xf32>
    %c2_i32_53 = arith.constant 2 : i32
    %107 = arith.muli %c1_i32, %c2_i32_53 : i32
    %108 = tpu.assume_multiple %107, 2 : i32
    %c7_i32_54 = arith.constant 7 : i32
    %109 = arith.subi %c7_i32_54, %c1_i32 : i32
    %c2_i32_55 = arith.constant 2 : i32
    %110 = arith.muli %109, %c2_i32_55 : i32
    %111 = tpu.assume_multiple %110, 2 : i32
    %112 = arith.index_cast %108 : i32 to index
    %c0_56 = arith.constant 0 : index
    %113 = vector.load %arg14[%112, %c0_56] : memref<16x96xf32, #tpu.memory_space<vmem>>, vector<2x96xf32>
    %114 = arith.index_cast %111 : i32 to index
    %c0_57 = arith.constant 0 : index
    %115 = vector.load %arg15[%114, %c0_57] : memref<16x96xf32, #tpu.memory_space<vmem>>, vector<2x96xf32>
    %116 = vector.extract_strided_slice %113 {offsets = [0, 0], sizes = [2, 32], strides = [1, 1]} : vector<2x96xf32> to vector<2x32xf32>
    %117 = vector.extract_strided_slice %105 {offsets = [0, 0], sizes = [2, 32], strides = [1, 1]} : vector<2x96xf32> to vector<2x32xf32>
    %118 = arith.addf %116, %117 : vector<2x32xf32>
    %119 = arith.negf %118 : vector<2x32xf32>
    %120 = math.exp %119 : vector<2x32xf32>
    %cst_58 = arith.constant 1.000000e+00 : f32
    %121 = vector.broadcast %cst_58 : f32 to vector<2x32xf32>
    %122 = arith.addf %121, %120 : vector<2x32xf32>
    %123 = arith.divf %121, %122 : vector<2x32xf32>
    %124 = vector.extract_strided_slice %113 {offsets = [0, 32], sizes = [2, 32], strides = [1, 1]} : vector<2x96xf32> to vector<2x32xf32>
    %125 = vector.extract_strided_slice %105 {offsets = [0, 32], sizes = [2, 32], strides = [1, 1]} : vector<2x96xf32> to vector<2x32xf32>
    %126 = arith.addf %124, %125 : vector<2x32xf32>
    %127 = arith.negf %126 : vector<2x32xf32>
    %128 = math.exp %127 : vector<2x32xf32>
    %cst_59 = arith.constant 1.000000e+00 : f32
    %129 = vector.broadcast %cst_59 : f32 to vector<2x32xf32>
    %130 = arith.addf %129, %128 : vector<2x32xf32>
    %131 = arith.divf %129, %130 : vector<2x32xf32>
    %132 = vector.extract_strided_slice %113 {offsets = [0, 64], sizes = [2, 32], strides = [1, 1]} : vector<2x96xf32> to vector<2x32xf32>
    %133 = vector.extract_strided_slice %105 {offsets = [0, 64], sizes = [2, 32], strides = [1, 1]} : vector<2x96xf32> to vector<2x32xf32>
    %134 = arith.addf %133, %26 : vector<2x32xf32>
    %135 = arith.mulf %123, %134 : vector<2x32xf32>
    %136 = arith.addf %132, %135 : vector<2x32xf32>
    %137 = math.tanh %136 : vector<2x32xf32>
    %cst_60 = arith.constant 1.000000e+00 : f32
    %138 = vector.broadcast %cst_60 : f32 to vector<2x32xf32>
    %139 = arith.subf %138, %131 : vector<2x32xf32>
    %140 = arith.mulf %139, %137 : vector<2x32xf32>
    %141 = arith.mulf %131, %68 : vector<2x32xf32>
    %142 = arith.addf %140, %141 : vector<2x32xf32>
    %143 = vector.extract_strided_slice %115 {offsets = [0, 0], sizes = [2, 32], strides = [1, 1]} : vector<2x96xf32> to vector<2x32xf32>
    %144 = vector.extract_strided_slice %106 {offsets = [0, 0], sizes = [2, 32], strides = [1, 1]} : vector<2x96xf32> to vector<2x32xf32>
    %145 = arith.addf %143, %144 : vector<2x32xf32>
    %146 = arith.negf %145 : vector<2x32xf32>
    %147 = math.exp %146 : vector<2x32xf32>
    %cst_61 = arith.constant 1.000000e+00 : f32
    %148 = vector.broadcast %cst_61 : f32 to vector<2x32xf32>
    %149 = arith.addf %148, %147 : vector<2x32xf32>
    %150 = arith.divf %148, %149 : vector<2x32xf32>
    %151 = vector.extract_strided_slice %115 {offsets = [0, 32], sizes = [2, 32], strides = [1, 1]} : vector<2x96xf32> to vector<2x32xf32>
    %152 = vector.extract_strided_slice %106 {offsets = [0, 32], sizes = [2, 32], strides = [1, 1]} : vector<2x96xf32> to vector<2x32xf32>
    %153 = arith.addf %151, %152 : vector<2x32xf32>
    %154 = arith.negf %153 : vector<2x32xf32>
    %155 = math.exp %154 : vector<2x32xf32>
    %cst_62 = arith.constant 1.000000e+00 : f32
    %156 = vector.broadcast %cst_62 : f32 to vector<2x32xf32>
    %157 = arith.addf %156, %155 : vector<2x32xf32>
    %158 = arith.divf %156, %157 : vector<2x32xf32>
    %159 = vector.extract_strided_slice %115 {offsets = [0, 64], sizes = [2, 32], strides = [1, 1]} : vector<2x96xf32> to vector<2x32xf32>
    %160 = vector.extract_strided_slice %106 {offsets = [0, 64], sizes = [2, 32], strides = [1, 1]} : vector<2x96xf32> to vector<2x32xf32>
    %161 = arith.addf %160, %29 : vector<2x32xf32>
    %162 = arith.mulf %150, %161 : vector<2x32xf32>
    %163 = arith.addf %159, %162 : vector<2x32xf32>
    %164 = math.tanh %163 : vector<2x32xf32>
    %cst_63 = arith.constant 1.000000e+00 : f32
    %165 = vector.broadcast %cst_63 : f32 to vector<2x32xf32>
    %166 = arith.subf %165, %158 : vector<2x32xf32>
    %167 = arith.mulf %166, %164 : vector<2x32xf32>
    %168 = arith.mulf %158, %95 : vector<2x32xf32>
    %169 = arith.addf %167, %168 : vector<2x32xf32>
    %170 = arith.index_cast %c1_i32 : i32 to index
    %c0_64 = arith.constant 0 : index
    %c0_65 = arith.constant 0 : index
    %171 = vector.load %arg12[%170, %c0_64, %c0_65] : memref<8x2x32xf32, #tpu.memory_space<vmem>>, vector<1x2x32xf32>
    %172 = vector.shape_cast %171 : vector<1x2x32xf32> to vector<2x32xf32>
    %173 = vector.shape_cast %142 : vector<2x32xf32> to vector<1x2x32xf32>
    tpu.vector_store %arg12[%170, %c0_64, %c0_65], %173 {strides = array<i32>} : memref<8x2x32xf32, #tpu.memory_space<vmem>>, vector<1x2x32xf32>,
    %c7_i32_66 = arith.constant 7 : i32
    %174 = arith.subi %c7_i32_66, %c1_i32 : i32
    %175 = arith.index_cast %174 : i32 to index
    %c0_67 = arith.constant 0 : index
    %c0_68 = arith.constant 0 : index
    %176 = vector.load %arg13[%175, %c0_67, %c0_68] : memref<8x2x32xf32, #tpu.memory_space<vmem>>, vector<1x2x32xf32>
    %177 = vector.shape_cast %176 : vector<1x2x32xf32> to vector<2x32xf32>
    %178 = vector.shape_cast %169 : vector<2x32xf32> to vector<1x2x32xf32>
    tpu.vector_store %arg13[%175, %c0_67, %c0_68], %178 {strides = array<i32>} : memref<8x2x32xf32, #tpu.memory_space<vmem>>, vector<1x2x32xf32>,
    %c2_i32_69 = arith.constant 2 : i32
    %cst_70 = arith.constant dense<0.000000e+00> : vector<2x96xf32>
    %179 = tpu.matmul %142, %22, %cst_70 {dimension_numbers = #tpu.dot_dimension_numbers<[1], [0], [0], [1], [0, 0, 1, 1], [], []>} : vector<2x32xf32>, vector<32x96xf32>, vector<2x96xf32> -> vector<2x96xf32>
    %cst_71 = arith.constant dense<0.000000e+00> : vector<2x96xf32>
    %180 = tpu.matmul %169, %23, %cst_71 {dimension_numbers = #tpu.dot_dimension_numbers<[1], [0], [0], [1], [0, 0, 1, 1], [], []>} : vector<2x32xf32>, vector<32x96xf32>, vector<2x96xf32> -> vector<2x96xf32>
    %c2_i32_72 = arith.constant 2 : i32
    %181 = arith.muli %c2_i32_69, %c2_i32_72 : i32
    %182 = tpu.assume_multiple %181, 2 : i32
    %c7_i32_73 = arith.constant 7 : i32
    %183 = arith.subi %c7_i32_73, %c2_i32_69 : i32
    %c2_i32_74 = arith.constant 2 : i32
    %184 = arith.muli %183, %c2_i32_74 : i32
    %185 = tpu.assume_multiple %184, 2 : i32
    %186 = arith.index_cast %182 : i32 to index
    %c0_75 = arith.constant 0 : index
    %187 = vector.load %arg14[%186, %c0_75] : memref<16x96xf32, #tpu.memory_space<vmem>>, vector<2x96xf32>
    %188 = arith.index_cast %185 : i32 to index
    %c0_76 = arith.constant 0 : index
    %189 = vector.load %arg15[%188, %c0_76] : memref<16x96xf32, #tpu.memory_space<vmem>>, vector<2x96xf32>
    %190 = vector.extract_strided_slice %187 {offsets = [0, 0], sizes = [2, 32], strides = [1, 1]} : vector<2x96xf32> to vector<2x32xf32>
    %191 = vector.extract_strided_slice %179 {offsets = [0, 0], sizes = [2, 32], strides = [1, 1]} : vector<2x96xf32> to vector<2x32xf32>
    %192 = arith.addf %190, %191 : vector<2x32xf32>
    %193 = arith.negf %192 : vector<2x32xf32>
    %194 = math.exp %193 : vector<2x32xf32>
    %cst_77 = arith.constant 1.000000e+00 : f32
    %195 = vector.broadcast %cst_77 : f32 to vector<2x32xf32>
    %196 = arith.addf %195, %194 : vector<2x32xf32>
    %197 = arith.divf %195, %196 : vector<2x32xf32>
    %198 = vector.extract_strided_slice %187 {offsets = [0, 32], sizes = [2, 32], strides = [1, 1]} : vector<2x96xf32> to vector<2x32xf32>
    %199 = vector.extract_strided_slice %179 {offsets = [0, 32], sizes = [2, 32], strides = [1, 1]} : vector<2x96xf32> to vector<2x32xf32>
    %200 = arith.addf %198, %199 : vector<2x32xf32>
    %201 = arith.negf %200 : vector<2x32xf32>
    %202 = math.exp %201 : vector<2x32xf32>
    %cst_78 = arith.constant 1.000000e+00 : f32
    %203 = vector.broadcast %cst_78 : f32 to vector<2x32xf32>
    %204 = arith.addf %203, %202 : vector<2x32xf32>
    %205 = arith.divf %203, %204 : vector<2x32xf32>
    %206 = vector.extract_strided_slice %187 {offsets = [0, 64], sizes = [2, 32], strides = [1, 1]} : vector<2x96xf32> to vector<2x32xf32>
    %207 = vector.extract_strided_slice %179 {offsets = [0, 64], sizes = [2, 32], strides = [1, 1]} : vector<2x96xf32> to vector<2x32xf32>
    %208 = arith.addf %207, %26 : vector<2x32xf32>
    %209 = arith.mulf %197, %208 : vector<2x32xf32>
    %210 = arith.addf %206, %209 : vector<2x32xf32>
    %211 = math.tanh %210 : vector<2x32xf32>
    %cst_79 = arith.constant 1.000000e+00 : f32
    %212 = vector.broadcast %cst_79 : f32 to vector<2x32xf32>
    %213 = arith.subf %212, %205 : vector<2x32xf32>
    %214 = arith.mulf %213, %211 : vector<2x32xf32>
    %215 = arith.mulf %205, %142 : vector<2x32xf32>
    %216 = arith.addf %214, %215 : vector<2x32xf32>
    %217 = vector.extract_strided_slice %189 {offsets = [0, 0], sizes = [2, 32], strides = [1, 1]} : vector<2x96xf32> to vector<2x32xf32>
    %218 = vector.extract_strided_slice %180 {offsets = [0, 0], sizes = [2, 32], strides = [1, 1]} : vector<2x96xf32> to vector<2x32xf32>
    %219 = arith.addf %217, %218 : vector<2x32xf32>
    %220 = arith.negf %219 : vector<2x32xf32>
    %221 = math.exp %220 : vector<2x32xf32>
    %cst_80 = arith.constant 1.000000e+00 : f32
    %222 = vector.broadcast %cst_80 : f32 to vector<2x32xf32>
    %223 = arith.addf %222, %221 : vector<2x32xf32>
    %224 = arith.divf %222, %223 : vector<2x32xf32>
    %225 = vector.extract_strided_slice %189 {offsets = [0, 32], sizes = [2, 32], strides = [1, 1]} : vector<2x96xf32> to vector<2x32xf32>
    %226 = vector.extract_strided_slice %180 {offsets = [0, 32], sizes = [2, 32], strides = [1, 1]} : vector<2x96xf32> to vector<2x32xf32>
    %227 = arith.addf %225, %226 : vector<2x32xf32>
    %228 = arith.negf %227 : vector<2x32xf32>
    %229 = math.exp %228 : vector<2x32xf32>
    %cst_81 = arith.constant 1.000000e+00 : f32
    %230 = vector.broadcast %cst_81 : f32 to vector<2x32xf32>
    %231 = arith.addf %230, %229 : vector<2x32xf32>
    %232 = arith.divf %230, %231 : vector<2x32xf32>
    %233 = vector.extract_strided_slice %189 {offsets = [0, 64], sizes = [2, 32], strides = [1, 1]} : vector<2x96xf32> to vector<2x32xf32>
    %234 = vector.extract_strided_slice %180 {offsets = [0, 64], sizes = [2, 32], strides = [1, 1]} : vector<2x96xf32> to vector<2x32xf32>
    %235 = arith.addf %234, %29 : vector<2x32xf32>
    %236 = arith.mulf %224, %235 : vector<2x32xf32>
    %237 = arith.addf %233, %236 : vector<2x32xf32>
    %238 = math.tanh %237 : vector<2x32xf32>
    %cst_82 = arith.constant 1.000000e+00 : f32
    %239 = vector.broadcast %cst_82 : f32 to vector<2x32xf32>
    %240 = arith.subf %239, %232 : vector<2x32xf32>
    %241 = arith.mulf %240, %238 : vector<2x32xf32>
    %242 = arith.mulf %232, %169 : vector<2x32xf32>
    %243 = arith.addf %241, %242 : vector<2x32xf32>
    %244 = arith.index_cast %c2_i32_69 : i32 to index
    %c0_83 = arith.constant 0 : index
    %c0_84 = arith.constant 0 : index
    %245 = vector.load %arg12[%244, %c0_83, %c0_84] : memref<8x2x32xf32, #tpu.memory_space<vmem>>, vector<1x2x32xf32>
    %246 = vector.shape_cast %245 : vector<1x2x32xf32> to vector<2x32xf32>
    %247 = vector.shape_cast %216 : vector<2x32xf32> to vector<1x2x32xf32>
    tpu.vector_store %arg12[%244, %c0_83, %c0_84], %247 {strides = array<i32>} : memref<8x2x32xf32, #tpu.memory_space<vmem>>, vector<1x2x32xf32>,
    %c7_i32_85 = arith.constant 7 : i32
    %248 = arith.subi %c7_i32_85, %c2_i32_69 : i32
    %249 = arith.index_cast %248 : i32 to index
    %c0_86 = arith.constant 0 : index
    %c0_87 = arith.constant 0 : index
    %250 = vector.load %arg13[%249, %c0_86, %c0_87] : memref<8x2x32xf32, #tpu.memory_space<vmem>>, vector<1x2x32xf32>
    %251 = vector.shape_cast %250 : vector<1x2x32xf32> to vector<2x32xf32>
    %252 = vector.shape_cast %243 : vector<2x32xf32> to vector<1x2x32xf32>
    tpu.vector_store %arg13[%249, %c0_86, %c0_87], %252 {strides = array<i32>} : memref<8x2x32xf32, #tpu.memory_space<vmem>>, vector<1x2x32xf32>,
    %c3_i32 = arith.constant 3 : i32
    %cst_88 = arith.constant dense<0.000000e+00> : vector<2x96xf32>
    %253 = tpu.matmul %216, %22, %cst_88 {dimension_numbers = #tpu.dot_dimension_numbers<[1], [0], [0], [1], [0, 0, 1, 1], [], []>} : vector<2x32xf32>, vector<32x96xf32>, vector<2x96xf32> -> vector<2x96xf32>
    %cst_89 = arith.constant dense<0.000000e+00> : vector<2x96xf32>
    %254 = tpu.matmul %243, %23, %cst_89 {dimension_numbers = #tpu.dot_dimension_numbers<[1], [0], [0], [1], [0, 0, 1, 1], [], []>} : vector<2x32xf32>, vector<32x96xf32>, vector<2x96xf32> -> vector<2x96xf32>
    %c2_i32_90 = arith.constant 2 : i32
    %255 = arith.muli %c3_i32, %c2_i32_90 : i32
    %256 = tpu.assume_multiple %255, 2 : i32
    %c7_i32_91 = arith.constant 7 : i32
    %257 = arith.subi %c7_i32_91, %c3_i32 : i32
    %c2_i32_92 = arith.constant 2 : i32
    %258 = arith.muli %257, %c2_i32_92 : i32
    %259 = tpu.assume_multiple %258, 2 : i32
    %260 = arith.index_cast %256 : i32 to index
    %c0_93 = arith.constant 0 : index
    %261 = vector.load %arg14[%260, %c0_93] : memref<16x96xf32, #tpu.memory_space<vmem>>, vector<2x96xf32>
    %262 = arith.index_cast %259 : i32 to index
    %c0_94 = arith.constant 0 : index
    %263 = vector.load %arg15[%262, %c0_94] : memref<16x96xf32, #tpu.memory_space<vmem>>, vector<2x96xf32>
    %264 = vector.extract_strided_slice %261 {offsets = [0, 0], sizes = [2, 32], strides = [1, 1]} : vector<2x96xf32> to vector<2x32xf32>
    %265 = vector.extract_strided_slice %253 {offsets = [0, 0], sizes = [2, 32], strides = [1, 1]} : vector<2x96xf32> to vector<2x32xf32>
    %266 = arith.addf %264, %265 : vector<2x32xf32>
    %267 = arith.negf %266 : vector<2x32xf32>
    %268 = math.exp %267 : vector<2x32xf32>
    %cst_95 = arith.constant 1.000000e+00 : f32
    %269 = vector.broadcast %cst_95 : f32 to vector<2x32xf32>
    %270 = arith.addf %269, %268 : vector<2x32xf32>
    %271 = arith.divf %269, %270 : vector<2x32xf32>
    %272 = vector.extract_strided_slice %261 {offsets = [0, 32], sizes = [2, 32], strides = [1, 1]} : vector<2x96xf32> to vector<2x32xf32>
    %273 = vector.extract_strided_slice %253 {offsets = [0, 32], sizes = [2, 32], strides = [1, 1]} : vector<2x96xf32> to vector<2x32xf32>
    %274 = arith.addf %272, %273 : vector<2x32xf32>
    %275 = arith.negf %274 : vector<2x32xf32>
    %276 = math.exp %275 : vector<2x32xf32>
    %cst_96 = arith.constant 1.000000e+00 : f32
    %277 = vector.broadcast %cst_96 : f32 to vector<2x32xf32>
    %278 = arith.addf %277, %276 : vector<2x32xf32>
    %279 = arith.divf %277, %278 : vector<2x32xf32>
    %280 = vector.extract_strided_slice %261 {offsets = [0, 64], sizes = [2, 32], strides = [1, 1]} : vector<2x96xf32> to vector<2x32xf32>
    %281 = vector.extract_strided_slice %253 {offsets = [0, 64], sizes = [2, 32], strides = [1, 1]} : vector<2x96xf32> to vector<2x32xf32>
    %282 = arith.addf %281, %26 : vector<2x32xf32>
    %283 = arith.mulf %271, %282 : vector<2x32xf32>
    %284 = arith.addf %280, %283 : vector<2x32xf32>
    %285 = math.tanh %284 : vector<2x32xf32>
    %cst_97 = arith.constant 1.000000e+00 : f32
    %286 = vector.broadcast %cst_97 : f32 to vector<2x32xf32>
    %287 = arith.subf %286, %279 : vector<2x32xf32>
    %288 = arith.mulf %287, %285 : vector<2x32xf32>
    %289 = arith.mulf %279, %216 : vector<2x32xf32>
    %290 = arith.addf %288, %289 : vector<2x32xf32>
    %291 = vector.extract_strided_slice %263 {offsets = [0, 0], sizes = [2, 32], strides = [1, 1]} : vector<2x96xf32> to vector<2x32xf32>
    %292 = vector.extract_strided_slice %254 {offsets = [0, 0], sizes = [2, 32], strides = [1, 1]} : vector<2x96xf32> to vector<2x32xf32>
    %293 = arith.addf %291, %292 : vector<2x32xf32>
    %294 = arith.negf %293 : vector<2x32xf32>
    %295 = math.exp %294 : vector<2x32xf32>
    %cst_98 = arith.constant 1.000000e+00 : f32
    %296 = vector.broadcast %cst_98 : f32 to vector<2x32xf32>
    %297 = arith.addf %296, %295 : vector<2x32xf32>
    %298 = arith.divf %296, %297 : vector<2x32xf32>
    %299 = vector.extract_strided_slice %263 {offsets = [0, 32], sizes = [2, 32], strides = [1, 1]} : vector<2x96xf32> to vector<2x32xf32>
    %300 = vector.extract_strided_slice %254 {offsets = [0, 32], sizes = [2, 32], strides = [1, 1]} : vector<2x96xf32> to vector<2x32xf32>
    %301 = arith.addf %299, %300 : vector<2x32xf32>
    %302 = arith.negf %301 : vector<2x32xf32>
    %303 = math.exp %302 : vector<2x32xf32>
    %cst_99 = arith.constant 1.000000e+00 : f32
    %304 = vector.broadcast %cst_99 : f32 to vector<2x32xf32>
    %305 = arith.addf %304, %303 : vector<2x32xf32>
    %306 = arith.divf %304, %305 : vector<2x32xf32>
    %307 = vector.extract_strided_slice %263 {offsets = [0, 64], sizes = [2, 32], strides = [1, 1]} : vector<2x96xf32> to vector<2x32xf32>
    %308 = vector.extract_strided_slice %254 {offsets = [0, 64], sizes = [2, 32], strides = [1, 1]} : vector<2x96xf32> to vector<2x32xf32>
    %309 = arith.addf %308, %29 : vector<2x32xf32>
    %310 = arith.mulf %298, %309 : vector<2x32xf32>
    %311 = arith.addf %307, %310 : vector<2x32xf32>
    %312 = math.tanh %311 : vector<2x32xf32>
    %cst_100 = arith.constant 1.000000e+00 : f32
    %313 = vector.broadcast %cst_100 : f32 to vector<2x32xf32>
    %314 = arith.subf %313, %306 : vector<2x32xf32>
    %315 = arith.mulf %314, %312 : vector<2x32xf32>
    %316 = arith.mulf %306, %243 : vector<2x32xf32>
    %317 = arith.addf %315, %316 : vector<2x32xf32>
    %318 = arith.index_cast %c3_i32 : i32 to index
    %c0_101 = arith.constant 0 : index
    %c0_102 = arith.constant 0 : index
    %319 = vector.load %arg12[%318, %c0_101, %c0_102] : memref<8x2x32xf32, #tpu.memory_space<vmem>>, vector<1x2x32xf32>
    %320 = vector.shape_cast %319 : vector<1x2x32xf32> to vector<2x32xf32>
    %321 = vector.shape_cast %290 : vector<2x32xf32> to vector<1x2x32xf32>
    tpu.vector_store %arg12[%318, %c0_101, %c0_102], %321 {strides = array<i32>} : memref<8x2x32xf32, #tpu.memory_space<vmem>>, vector<1x2x32xf32>,
    %c7_i32_103 = arith.constant 7 : i32
    %322 = arith.subi %c7_i32_103, %c3_i32 : i32
    %323 = arith.index_cast %322 : i32 to index
    %c0_104 = arith.constant 0 : index
    %c0_105 = arith.constant 0 : index
    %324 = vector.load %arg13[%323, %c0_104, %c0_105] : memref<8x2x32xf32, #tpu.memory_space<vmem>>, vector<1x2x32xf32>
    %325 = vector.shape_cast %324 : vector<1x2x32xf32> to vector<2x32xf32>
    %326 = vector.shape_cast %317 : vector<2x32xf32> to vector<1x2x32xf32>
    tpu.vector_store %arg13[%323, %c0_104, %c0_105], %326 {strides = array<i32>} : memref<8x2x32xf32, #tpu.memory_space<vmem>>, vector<1x2x32xf32>,
    %c4_i32 = arith.constant 4 : i32
    %cst_106 = arith.constant dense<0.000000e+00> : vector<2x96xf32>
    %327 = tpu.matmul %290, %22, %cst_106 {dimension_numbers = #tpu.dot_dimension_numbers<[1], [0], [0], [1], [0, 0, 1, 1], [], []>} : vector<2x32xf32>, vector<32x96xf32>, vector<2x96xf32> -> vector<2x96xf32>
    %cst_107 = arith.constant dense<0.000000e+00> : vector<2x96xf32>
    %328 = tpu.matmul %317, %23, %cst_107 {dimension_numbers = #tpu.dot_dimension_numbers<[1], [0], [0], [1], [0, 0, 1, 1], [], []>} : vector<2x32xf32>, vector<32x96xf32>, vector<2x96xf32> -> vector<2x96xf32>
    %c2_i32_108 = arith.constant 2 : i32
    %329 = arith.muli %c4_i32, %c2_i32_108 : i32
    %330 = tpu.assume_multiple %329, 2 : i32
    %c7_i32_109 = arith.constant 7 : i32
    %331 = arith.subi %c7_i32_109, %c4_i32 : i32
    %c2_i32_110 = arith.constant 2 : i32
    %332 = arith.muli %331, %c2_i32_110 : i32
    %333 = tpu.assume_multiple %332, 2 : i32
    %334 = arith.index_cast %330 : i32 to index
    %c0_111 = arith.constant 0 : index
    %335 = vector.load %arg14[%334, %c0_111] : memref<16x96xf32, #tpu.memory_space<vmem>>, vector<2x96xf32>
    %336 = arith.index_cast %333 : i32 to index
    %c0_112 = arith.constant 0 : index
    %337 = vector.load %arg15[%336, %c0_112] : memref<16x96xf32, #tpu.memory_space<vmem>>, vector<2x96xf32>
    %338 = vector.extract_strided_slice %335 {offsets = [0, 0], sizes = [2, 32], strides = [1, 1]} : vector<2x96xf32> to vector<2x32xf32>
    %339 = vector.extract_strided_slice %327 {offsets = [0, 0], sizes = [2, 32], strides = [1, 1]} : vector<2x96xf32> to vector<2x32xf32>
    %340 = arith.addf %338, %339 : vector<2x32xf32>
    %341 = arith.negf %340 : vector<2x32xf32>
    %342 = math.exp %341 : vector<2x32xf32>
    %cst_113 = arith.constant 1.000000e+00 : f32
    %343 = vector.broadcast %cst_113 : f32 to vector<2x32xf32>
    %344 = arith.addf %343, %342 : vector<2x32xf32>
    %345 = arith.divf %343, %344 : vector<2x32xf32>
    %346 = vector.extract_strided_slice %335 {offsets = [0, 32], sizes = [2, 32], strides = [1, 1]} : vector<2x96xf32> to vector<2x32xf32>
    %347 = vector.extract_strided_slice %327 {offsets = [0, 32], sizes = [2, 32], strides = [1, 1]} : vector<2x96xf32> to vector<2x32xf32>
    %348 = arith.addf %346, %347 : vector<2x32xf32>
    %349 = arith.negf %348 : vector<2x32xf32>
    %350 = math.exp %349 : vector<2x32xf32>
    %cst_114 = arith.constant 1.000000e+00 : f32
    %351 = vector.broadcast %cst_114 : f32 to vector<2x32xf32>
    %352 = arith.addf %351, %350 : vector<2x32xf32>
    %353 = arith.divf %351, %352 : vector<2x32xf32>
    %354 = vector.extract_strided_slice %335 {offsets = [0, 64], sizes = [2, 32], strides = [1, 1]} : vector<2x96xf32> to vector<2x32xf32>
    %355 = vector.extract_strided_slice %327 {offsets = [0, 64], sizes = [2, 32], strides = [1, 1]} : vector<2x96xf32> to vector<2x32xf32>
    %356 = arith.addf %355, %26 : vector<2x32xf32>
    %357 = arith.mulf %345, %356 : vector<2x32xf32>
    %358 = arith.addf %354, %357 : vector<2x32xf32>
    %359 = math.tanh %358 : vector<2x32xf32>
    %cst_115 = arith.constant 1.000000e+00 : f32
    %360 = vector.broadcast %cst_115 : f32 to vector<2x32xf32>
    %361 = arith.subf %360, %353 : vector<2x32xf32>
    %362 = arith.mulf %361, %359 : vector<2x32xf32>
    %363 = arith.mulf %353, %290 : vector<2x32xf32>
    %364 = arith.addf %362, %363 : vector<2x32xf32>
    %365 = vector.extract_strided_slice %337 {offsets = [0, 0], sizes = [2, 32], strides = [1, 1]} : vector<2x96xf32> to vector<2x32xf32>
    %366 = vector.extract_strided_slice %328 {offsets = [0, 0], sizes = [2, 32], strides = [1, 1]} : vector<2x96xf32> to vector<2x32xf32>
    %367 = arith.addf %365, %366 : vector<2x32xf32>
    %368 = arith.negf %367 : vector<2x32xf32>
    %369 = math.exp %368 : vector<2x32xf32>
    %cst_116 = arith.constant 1.000000e+00 : f32
    %370 = vector.broadcast %cst_116 : f32 to vector<2x32xf32>
    %371 = arith.addf %370, %369 : vector<2x32xf32>
    %372 = arith.divf %370, %371 : vector<2x32xf32>
    %373 = vector.extract_strided_slice %337 {offsets = [0, 32], sizes = [2, 32], strides = [1, 1]} : vector<2x96xf32> to vector<2x32xf32>
    %374 = vector.extract_strided_slice %328 {offsets = [0, 32], sizes = [2, 32], strides = [1, 1]} : vector<2x96xf32> to vector<2x32xf32>
    %375 = arith.addf %373, %374 : vector<2x32xf32>
    %376 = arith.negf %375 : vector<2x32xf32>
    %377 = math.exp %376 : vector<2x32xf32>
    %cst_117 = arith.constant 1.000000e+00 : f32
    %378 = vector.broadcast %cst_117 : f32 to vector<2x32xf32>
    %379 = arith.addf %378, %377 : vector<2x32xf32>
    %380 = arith.divf %378, %379 : vector<2x32xf32>
    %381 = vector.extract_strided_slice %337 {offsets = [0, 64], sizes = [2, 32], strides = [1, 1]} : vector<2x96xf32> to vector<2x32xf32>
    %382 = vector.extract_strided_slice %328 {offsets = [0, 64], sizes = [2, 32], strides = [1, 1]} : vector<2x96xf32> to vector<2x32xf32>
    %383 = arith.addf %382, %29 : vector<2x32xf32>
    %384 = arith.mulf %372, %383 : vector<2x32xf32>
    %385 = arith.addf %381, %384 : vector<2x32xf32>
    %386 = math.tanh %385 : vector<2x32xf32>
    %cst_118 = arith.constant 1.000000e+00 : f32
    %387 = vector.broadcast %cst_118 : f32 to vector<2x32xf32>
    %388 = arith.subf %387, %380 : vector<2x32xf32>
    %389 = arith.mulf %388, %386 : vector<2x32xf32>
    %390 = arith.mulf %380, %317 : vector<2x32xf32>
    %391 = arith.addf %389, %390 : vector<2x32xf32>
    %392 = arith.index_cast %c4_i32 : i32 to index
    %c0_119 = arith.constant 0 : index
    %c0_120 = arith.constant 0 : index
    %393 = vector.load %arg12[%392, %c0_119, %c0_120] : memref<8x2x32xf32, #tpu.memory_space<vmem>>, vector<1x2x32xf32>
    %394 = vector.shape_cast %393 : vector<1x2x32xf32> to vector<2x32xf32>
    %395 = vector.shape_cast %364 : vector<2x32xf32> to vector<1x2x32xf32>
    tpu.vector_store %arg12[%392, %c0_119, %c0_120], %395 {strides = array<i32>} : memref<8x2x32xf32, #tpu.memory_space<vmem>>, vector<1x2x32xf32>,
    %c7_i32_121 = arith.constant 7 : i32
    %396 = arith.subi %c7_i32_121, %c4_i32 : i32
    %397 = arith.index_cast %396 : i32 to index
    %c0_122 = arith.constant 0 : index
    %c0_123 = arith.constant 0 : index
    %398 = vector.load %arg13[%397, %c0_122, %c0_123] : memref<8x2x32xf32, #tpu.memory_space<vmem>>, vector<1x2x32xf32>
    %399 = vector.shape_cast %398 : vector<1x2x32xf32> to vector<2x32xf32>
    %400 = vector.shape_cast %391 : vector<2x32xf32> to vector<1x2x32xf32>
    tpu.vector_store %arg13[%397, %c0_122, %c0_123], %400 {strides = array<i32>} : memref<8x2x32xf32, #tpu.memory_space<vmem>>, vector<1x2x32xf32>,
    %c5_i32 = arith.constant 5 : i32
    %cst_124 = arith.constant dense<0.000000e+00> : vector<2x96xf32>
    %401 = tpu.matmul %364, %22, %cst_124 {dimension_numbers = #tpu.dot_dimension_numbers<[1], [0], [0], [1], [0, 0, 1, 1], [], []>} : vector<2x32xf32>, vector<32x96xf32>, vector<2x96xf32> -> vector<2x96xf32>
    %cst_125 = arith.constant dense<0.000000e+00> : vector<2x96xf32>
    %402 = tpu.matmul %391, %23, %cst_125 {dimension_numbers = #tpu.dot_dimension_numbers<[1], [0], [0], [1], [0, 0, 1, 1], [], []>} : vector<2x32xf32>, vector<32x96xf32>, vector<2x96xf32> -> vector<2x96xf32>
    %c2_i32_126 = arith.constant 2 : i32
    %403 = arith.muli %c5_i32, %c2_i32_126 : i32
    %404 = tpu.assume_multiple %403, 2 : i32
    %c7_i32_127 = arith.constant 7 : i32
    %405 = arith.subi %c7_i32_127, %c5_i32 : i32
    %c2_i32_128 = arith.constant 2 : i32
    %406 = arith.muli %405, %c2_i32_128 : i32
    %407 = tpu.assume_multiple %406, 2 : i32
    %408 = arith.index_cast %404 : i32 to index
    %c0_129 = arith.constant 0 : index
    %409 = vector.load %arg14[%408, %c0_129] : memref<16x96xf32, #tpu.memory_space<vmem>>, vector<2x96xf32>
    %410 = arith.index_cast %407 : i32 to index
    %c0_130 = arith.constant 0 : index
    %411 = vector.load %arg15[%410, %c0_130] : memref<16x96xf32, #tpu.memory_space<vmem>>, vector<2x96xf32>
    %412 = vector.extract_strided_slice %409 {offsets = [0, 0], sizes = [2, 32], strides = [1, 1]} : vector<2x96xf32> to vector<2x32xf32>
    %413 = vector.extract_strided_slice %401 {offsets = [0, 0], sizes = [2, 32], strides = [1, 1]} : vector<2x96xf32> to vector<2x32xf32>
    %414 = arith.addf %412, %413 : vector<2x32xf32>
    %415 = arith.negf %414 : vector<2x32xf32>
    %416 = math.exp %415 : vector<2x32xf32>
    %cst_131 = arith.constant 1.000000e+00 : f32
    %417 = vector.broadcast %cst_131 : f32 to vector<2x32xf32>
    %418 = arith.addf %417, %416 : vector<2x32xf32>
    %419 = arith.divf %417, %418 : vector<2x32xf32>
    %420 = vector.extract_strided_slice %409 {offsets = [0, 32], sizes = [2, 32], strides = [1, 1]} : vector<2x96xf32> to vector<2x32xf32>
    %421 = vector.extract_strided_slice %401 {offsets = [0, 32], sizes = [2, 32], strides = [1, 1]} : vector<2x96xf32> to vector<2x32xf32>
    %422 = arith.addf %420, %421 : vector<2x32xf32>
    %423 = arith.negf %422 : vector<2x32xf32>
    %424 = math.exp %423 : vector<2x32xf32>
    %cst_132 = arith.constant 1.000000e+00 : f32
    %425 = vector.broadcast %cst_132 : f32 to vector<2x32xf32>
    %426 = arith.addf %425, %424 : vector<2x32xf32>
    %427 = arith.divf %425, %426 : vector<2x32xf32>
    %428 = vector.extract_strided_slice %409 {offsets = [0, 64], sizes = [2, 32], strides = [1, 1]} : vector<2x96xf32> to vector<2x32xf32>
    %429 = vector.extract_strided_slice %401 {offsets = [0, 64], sizes = [2, 32], strides = [1, 1]} : vector<2x96xf32> to vector<2x32xf32>
    %430 = arith.addf %429, %26 : vector<2x32xf32>
    %431 = arith.mulf %419, %430 : vector<2x32xf32>
    %432 = arith.addf %428, %431 : vector<2x32xf32>
    %433 = math.tanh %432 : vector<2x32xf32>
    %cst_133 = arith.constant 1.000000e+00 : f32
    %434 = vector.broadcast %cst_133 : f32 to vector<2x32xf32>
    %435 = arith.subf %434, %427 : vector<2x32xf32>
    %436 = arith.mulf %435, %433 : vector<2x32xf32>
    %437 = arith.mulf %427, %364 : vector<2x32xf32>
    %438 = arith.addf %436, %437 : vector<2x32xf32>
    %439 = vector.extract_strided_slice %411 {offsets = [0, 0], sizes = [2, 32], strides = [1, 1]} : vector<2x96xf32> to vector<2x32xf32>
    %440 = vector.extract_strided_slice %402 {offsets = [0, 0], sizes = [2, 32], strides = [1, 1]} : vector<2x96xf32> to vector<2x32xf32>
    %441 = arith.addf %439, %440 : vector<2x32xf32>
    %442 = arith.negf %441 : vector<2x32xf32>
    %443 = math.exp %442 : vector<2x32xf32>
    %cst_134 = arith.constant 1.000000e+00 : f32
    %444 = vector.broadcast %cst_134 : f32 to vector<2x32xf32>
    %445 = arith.addf %444, %443 : vector<2x32xf32>
    %446 = arith.divf %444, %445 : vector<2x32xf32>
    %447 = vector.extract_strided_slice %411 {offsets = [0, 32], sizes = [2, 32], strides = [1, 1]} : vector<2x96xf32> to vector<2x32xf32>
    %448 = vector.extract_strided_slice %402 {offsets = [0, 32], sizes = [2, 32], strides = [1, 1]} : vector<2x96xf32> to vector<2x32xf32>
    %449 = arith.addf %447, %448 : vector<2x32xf32>
    %450 = arith.negf %449 : vector<2x32xf32>
    %451 = math.exp %450 : vector<2x32xf32>
    %cst_135 = arith.constant 1.000000e+00 : f32
    %452 = vector.broadcast %cst_135 : f32 to vector<2x32xf32>
    %453 = arith.addf %452, %451 : vector<2x32xf32>
    %454 = arith.divf %452, %453 : vector<2x32xf32>
    %455 = vector.extract_strided_slice %411 {offsets = [0, 64], sizes = [2, 32], strides = [1, 1]} : vector<2x96xf32> to vector<2x32xf32>
    %456 = vector.extract_strided_slice %402 {offsets = [0, 64], sizes = [2, 32], strides = [1, 1]} : vector<2x96xf32> to vector<2x32xf32>
    %457 = arith.addf %456, %29 : vector<2x32xf32>
    %458 = arith.mulf %446, %457 : vector<2x32xf32>
    %459 = arith.addf %455, %458 : vector<2x32xf32>
    %460 = math.tanh %459 : vector<2x32xf32>
    %cst_136 = arith.constant 1.000000e+00 : f32
    %461 = vector.broadcast %cst_136 : f32 to vector<2x32xf32>
    %462 = arith.subf %461, %454 : vector<2x32xf32>
    %463 = arith.mulf %462, %460 : vector<2x32xf32>
    %464 = arith.mulf %454, %391 : vector<2x32xf32>
    %465 = arith.addf %463, %464 : vector<2x32xf32>
    %466 = arith.index_cast %c5_i32 : i32 to index
    %c0_137 = arith.constant 0 : index
    %c0_138 = arith.constant 0 : index
    %467 = vector.load %arg12[%466, %c0_137, %c0_138] : memref<8x2x32xf32, #tpu.memory_space<vmem>>, vector<1x2x32xf32>
    %468 = vector.shape_cast %467 : vector<1x2x32xf32> to vector<2x32xf32>
    %469 = vector.shape_cast %438 : vector<2x32xf32> to vector<1x2x32xf32>
    tpu.vector_store %arg12[%466, %c0_137, %c0_138], %469 {strides = array<i32>} : memref<8x2x32xf32, #tpu.memory_space<vmem>>, vector<1x2x32xf32>,
    %c7_i32_139 = arith.constant 7 : i32
    %470 = arith.subi %c7_i32_139, %c5_i32 : i32
    %471 = arith.index_cast %470 : i32 to index
    %c0_140 = arith.constant 0 : index
    %c0_141 = arith.constant 0 : index
    %472 = vector.load %arg13[%471, %c0_140, %c0_141] : memref<8x2x32xf32, #tpu.memory_space<vmem>>, vector<1x2x32xf32>
    %473 = vector.shape_cast %472 : vector<1x2x32xf32> to vector<2x32xf32>
    %474 = vector.shape_cast %465 : vector<2x32xf32> to vector<1x2x32xf32>
    tpu.vector_store %arg13[%471, %c0_140, %c0_141], %474 {strides = array<i32>} : memref<8x2x32xf32, #tpu.memory_space<vmem>>, vector<1x2x32xf32>,
    %c6_i32 = arith.constant 6 : i32
    %cst_142 = arith.constant dense<0.000000e+00> : vector<2x96xf32>
    %475 = tpu.matmul %438, %22, %cst_142 {dimension_numbers = #tpu.dot_dimension_numbers<[1], [0], [0], [1], [0, 0, 1, 1], [], []>} : vector<2x32xf32>, vector<32x96xf32>, vector<2x96xf32> -> vector<2x96xf32>
    %cst_143 = arith.constant dense<0.000000e+00> : vector<2x96xf32>
    %476 = tpu.matmul %465, %23, %cst_143 {dimension_numbers = #tpu.dot_dimension_numbers<[1], [0], [0], [1], [0, 0, 1, 1], [], []>} : vector<2x32xf32>, vector<32x96xf32>, vector<2x96xf32> -> vector<2x96xf32>
    %c2_i32_144 = arith.constant 2 : i32
    %477 = arith.muli %c6_i32, %c2_i32_144 : i32
    %478 = tpu.assume_multiple %477, 2 : i32
    %c7_i32_145 = arith.constant 7 : i32
    %479 = arith.subi %c7_i32_145, %c6_i32 : i32
    %c2_i32_146 = arith.constant 2 : i32
    %480 = arith.muli %479, %c2_i32_146 : i32
    %481 = tpu.assume_multiple %480, 2 : i32
    %482 = arith.index_cast %478 : i32 to index
    %c0_147 = arith.constant 0 : index
    %483 = vector.load %arg14[%482, %c0_147] : memref<16x96xf32, #tpu.memory_space<vmem>>, vector<2x96xf32>
    %484 = arith.index_cast %481 : i32 to index
    %c0_148 = arith.constant 0 : index
    %485 = vector.load %arg15[%484, %c0_148] : memref<16x96xf32, #tpu.memory_space<vmem>>, vector<2x96xf32>
    %486 = vector.extract_strided_slice %483 {offsets = [0, 0], sizes = [2, 32], strides = [1, 1]} : vector<2x96xf32> to vector<2x32xf32>
    %487 = vector.extract_strided_slice %475 {offsets = [0, 0], sizes = [2, 32], strides = [1, 1]} : vector<2x96xf32> to vector<2x32xf32>
    %488 = arith.addf %486, %487 : vector<2x32xf32>
    %489 = arith.negf %488 : vector<2x32xf32>
    %490 = math.exp %489 : vector<2x32xf32>
    %cst_149 = arith.constant 1.000000e+00 : f32
    %491 = vector.broadcast %cst_149 : f32 to vector<2x32xf32>
    %492 = arith.addf %491, %490 : vector<2x32xf32>
    %493 = arith.divf %491, %492 : vector<2x32xf32>
    %494 = vector.extract_strided_slice %483 {offsets = [0, 32], sizes = [2, 32], strides = [1, 1]} : vector<2x96xf32> to vector<2x32xf32>
    %495 = vector.extract_strided_slice %475 {offsets = [0, 32], sizes = [2, 32], strides = [1, 1]} : vector<2x96xf32> to vector<2x32xf32>
    %496 = arith.addf %494, %495 : vector<2x32xf32>
    %497 = arith.negf %496 : vector<2x32xf32>
    %498 = math.exp %497 : vector<2x32xf32>
    %cst_150 = arith.constant 1.000000e+00 : f32
    %499 = vector.broadcast %cst_150 : f32 to vector<2x32xf32>
    %500 = arith.addf %499, %498 : vector<2x32xf32>
    %501 = arith.divf %499, %500 : vector<2x32xf32>
    %502 = vector.extract_strided_slice %483 {offsets = [0, 64], sizes = [2, 32], strides = [1, 1]} : vector<2x96xf32> to vector<2x32xf32>
    %503 = vector.extract_strided_slice %475 {offsets = [0, 64], sizes = [2, 32], strides = [1, 1]} : vector<2x96xf32> to vector<2x32xf32>
    %504 = arith.addf %503, %26 : vector<2x32xf32>
    %505 = arith.mulf %493, %504 : vector<2x32xf32>
    %506 = arith.addf %502, %505 : vector<2x32xf32>
    %507 = math.tanh %506 : vector<2x32xf32>
    %cst_151 = arith.constant 1.000000e+00 : f32
    %508 = vector.broadcast %cst_151 : f32 to vector<2x32xf32>
    %509 = arith.subf %508, %501 : vector<2x32xf32>
    %510 = arith.mulf %509, %507 : vector<2x32xf32>
    %511 = arith.mulf %501, %438 : vector<2x32xf32>
    %512 = arith.addf %510, %511 : vector<2x32xf32>
    %513 = vector.extract_strided_slice %485 {offsets = [0, 0], sizes = [2, 32], strides = [1, 1]} : vector<2x96xf32> to vector<2x32xf32>
    %514 = vector.extract_strided_slice %476 {offsets = [0, 0], sizes = [2, 32], strides = [1, 1]} : vector<2x96xf32> to vector<2x32xf32>
    %515 = arith.addf %513, %514 : vector<2x32xf32>
    %516 = arith.negf %515 : vector<2x32xf32>
    %517 = math.exp %516 : vector<2x32xf32>
    %cst_152 = arith.constant 1.000000e+00 : f32
    %518 = vector.broadcast %cst_152 : f32 to vector<2x32xf32>
    %519 = arith.addf %518, %517 : vector<2x32xf32>
    %520 = arith.divf %518, %519 : vector<2x32xf32>
    %521 = vector.extract_strided_slice %485 {offsets = [0, 32], sizes = [2, 32], strides = [1, 1]} : vector<2x96xf32> to vector<2x32xf32>
    %522 = vector.extract_strided_slice %476 {offsets = [0, 32], sizes = [2, 32], strides = [1, 1]} : vector<2x96xf32> to vector<2x32xf32>
    %523 = arith.addf %521, %522 : vector<2x32xf32>
    %524 = arith.negf %523 : vector<2x32xf32>
    %525 = math.exp %524 : vector<2x32xf32>
    %cst_153 = arith.constant 1.000000e+00 : f32
    %526 = vector.broadcast %cst_153 : f32 to vector<2x32xf32>
    %527 = arith.addf %526, %525 : vector<2x32xf32>
    %528 = arith.divf %526, %527 : vector<2x32xf32>
    %529 = vector.extract_strided_slice %485 {offsets = [0, 64], sizes = [2, 32], strides = [1, 1]} : vector<2x96xf32> to vector<2x32xf32>
    %530 = vector.extract_strided_slice %476 {offsets = [0, 64], sizes = [2, 32], strides = [1, 1]} : vector<2x96xf32> to vector<2x32xf32>
    %531 = arith.addf %530, %29 : vector<2x32xf32>
    %532 = arith.mulf %520, %531 : vector<2x32xf32>
    %533 = arith.addf %529, %532 : vector<2x32xf32>
    %534 = math.tanh %533 : vector<2x32xf32>
    %cst_154 = arith.constant 1.000000e+00 : f32
    %535 = vector.broadcast %cst_154 : f32 to vector<2x32xf32>
    %536 = arith.subf %535, %528 : vector<2x32xf32>
    %537 = arith.mulf %536, %534 : vector<2x32xf32>
    %538 = arith.mulf %528, %465 : vector<2x32xf32>
    %539 = arith.addf %537, %538 : vector<2x32xf32>
    %540 = arith.index_cast %c6_i32 : i32 to index
    %c0_155 = arith.constant 0 : index
    %c0_156 = arith.constant 0 : index
    %541 = vector.load %arg12[%540, %c0_155, %c0_156] : memref<8x2x32xf32, #tpu.memory_space<vmem>>, vector<1x2x32xf32>
    %542 = vector.shape_cast %541 : vector<1x2x32xf32> to vector<2x32xf32>
    %543 = vector.shape_cast %512 : vector<2x32xf32> to vector<1x2x32xf32>
    tpu.vector_store %arg12[%540, %c0_155, %c0_156], %543 {strides = array<i32>} : memref<8x2x32xf32, #tpu.memory_space<vmem>>, vector<1x2x32xf32>,
    %c7_i32_157 = arith.constant 7 : i32
    %544 = arith.subi %c7_i32_157, %c6_i32 : i32
    %545 = arith.index_cast %544 : i32 to index
    %c0_158 = arith.constant 0 : index
    %c0_159 = arith.constant 0 : index
    %546 = vector.load %arg13[%545, %c0_158, %c0_159] : memref<8x2x32xf32, #tpu.memory_space<vmem>>, vector<1x2x32xf32>
    %547 = vector.shape_cast %546 : vector<1x2x32xf32> to vector<2x32xf32>
    %548 = vector.shape_cast %539 : vector<2x32xf32> to vector<1x2x32xf32>
    tpu.vector_store %arg13[%545, %c0_158, %c0_159], %548 {strides = array<i32>} : memref<8x2x32xf32, #tpu.memory_space<vmem>>, vector<1x2x32xf32>,
    %c7_i32_160 = arith.constant 7 : i32
    %cst_161 = arith.constant dense<0.000000e+00> : vector<2x96xf32>
    %549 = tpu.matmul %512, %22, %cst_161 {dimension_numbers = #tpu.dot_dimension_numbers<[1], [0], [0], [1], [0, 0, 1, 1], [], []>} : vector<2x32xf32>, vector<32x96xf32>, vector<2x96xf32> -> vector<2x96xf32>
    %cst_162 = arith.constant dense<0.000000e+00> : vector<2x96xf32>
    %550 = tpu.matmul %539, %23, %cst_162 {dimension_numbers = #tpu.dot_dimension_numbers<[1], [0], [0], [1], [0, 0, 1, 1], [], []>} : vector<2x32xf32>, vector<32x96xf32>, vector<2x96xf32> -> vector<2x96xf32>
    %c2_i32_163 = arith.constant 2 : i32
    %551 = arith.muli %c7_i32_160, %c2_i32_163 : i32
    %552 = tpu.assume_multiple %551, 2 : i32
    %c7_i32_164 = arith.constant 7 : i32
    %553 = arith.subi %c7_i32_164, %c7_i32_160 : i32
    %c2_i32_165 = arith.constant 2 : i32
    %554 = arith.muli %553, %c2_i32_165 : i32
    %555 = tpu.assume_multiple %554, 2 : i32
    %556 = arith.index_cast %552 : i32 to index
    %c0_166 = arith.constant 0 : index
    %557 = vector.load %arg14[%556, %c0_166] : memref<16x96xf32, #tpu.memory_space<vmem>>, vector<2x96xf32>
    %558 = arith.index_cast %555 : i32 to index
    %c0_167 = arith.constant 0 : index
    %559 = vector.load %arg15[%558, %c0_167] : memref<16x96xf32, #tpu.memory_space<vmem>>, vector<2x96xf32>
    %560 = vector.extract_strided_slice %557 {offsets = [0, 0], sizes = [2, 32], strides = [1, 1]} : vector<2x96xf32> to vector<2x32xf32>
    %561 = vector.extract_strided_slice %549 {offsets = [0, 0], sizes = [2, 32], strides = [1, 1]} : vector<2x96xf32> to vector<2x32xf32>
    %562 = arith.addf %560, %561 : vector<2x32xf32>
    %563 = arith.negf %562 : vector<2x32xf32>
    %564 = math.exp %563 : vector<2x32xf32>
    %cst_168 = arith.constant 1.000000e+00 : f32
    %565 = vector.broadcast %cst_168 : f32 to vector<2x32xf32>
    %566 = arith.addf %565, %564 : vector<2x32xf32>
    %567 = arith.divf %565, %566 : vector<2x32xf32>
    %568 = vector.extract_strided_slice %557 {offsets = [0, 32], sizes = [2, 32], strides = [1, 1]} : vector<2x96xf32> to vector<2x32xf32>
    %569 = vector.extract_strided_slice %549 {offsets = [0, 32], sizes = [2, 32], strides = [1, 1]} : vector<2x96xf32> to vector<2x32xf32>
    %570 = arith.addf %568, %569 : vector<2x32xf32>
    %571 = arith.negf %570 : vector<2x32xf32>
    %572 = math.exp %571 : vector<2x32xf32>
    %cst_169 = arith.constant 1.000000e+00 : f32
    %573 = vector.broadcast %cst_169 : f32 to vector<2x32xf32>
    %574 = arith.addf %573, %572 : vector<2x32xf32>
    %575 = arith.divf %573, %574 : vector<2x32xf32>
    %576 = vector.extract_strided_slice %557 {offsets = [0, 64], sizes = [2, 32], strides = [1, 1]} : vector<2x96xf32> to vector<2x32xf32>
    %577 = vector.extract_strided_slice %549 {offsets = [0, 64], sizes = [2, 32], strides = [1, 1]} : vector<2x96xf32> to vector<2x32xf32>
    %578 = arith.addf %577, %26 : vector<2x32xf32>
    %579 = arith.mulf %567, %578 : vector<2x32xf32>
    %580 = arith.addf %576, %579 : vector<2x32xf32>
    %581 = math.tanh %580 : vector<2x32xf32>
    %cst_170 = arith.constant 1.000000e+00 : f32
    %582 = vector.broadcast %cst_170 : f32 to vector<2x32xf32>
    %583 = arith.subf %582, %575 : vector<2x32xf32>
    %584 = arith.mulf %583, %581 : vector<2x32xf32>
    %585 = arith.mulf %575, %512 : vector<2x32xf32>
    %586 = arith.addf %584, %585 : vector<2x32xf32>
    %587 = vector.extract_strided_slice %559 {offsets = [0, 0], sizes = [2, 32], strides = [1, 1]} : vector<2x96xf32> to vector<2x32xf32>
    %588 = vector.extract_strided_slice %550 {offsets = [0, 0], sizes = [2, 32], strides = [1, 1]} : vector<2x96xf32> to vector<2x32xf32>
    %589 = arith.addf %587, %588 : vector<2x32xf32>
    %590 = arith.negf %589 : vector<2x32xf32>
    %591 = math.exp %590 : vector<2x32xf32>
    %cst_171 = arith.constant 1.000000e+00 : f32
    %592 = vector.broadcast %cst_171 : f32 to vector<2x32xf32>
    %593 = arith.addf %592, %591 : vector<2x32xf32>
    %594 = arith.divf %592, %593 : vector<2x32xf32>
    %595 = vector.extract_strided_slice %559 {offsets = [0, 32], sizes = [2, 32], strides = [1, 1]} : vector<2x96xf32> to vector<2x32xf32>
    %596 = vector.extract_strided_slice %550 {offsets = [0, 32], sizes = [2, 32], strides = [1, 1]} : vector<2x96xf32> to vector<2x32xf32>
    %597 = arith.addf %595, %596 : vector<2x32xf32>
    %598 = arith.negf %597 : vector<2x32xf32>
    %599 = math.exp %598 : vector<2x32xf32>
    %cst_172 = arith.constant 1.000000e+00 : f32
    %600 = vector.broadcast %cst_172 : f32 to vector<2x32xf32>
    %601 = arith.addf %600, %599 : vector<2x32xf32>
    %602 = arith.divf %600, %601 : vector<2x32xf32>
    %603 = vector.extract_strided_slice %559 {offsets = [0, 64], sizes = [2, 32], strides = [1, 1]} : vector<2x96xf32> to vector<2x32xf32>
    %604 = vector.extract_strided_slice %550 {offsets = [0, 64], sizes = [2, 32], strides = [1, 1]} : vector<2x96xf32> to vector<2x32xf32>
    %605 = arith.addf %604, %29 : vector<2x32xf32>
    %606 = arith.mulf %594, %605 : vector<2x32xf32>
    %607 = arith.addf %603, %606 : vector<2x32xf32>
    %608 = math.tanh %607 : vector<2x32xf32>
    %cst_173 = arith.constant 1.000000e+00 : f32
    %609 = vector.broadcast %cst_173 : f32 to vector<2x32xf32>
    %610 = arith.subf %609, %602 : vector<2x32xf32>
    %611 = arith.mulf %610, %608 : vector<2x32xf32>
    %612 = arith.mulf %602, %539 : vector<2x32xf32>
    %613 = arith.addf %611, %612 : vector<2x32xf32>
    %614 = arith.index_cast %c7_i32_160 : i32 to index
    %c0_174 = arith.constant 0 : index
    %c0_175 = arith.constant 0 : index
    %615 = vector.load %arg12[%614, %c0_174, %c0_175] : memref<8x2x32xf32, #tpu.memory_space<vmem>>, vector<1x2x32xf32>
    %616 = vector.shape_cast %615 : vector<1x2x32xf32> to vector<2x32xf32>
    %617 = vector.shape_cast %586 : vector<2x32xf32> to vector<1x2x32xf32>
    tpu.vector_store %arg12[%614, %c0_174, %c0_175], %617 {strides = array<i32>} : memref<8x2x32xf32, #tpu.memory_space<vmem>>, vector<1x2x32xf32>,
    %c7_i32_176 = arith.constant 7 : i32
    %618 = arith.subi %c7_i32_176, %c7_i32_160 : i32
    %619 = arith.index_cast %618 : i32 to index
    %c0_177 = arith.constant 0 : index
    %c0_178 = arith.constant 0 : index
    %620 = vector.load %arg13[%619, %c0_177, %c0_178] : memref<8x2x32xf32, #tpu.memory_space<vmem>>, vector<1x2x32xf32>
    %621 = vector.shape_cast %620 : vector<1x2x32xf32> to vector<2x32xf32>
    %622 = vector.shape_cast %613 : vector<2x32xf32> to vector<1x2x32xf32>
    tpu.vector_store %arg13[%619, %c0_177, %c0_178], %622 {strides = array<i32>} : memref<8x2x32xf32, #tpu.memory_space<vmem>>, vector<1x2x32xf32>,
    %c8_i32 = arith.constant 8 : i32
    return
  }
}

module attributes {stable_mosaic.version = 11 : i64} {
  func.func @kernel(%arg0: memref<16x32xf32, #tpu.memory_space<vmem>>, %arg1: memref<16x32xf32, #tpu.memory_space<vmem>>, %arg2: memref<32x32xf32, #tpu.memory_space<vmem>>, %arg3: memref<32x32xf32, #tpu.memory_space<vmem>>, %arg4: memref<1x32xf32, #tpu.memory_space<vmem>>, %arg5: memref<1x32xf32, #tpu.memory_space<vmem>>, %arg6: memref<1x1xf32, #tpu.memory_space<vmem>>, %arg7: memref<32x3xf32, #tpu.memory_space<vmem>>, %arg8: memref<32x3xf32, #tpu.memory_space<vmem>>, %arg9: memref<1x3xf32, #tpu.memory_space<vmem>>, %arg10: memref<2x3xf32, #tpu.memory_space<vmem>>, %arg11: memref<8x2x1xf32, #tpu.memory_space<vmem>>) attributes {dimension_semantics = [], scalar_prefetch = 0 : i64, scratch_operands = 0 : i64, tpu.core_type = #tpu.core_type<tc>} {
    %c0 = arith.constant 0 : index
    %c0_0 = arith.constant 0 : index
    %0 = vector.load %arg0[%c0, %c0_0] : memref<16x32xf32, #tpu.memory_space<vmem>>, vector<16x32xf32>
    %c0_1 = arith.constant 0 : index
    %c0_2 = arith.constant 0 : index
    %1 = vector.load %arg2[%c0_1, %c0_2] : memref<32x32xf32, #tpu.memory_space<vmem>>, vector<32x32xf32>
    %cst = arith.constant dense<0.000000e+00> : vector<16x32xf32>
    %2 = tpu.matmul %0, %1, %cst {dimension_numbers = #tpu.dot_dimension_numbers<[1], [0], [0], [1], [0, 0, 1, 1], [], []>} : vector<16x32xf32>, vector<32x32xf32>, vector<16x32xf32> -> vector<16x32xf32>
    %c0_3 = arith.constant 0 : index
    %c0_4 = arith.constant 0 : index
    %3 = vector.load %arg1[%c0_3, %c0_4] : memref<16x32xf32, #tpu.memory_space<vmem>>, vector<16x32xf32>
    %c0_5 = arith.constant 0 : index
    %c0_6 = arith.constant 0 : index
    %4 = vector.load %arg3[%c0_5, %c0_6] : memref<32x32xf32, #tpu.memory_space<vmem>>, vector<32x32xf32>
    %cst_7 = arith.constant dense<0.000000e+00> : vector<16x32xf32>
    %5 = tpu.matmul %3, %4, %cst_7 {dimension_numbers = #tpu.dot_dimension_numbers<[1], [0], [0], [1], [0, 0, 1, 1], [], []>} : vector<16x32xf32>, vector<32x32xf32>, vector<16x32xf32> -> vector<16x32xf32>
    %6 = arith.addf %2, %5 : vector<16x32xf32>
    %c0_8 = arith.constant 0 : index
    %c0_9 = arith.constant 0 : index
    %7 = vector.load %arg4[%c0_8, %c0_9] : memref<1x32xf32, #tpu.memory_space<vmem>>, vector<1x32xf32>
    %8 = vector.broadcast %7 : vector<1x32xf32> to vector<16x32xf32>
    %9 = arith.addf %6, %8 : vector<16x32xf32>
    %10 = math.tanh %9 : vector<16x32xf32>
    %c0_10 = arith.constant 0 : index
    %c0_11 = arith.constant 0 : index
    %11 = vector.load %arg5[%c0_10, %c0_11] : memref<1x32xf32, #tpu.memory_space<vmem>>, vector<1x32xf32>
    %12 = vector.broadcast %11 : vector<1x32xf32> to vector<16x32xf32>
    %13 = arith.mulf %10, %12 : vector<16x32xf32>
    %cst_12 = arith.constant dense<0.000000e+00> : vector<16xf32>
    %14 = vector.multi_reduction <add>, %13, %cst_12 [1] : vector<16x32xf32> to vector<16xf32>
    %15 = vector.shape_cast %14 : vector<16xf32> to vector<16x1xf32>
    %c0_13 = arith.constant 0 : index
    %c0_14 = arith.constant 0 : index
    %16 = vector.load %arg6[%c0_13, %c0_14] : memref<1x1xf32, #tpu.memory_space<vmem>>, vector<1x1xf32>
    %17 = vector.broadcast %16 : vector<1x1xf32> to vector<16x1xf32>
    %18 = arith.addf %15, %17 : vector<16x1xf32>
    %19 = vector.shape_cast %18 : vector<16x1xf32> to vector<8x2x1xf32>
    %cst_15 = arith.constant dense<0xFF800000> : vector<2x1xf32>
    %20 = vector.multi_reduction <maximumf>, %19, %cst_15 [0] : vector<8x2x1xf32> to vector<2x1xf32>
    %21 = vector.shape_cast %20 : vector<2x1xf32> to vector<1x2x1xf32>
    %22 = vector.broadcast %21 : vector<1x2x1xf32> to vector<8x2x1xf32>
    %23 = arith.subf %19, %22 : vector<8x2x1xf32>
    %24 = math.exp %23 : vector<8x2x1xf32>
    %cst_16 = arith.constant dense<0.000000e+00> : vector<2x1xf32>
    %25 = vector.multi_reduction <add>, %24, %cst_16 [0] : vector<8x2x1xf32> to vector<2x1xf32>
    %26 = vector.shape_cast %25 : vector<2x1xf32> to vector<1x2x1xf32>
    %27 = vector.broadcast %26 : vector<1x2x1xf32> to vector<8x2x1xf32>
    %28 = arith.divf %24, %27 : vector<8x2x1xf32>
    %c0_17 = arith.constant 0 : index
    %c0_18 = arith.constant 0 : index
    %c0_19 = arith.constant 0 : index
    %29 = vector.load %arg11[%c0_17, %c0_18, %c0_19] : memref<8x2x1xf32, #tpu.memory_space<vmem>>, vector<8x2x1xf32>
    tpu.vector_store %arg11[%c0_17, %c0_18, %c0_19], %28 {strides = array<i32>} : memref<8x2x1xf32, #tpu.memory_space<vmem>>, vector<8x2x1xf32>,
    %c0_20 = arith.constant 0 : index
    %c0_21 = arith.constant 0 : index
    %30 = vector.load %arg0[%c0_20, %c0_21] : memref<16x32xf32, #tpu.memory_space<vmem>>, vector<16x32xf32>
    %31 = vector.shape_cast %30 : vector<16x32xf32> to vector<8x2x32xf32>
    %32 = vector.broadcast %28 : vector<8x2x1xf32> to vector<8x2x32xf32>
    %33 = arith.mulf %32, %31 : vector<8x2x32xf32>
    %cst_22 = arith.constant dense<0.000000e+00> : vector<2x32xf32>
    %34 = vector.multi_reduction <add>, %33, %cst_22 [0] : vector<8x2x32xf32> to vector<2x32xf32>
    %c0_23 = arith.constant 0 : index
    %c0_24 = arith.constant 0 : index
    %35 = vector.load %arg1[%c0_23, %c0_24] : memref<16x32xf32, #tpu.memory_space<vmem>>, vector<16x32xf32>
    %36 = vector.shape_cast %35 : vector<16x32xf32> to vector<8x2x32xf32>
    %37 = vector.broadcast %28 : vector<8x2x1xf32> to vector<8x2x32xf32>
    %38 = arith.mulf %37, %36 : vector<8x2x32xf32>
    %cst_25 = arith.constant dense<0.000000e+00> : vector<2x32xf32>
    %39 = vector.multi_reduction <add>, %38, %cst_25 [0] : vector<8x2x32xf32> to vector<2x32xf32>
    %c0_26 = arith.constant 0 : index
    %c0_27 = arith.constant 0 : index
    %40 = vector.load %arg7[%c0_26, %c0_27] : memref<32x3xf32, #tpu.memory_space<vmem>>, vector<32x3xf32>
    %cst_28 = arith.constant dense<0.000000e+00> : vector<2x3xf32>
    %41 = tpu.matmul %34, %40, %cst_28 {dimension_numbers = #tpu.dot_dimension_numbers<[1], [0], [0], [1], [0, 0, 1, 1], [], []>} : vector<2x32xf32>, vector<32x3xf32>, vector<2x3xf32> -> vector<2x3xf32>
    %c0_29 = arith.constant 0 : index
    %c0_30 = arith.constant 0 : index
    %42 = vector.load %arg8[%c0_29, %c0_30] : memref<32x3xf32, #tpu.memory_space<vmem>>, vector<32x3xf32>
    %cst_31 = arith.constant dense<0.000000e+00> : vector<2x3xf32>
    %43 = tpu.matmul %39, %42, %cst_31 {dimension_numbers = #tpu.dot_dimension_numbers<[1], [0], [0], [1], [0, 0, 1, 1], [], []>} : vector<2x32xf32>, vector<32x3xf32>, vector<2x3xf32> -> vector<2x3xf32>
    %44 = arith.addf %41, %43 : vector<2x3xf32>
    %c0_32 = arith.constant 0 : index
    %c0_33 = arith.constant 0 : index
    %45 = vector.load %arg9[%c0_32, %c0_33] : memref<1x3xf32, #tpu.memory_space<vmem>>, vector<1x3xf32>
    %46 = vector.broadcast %45 : vector<1x3xf32> to vector<2x3xf32>
    %47 = arith.addf %44, %46 : vector<2x3xf32>
    %c0_34 = arith.constant 0 : index
    %c0_35 = arith.constant 0 : index
    %48 = vector.load %arg10[%c0_34, %c0_35] : memref<2x3xf32, #tpu.memory_space<vmem>>, vector<2x3xf32>
    tpu.vector_store %arg10[%c0_34, %c0_35], %47 {strides = array<i32>} : memref<2x3xf32, #tpu.memory_space<vmem>>, vector<2x3xf32>,
    return
  }
}

</mosaic_0001>

<bundles_post_ra>
// kernel: gru_attention_forward.5
= control target key start
LH: loop header
LB: loop body
LE: loop exit
PB: predicated region body
PF: predicated region fallthrough
CT: control target
= control target key end

     0   :  { %s1217_s0 = inlined_call_operand.vmem [shape: f32[16,32], index: 0, kind: input, shape index: {}]   ;;  %s1218_s1 = inlined_call_operand.vmem [shape: f32[16,32], index: 1, kind: input, shape index: {}]   ;;  %s1219_s2 = inlined_call_operand.vmem [shape: f32[32,32], index: 2, kind: input, shape index: {}]   ;;  %s1220_s3 = inlined_call_operand.vmem [shape: f32[32,32], index: 3, kind: input, shape index: {}]   ;;  %s1221_s4 = inlined_call_operand.vmem [shape: f32[1,32], index: 4, kind: input, shape index: {}]   ;;  %s1222_s5 = inlined_call_operand.vmem [shape: f32[1,32], index: 5, kind: input, shape index: {}]   ;;  %s1223_s6 = inlined_call_operand.<no memory space> [shape: f32[1,1], index: 6, kind: input, shape index: {}]   ;;  %s1224_s7 = inlined_call_operand.vmem [shape: f32[32,3], index: 7, kind: input, shape index: {}]   ;;  %s1225_s8 = inlined_call_operand.vmem [shape: f32[32,3], index: 8, kind: input, shape index: {}]   ;;  %s1226_s9 = inlined_call_operand.vmem [shape: f32[1,3], index: 9, kind: input, shape index: {}]   ;;  %s1227_s10 = inlined_call_operand.hbm [shape: f32[2,3], index: 10, kind: output, shape index: {0}]   ;;  %s1228_s11 = inlined_call_operand.vmem [shape: f32[8,2,1], index: 11, kind: output, shape index: {1}]  }
   0x1   :  { %v17_v0 = vstv %s1223_s6 }
   0x2   :  { %18 = vst [vmem:[#allocation2] sm:$0x1] %v17_v0 }
   0x3   :  { %v48_v1 = vld [vmem:[%s1220_s3] sm:$0xff]  ;;  %v49_v2 = vld [vmem:[%s1220_s3 + $0x8] sm:$0xff]  ;;  %v50_v3 = vld [vmem:[%s1220_s3 + $0x10] sm:$0xff]  ;;  %vm52_vm0 = vcmask 261120  }
   0x4   :  { %v859_v4 = vpack.c.bf16 %v49_v2, %v48_v1  ;;  %v51_v5 = vld [vmem:[%s1220_s3 + $0x18] sm:$0xff]  ;;  %v1029_v6 = vld [vmem:[%s1218_s1] sm:$0xff]  ;;  %v43_v9 = vld [vmem:[%s1219_s2 + $0x8] sm:$0xff] }
   0x5   :  { %v863_v7 = vpack.c.bf16 %v51_v5, %v50_v3  ;;  %823 = vmatprep.mubr.msk.f32.mxu0 %vm52_vm0, %v1029_v6  ;;  %v42_v8 = vld [vmem:[%s1219_s2] sm:$0xff] }
   0x6   :  { %860 = vmatprep.subr.bf16.mxu0 %v859_v4 }
   0x7   :  { %862 = vmatpush3.bf16.msra.mxu0 %v859_v4 }
   0x8   :  { %19 = vsyncpa [#allocation4], 0  ;;  %864 = vmatprep.subr.bf16.mxu0 %v863_v7  ;;  %v867_v10 = vpack.c.bf16 %v43_v9, %v42_v8  ;;  %v44_v11 = vld [vmem:[%s1219_s2 + $0x10] sm:$0xff]  ;;  %v45_v12 = vld [vmem:[%s1219_s2 + $0x18] sm:$0xff]  ;;  %v944_v29 = vmov 0   ;;  %v256_v32 = vlaneseq  ;;  %vm294_vm1 = vcmask 1024  }
   0x9   :  { %v1048_v13 = vld [vmem:[%s1218_s1 + $0x8] sm:$0xff]  ;;  %v871_v14 = vpack.c.bf16 %v45_v12, %v44_v11  ;;  %v1053_v15 = vld [vmem:[%s1217_s0] sm:$0xff]  ;;  %897 = vset.pattern.permute.xlu0 %v944_v29  ;;  %896 = vset.pattern.permute.xlu1 %v944_v29  ;;  %v945_v30 = vmov 1983009808   ;;  %vm947_vm2 = vmmov 0   ;;  %vm516_vm3 = vcmask 254976  }
   0xa   :  { %v1062_v16 = vld [vmem:[%s1217_s0 + $0x8] sm:$0xff]  ;;  %v787_v17 = vld [vmem:[%s1221_s4] ss:$0 sm:$0xff]  ;;  %v254_v31 = vunpack.c.l.s4 %v945_v30  ;;  %v1074_v34 = vshrl.u32 %v256_v32, 7  ;;  %s950_s26 = smov [#allocation3]   ;;  %vm763_vm4 = vcmask 17408  }
   0xb   :  { %866 = vmatpush3.bf16.msra.mxu0 %v863_v7  ;;  %v788_v22 = vld [vmem:[%s1222_s5] ss:$0 sm:$0xff]  ;;  %s771_s6 = sshll.u32 %s950_s26, 4  ;;  %s772_s6 = int_to_ptr.vmem [resolvable:$true] %s771_s6 }
   0xc   :  { %868 = vmatprep.subr.bf16.mxu0 %v867_v10  ;;  %v255_v33 = vunpack.c.0.s8 %v254_v31  ;;  %v789_v35 = vld [vmem:[#allocation2] ss:$0 sm:$0xff]  ;;  %s920_s27 = scalar_lea.vmem %s772_s6, 32  ;;  %p925_p1 = scmp.lt.s32.totalorder %s772_s6, %s772_s6 }
   0xd   :  { %p921_p0 = scmp.ne.s32.totalorder %s772_s6, %s920_s27  ;;  %p926_p2 = scmp.lt.s32.totalorder %s920_s27, %s920_s27 }
   0xe   :  { %824 = vmatmul.mubr.msk.f32.vlgmr.msra.gmra.mrb[0].mxu0 %vm52_vm0, %v1048_v13  ;;  %v1077_v36 = vsub.s32 %v255_v33, %v1074_v34 }
   0xf   :  { %870 = vmatpush3.bf16.msra.mxu0 %v867_v10  ;;  %834 = vmatprep.mubr.msk.f32.mxu0 %vm52_vm0, %v1053_v15  ;;  %p927_p3 = por %p926_p2, %p925_p1 }
  0x10   :  { %872 = vmatprep.subr.bf16.mxu0 %v871_v14 }
  0x11   :  { %p928_p4 = pnand %p927_p3, %p921_p0 }
  0x13   :  { %874 = vmatpush3.bf16.msra.mxu0 %v871_v14 }
  0x16   :  { %835 = vmatmul.mubr.msk.f32.vlgmr.msra.gmra.mrb[0].mxu0 %vm52_vm0, %v1062_v16 }
  0xe9   :  { %v836_v18 = vpop.f32.mrb[0].mxu0 }
  0xea   :  { %v223_v19 = vadd.f32 %v836_v18, %v787_v17  ;;  %v206_v20 = vpop.f32.mrb[1].mxu0 }
  0xeb   :  { %v222_v21 = vadd.f32 %v787_v17, %v206_v20 }
  0xec   :  { %898 = vtanh.f32 %v223_v19 }
  0xed   :  { %900 = vtanh.f32 %v222_v21 }
  0xf6   :  { %v899_v23 = vpop.eup %898 }
  0xf7   :  { %v901_v24 = vpop.eup %900  ;;  %v234_v27 = vmul.f32 %v899_v23, %v788_v22 }
  0xf8   :  { %v233_v25 = vmul.f32 %v901_v24, %v788_v22 }
  0xf9   :  { %v238_v28 = vsel %vm52_vm0, %v234_v27, 0.0 }
  0xfa   :  { %v235_v26 = vsel %vm52_vm0, %v233_v25, 0.0 }
  0xfb   :  { %236 = vadd.xlane.f32.xlu0 %v235_v26 }
  0xff   :  { %239 = vadd.xlane.f32.xlu0 %v238_v28 }
 0x188   :  { %v237_v37 = vpop.xlane.xlu0 %236 }
 0x189   :  { %v248_v38 = vadd.f32 %v789_v35, %v237_v37 }
 0x18b   :  { %v252_v39 = vcombine.high %v248_v38, %v248_v38  ;;  %v259_v40 = vrot.slane %v248_v38, %v1077_v36 }
 0x18c   :  { %v240_v41 = vpop.xlane.xlu0 %239 }
 0x18d   :  { %v266_v42 = vrot.slane %v252_v39, %v1077_v36  ;;  %v249_v43 = vadd.f32 %v789_v35, %v240_v41  ;;  %v267_v45 = vcombine.high %v259_v40, %v259_v40  ;;  %v295_v53 = vsel %vm294_vm1, %v259_v40, -inf }
 0x18f   :  { %v269_v44 = vcombine.high %v249_v43, %v249_v43  ;;  %v276_v46 = vrot.slane %v249_v43, %v1077_v36  ;;  %v268_v47 = vcombine.high %v266_v42, %v266_v42  ;;  %v296_v54 = vsel %vm294_vm1, %v267_v45, -inf }
 0x190   :  { %v297_v56 = vsel %vm294_vm1, %v266_v42, -inf }
 0x191   :  { %v283_v48 = vrot.slane %v269_v44, %v1077_v36  ;;  %v284_v49 = vcombine.high %v276_v46, %v276_v46  ;;  %v299_v51 = vsel %vm294_vm1, %v276_v46, -inf  ;;  %v298_v57 = vsel %vm294_vm1, %v268_v47, -inf }
 0x192   :  { %v300_v60 = vmax.f32 %v295_v53, %v299_v51 }
 0x193   :  { %v285_v50 = vcombine.high %v283_v48, %v283_v48  ;;  %v303_v52 = vsel %vm294_vm1, %v283_v48, -inf  ;;  %v301_v55 = vsel %vm294_vm1, %v284_v49, -inf }
 0x194   :  { %v302_v58 = vmax.f32 %v296_v54, %v301_v55  ;;  %v304_v61 = vmax.f32 %v297_v56, %v303_v52  ;;  %v605_v56 = vld [vmem:[%s1225_s8] sm:$0xff] }
 0x195   :  { %v305_v59 = vsel %vm294_vm1, %v285_v50, -inf }
 0x196   :  { %v306_v62 = vmax.f32 %v298_v57, %v305_v59  ;;  %v307_v63 = vmax.f32 %v300_v60, %v302_v58  ;;  %v606_v57 = vld [vmem:[%s1225_s8 + $0x8] sm:$0xff]  ;;  %v946_v59 = vmov 0.0|0.0   ;;  %v607_v60 = vld [vmem:[%s1225_s8 + $0x10] sm:$0xff] }
 0x197   :  { %v876_v58 = vpack.c.bf16 %v606_v57, %v605_v56  ;;  %875 = vmatprep.subr.bf16.mxu1 %v946_v59 }
 0x198   :  { %v308_v0 = vmax.f32 %v304_v61, %v306_v62  ;;  %v608_v61 = vld [vmem:[%s1225_s8 + $0x18] sm:$0xff] }
 0x199   :  { %877 = vmatpush3.bf16.msra.mxu1 %v876_v58  ;;  %v879_v62 = vpack.c.bf16 %v608_v61, %v607_v60 }
 0x19a   :  { %v309_v1 = vmax.f32 %v307_v63, %v308_v0  ;;  %878 = vmatprep.subr.bf16.mxu1 %v946_v59  ;;  %v948_v63 = vmov 0.0   ;;  %v949_v0 = vmov 269488144  }
 0x19b   :  { %845 = vmatprep.mubr.msk.f32.mxu1 %vm947_vm2, %v948_v63 }
 0x19c   :  { %v310_v2 = vsub.f32 %v259_v40, %v309_v1  ;;  %v311_v3 = vsub.f32 %v267_v45, %v309_v1  ;;  %v312_v4 = vsub.f32 %v266_v42, %v309_v1  ;;  %v313_v5 = vsub.f32 %v268_v47, %v309_v1 }
 0x19d   :  { %v314_v8 = vsub.f32 %v276_v46, %v309_v1  ;;  %v315_v11 = vsub.f32 %v284_v49, %v309_v1  ;;  %v316_v14 = vsub.f32 %v283_v48, %v309_v1  ;;  %v317_v18 = vsub.f32 %v285_v50, %v309_v1  ;;  %880 = vmatpush3.bf16.msra.mxu1 %v879_v62 }
 0x19e   :  { %v318_v7 = vmul.f32 1.442695, %v310_v2  ;;  %v320_v9 = vmul.f32 1.442695, %v311_v3  ;;  %v322_v10 = vmul.f32 1.442695, %v312_v4  ;;  %881 = vmatprep.subr.bf16.mxu1 %v946_v59  ;;  %v418_v1 = vunpack.c.l.s4 %v949_v0 }
 0x19f   :  { %v324_v12 = vmul.f32 1.442695, %v313_v5  ;;  %v326_v17 = vmul.f32 1.442695, %v314_v8  ;;  %v328_v19 = vmul.f32 1.442695, %v315_v11  ;;  %v543_v5 = vrot.slane %v1029_v6, %v1077_v36 }
 0x1a0   :  { %902 = vpow2.f32 %v318_v7  ;;  %v330_v20 = vmul.f32 1.442695, %v316_v14  ;;  %v332_v21 = vmul.f32 1.442695, %v317_v18  ;;  %v419_v2 = vunpack.c.0.s8 %v418_v1 }
 0x1a1   :  { %904 = vpow2.f32 %v320_v9  ;;  %v551_v7 = vcombine.high %v543_v5, %v543_v5  ;;  %v536_v9 = vcombine.high %v1029_v6, %v1029_v6  ;;  %v370_v6 = vcombine.high %v1053_v15, %v1053_v15 }
 0x1a2   :  { %906 = vpow2.f32 %v322_v10  ;;  %v422_v4 = vsub.s32 %v419_v2, %v1074_v34 }
 0x1a3   :  { %908 = vpow2.f32 %v324_v12  ;;  %v550_v18 = vrot.slane %v536_v9, %v1077_v36  ;;  %v601_v9 = vld [vmem:[%s1224_s7] sm:$0xff] }
 0x1a4   :  { %910 = vpow2.f32 %v326_v17 }
 0x1a5   :  { %912 = vpow2.f32 %v328_v19 }
 0x1a6   :  { %914 = vpow2.f32 %v330_v20  ;;  %v377_v20 = vrot.slane %v1053_v15, %v1077_v36 }
 0x1a7   :  { %916 = vpow2.f32 %v332_v21 }
 0x1a8   :  { %v385_v21 = vcombine.high %v377_v20, %v377_v20 }
 0x1aa   :  { %v903_v22 = vpop.eup %902 }
 0x1ab   :  { %v905_v23 = vpop.eup %904  ;;  %v334_v24 = vsel %vm294_vm1, %v903_v22, 0.0 }
 0x1ac   :  { %v907_v25 = vpop.eup %906  ;;  %v335_v26 = vsel %vm294_vm1, %v905_v23, 0.0 }
 0x1ad   :  { %v909_v27 = vpop.eup %908  ;;  %v336_v28 = vadd.f32 %v335_v26, %v334_v24  ;;  %v337_v29 = vsel %vm294_vm1, %v907_v25, 0.0 }
 0x1ae   :  { %v911_v30 = vpop.eup %910  ;;  %v339_v32 = vsel %vm294_vm1, %v909_v27, 0.0 }
 0x1af   :  { %v338_v31 = vadd.f32 %v337_v29, %v336_v28  ;;  %v913_v33 = vpop.eup %912  ;;  %v341_v37 = vsel %vm294_vm1, %v911_v30, 0.0  ;;  %v560_v28 = vrot.slane %v1048_v13, %v1077_v36 }
 0x1b0   :  { %v915_v38 = vpop.eup %914  ;;  %v343_v40 = vsel %vm294_vm1, %v913_v33, 0.0 }
 0x1b1   :  { %v340_v35 = vadd.f32 %v339_v32, %v338_v31  ;;  %v917_v41 = vpop.eup %916  ;;  %v345_v43 = vsel %vm294_vm1, %v915_v38, 0.0 }
 0x1b2   :  { %v347_v45 = vsel %vm294_vm1, %v917_v41, 0.0 }
 0x1b3   :  { %v342_v39 = vadd.f32 %v341_v37, %v340_v35  ;;  %v553_v35 = vcombine.high %v1048_v13, %v1048_v13  ;;  %v384_v37 = vrot.slane %v370_v6, %v1077_v36  ;;  %v394_v13 = vrot.slane %v1062_v16, %v1077_v36 }
 0x1b5   :  { %v344_v42 = vadd.f32 %v343_v40, %v342_v39  ;;  %v402_v56 = vcombine.high %v394_v13, %v394_v13 }
 0x1b7   :  { %v346_v44 = vadd.f32 %v345_v43, %v344_v42  ;;  %v386_v42 = vcombine.high %v384_v37, %v384_v37 }
 0x1b9   :  { %v348_v46 = vadd.f32 %v347_v45, %v346_v44 }
 0x1bb   :  { %918 = vrcp.f32 %v348_v46 }
 0x1c5   :  { %v919_v47 = vpop.eup %918 }
 0x1c6   :  { %v352_v48 = vmul.f32 %v919_v47, %v907_v25  ;;  %v350_v49 = vmul.f32 %v919_v47, %v903_v22  ;;  %v351_v50 = vmul.f32 %v919_v47, %v905_v23  ;;  %v353_v51 = vmul.f32 %v919_v47, %v909_v27 }
 0x1c7   :  { %v354_v52 = vmul.f32 %v919_v47, %v911_v30  ;;  %v355_v53 = vmul.f32 %v919_v47, %v913_v33  ;;  %v356_v54 = vmul.f32 %v919_v47, %v915_v38  ;;  %v357_v55 = vmul.f32 %v919_v47, %v917_v41 }
 0x1c8   :  { %438 = vperm.xlu0 %897, %v352_v48   ;;  %360 = vst.msk [vmem:[%s1228_s11 + $0x4] sm:$0x3] %vm294_vm1, %v352_v48  ;;  %414 = vperm.xlu1 %896, %v350_v49   ;;  %358 = vst.msk [vmem:[%s1228_s11] sm:$0x3] %vm294_vm1, %v350_v49  ;;  %v552_v23 = vcombine.high %v550_v18, %v550_v18  ;;  %v568_v33 = vcombine.high %v560_v28, %v560_v28 }
 0x1c9   :  { %359 = vst.msk [vmem:[%s1228_s11 + $0x2] sm:$0x3] %vm294_vm1, %v351_v50  ;;  %361 = vst.msk [vmem:[%s1228_s11 + $0x6] sm:$0x3] %vm294_vm1, %v353_v51  ;;  %v567_v47 = vrot.slane %v553_v35, %v1077_v36  ;;  %v387_v48 = vcombine.high %v1062_v16, %v1062_v16 }
 0x1ca   :  { %362 = vst.msk [vmem:[%s1228_s11 + $0x8] sm:$0x3] %vm294_vm1, %v354_v52  ;;  %363 = vst.msk [vmem:[%s1228_s11 + $0xa] sm:$0x3] %vm294_vm1, %v355_v53 }
 0x1cb   :  { %364 = vst.msk [vmem:[%s1228_s11 + $0xc] sm:$0x3] %vm294_vm1, %v356_v54  ;;  %365 = vst.msk [vmem:[%s1228_s11 + $0xe] sm:$0x3] %vm294_vm1, %v357_v55  ;;  %v569_v61 = vcombine.high %v567_v47, %v567_v47  ;;  %v401_v0 = vrot.slane %v387_v48, %v1077_v36 }
 0x1cc   :  { %426 = vperm.xlu1 %896, %v351_v50  }
 0x1d0   :  { %450 = vperm.xlu1 %896, %v353_v51  }
 0x1d4   :  { %462 = vperm.xlu1 %896, %v354_v52  }
 0x1d8   :  { %474 = vperm.xlu1 %896, %v355_v53  }
 0x1dc   :  { %486 = vperm.xlu1 %896, %v356_v54  }
 0x1e0   :  { %498 = vperm.xlu1 %896, %v357_v55  }
 0x247   :  { %v415_v3 = vpop.permute.xlu1 %414  ;;  %v439_v11 = vpop.permute.xlu0 %438 }
 0x248   :  { %v423_v10 = vrot.slane %v415_v3, %v422_v4  ;;  %v447_v19 = vrot.slane %v439_v11, %v422_v4 }
 0x24a   :  { %v578_v34 = vmul.f32 %v543_v5, %v423_v10  ;;  %v580_v26 = vmul.f32 %v550_v18, %v447_v19  ;;  %v508_v39 = vmul.f32 %v423_v10, %v377_v20  ;;  %v510_v50 = vmul.f32 %v447_v19, %v384_v37  ;;  %v602_v10 = vld [vmem:[%s1224_s7 + $0x8] sm:$0xff]  ;;  %v792_v37 = vld [vmem:[%s1226_s9] ss:$0 sm:$0xff] }
 0x24b   :  { %v427_v8 = vpop.permute.xlu1 %426  ;;  %v882_v20 = vpack.c.bf16 %v602_v10, %v601_v9 }
 0x24c   :  { %v435_v12 = vrot.slane %v427_v8, %v422_v4  ;;  %v586_v27 = vsel %vm516_vm3, %v578_v34, 0.0  ;;  %v589_v15 = vsel %vm516_vm3, %v580_v26, 0.0  ;;  %v517_v51 = vsel %vm516_vm3, %v508_v39, 0.0 }
 0x24d   :  { %v520_v16 = vsel %vm516_vm3, %v510_v50, 0.0 }
 0x24e   :  { %v579_v14 = vmul.f32 %v551_v7, %v435_v12  ;;  %v509_v31 = vmul.f32 %v435_v12, %v385_v21  ;;  %v403_v12 = vcombine.high %v401_v0, %v401_v0 }
 0x24f   :  { %v451_v17 = vpop.permute.xlu1 %450 }
 0x250   :  { %v587_v22 = vsel %vm516_vm3, %v579_v14, 0.0  ;;  %v459_v24 = vrot.slane %v451_v17, %v422_v4  ;;  %v518_v44 = vsel %vm516_vm3, %v509_v31, 0.0 }
 0x251   :  { %v588_v29 = vadd.f32 %v587_v22, %v586_v27  ;;  %v519_v54 = vadd.f32 %v518_v44, %v517_v51  ;;  %v603_v22 = vld [vmem:[%s1224_s7 + $0x10] sm:$0xff] }
 0x252   :  { %v581_v32 = vmul.f32 %v552_v23, %v459_v24  ;;  %v511_v57 = vmul.f32 %v459_v24, %v386_v42  ;;  %v604_v23 = vld [vmem:[%s1224_s7 + $0x18] sm:$0xff] }
 0x253   :  { %v463_v25 = vpop.permute.xlu1 %462  ;;  %v590_v43 = vadd.f32 %v589_v15, %v588_v29  ;;  %v521_v7 = vadd.f32 %v520_v16, %v519_v54  ;;  %v885_v27 = vpack.c.bf16 %v604_v23, %v603_v22 }
 0x254   :  { %v471_v30 = vrot.slane %v463_v25, %v422_v4  ;;  %v591_v45 = vsel %vm516_vm3, %v581_v32, 0.0  ;;  %v522_v11 = vsel %vm516_vm3, %v511_v57, 0.0 }
 0x255   :  { %v592_v55 = vadd.f32 %v591_v45, %v590_v43  ;;  %v523_v34 = vadd.f32 %v522_v11, %v521_v7 }
 0x256   :  { %v582_v40 = vmul.f32 %v560_v28, %v471_v30  ;;  %v512_v2 = vmul.f32 %v471_v30, %v394_v13 }
 0x257   :  { %v475_v38 = vpop.permute.xlu1 %474 }
 0x258   :  { %v483_v41 = vrot.slane %v475_v38, %v422_v4  ;;  %v593_v52 = vsel %vm516_vm3, %v582_v40, 0.0  ;;  %v524_v18 = vsel %vm516_vm3, %v512_v2, 0.0 }
 0x259   :  { %v594_v62 = vadd.f32 %v593_v52, %v592_v55  ;;  %v525_v25 = vadd.f32 %v524_v18, %v523_v34 }
 0x25a   :  { %v583_v46 = vmul.f32 %v568_v33, %v483_v41  ;;  %v513_v36 = vmul.f32 %v483_v41, %v402_v56 }
 0x25b   :  { %v487_v49 = vpop.permute.xlu1 %486 }
 0x25c   :  { %v495_v53 = vrot.slane %v487_v49, %v422_v4  ;;  %v595_v58 = vsel %vm516_vm3, %v583_v46, 0.0  ;;  %v526_v24 = vsel %vm516_vm3, %v513_v36, 0.0 }
 0x25d   :  { %v596_v8 = vadd.f32 %v595_v58, %v594_v62  ;;  %v527_v28 = vadd.f32 %v526_v24, %v525_v25 }
 0x25e   :  { %v584_v60 = vmul.f32 %v567_v47, %v495_v53  ;;  %v514_v19 = vmul.f32 %v495_v53, %v401_v0 }
 0x25f   :  { %v499_v1 = vpop.permute.xlu1 %498 }
 0x260   :  { %v597_v3 = vsel %vm516_vm3, %v584_v60, 0.0  ;;  %v507_v5 = vrot.slane %v499_v1, %v422_v4  ;;  %v528_v26 = vsel %vm516_vm3, %v514_v19, 0.0 }
 0x261   :  { %v598_v17 = vadd.f32 %v597_v3, %v596_v8  ;;  %v529_v30 = vadd.f32 %v528_v26, %v527_v28 }
 0x262   :  { %v585_v14 = vmul.f32 %v569_v61, %v507_v5  ;;  %v515_v6 = vmul.f32 %v507_v5, %v403_v12 }
 0x264   :  { %v599_v4 = vsel %vm516_vm3, %v585_v14, 0.0  ;;  %v530_v29 = vsel %vm516_vm3, %v515_v6, 0.0 }
 0x265   :  { %v600_v21 = vadd.f32 %v599_v4, %v598_v17  ;;  %v531_v31 = vadd.f32 %v530_v29, %v529_v30 }
 0x267   :  { %846 = vmatmul.mubr.msk.f32.vlgmr.msra.gmra.mrb[0].mxu1 %vm52_vm0, %v600_v21 }
 0x268   :  { %883 = vmatpush3.bf16.msra.mxu1 %v882_v20  ;;  %856 = vmatprep.mubr.msk.f32.mxu1 %vm947_vm2, %v948_v63 }
 0x269   :  { %884 = vmatprep.subr.bf16.mxu1 %v946_v59 }
 0x26c   :  { %886 = vmatpush3.bf16.msra.mxu1 %v885_v27 }
 0x26f   :  { %857 = vmatmul.mubr.msk.f32.vlgmr.msra.gmra.mrb[2].mxu1 %vm52_vm0, %v531_v31 }
 0x33a   :  { %v678_v32 = vpop.f32.mrb[0].mxu1 }
 0x33b   :  { %v847_v33 = vpop.f32.mrb[1].mxu1 }
 0x342   :  { %v751_v35 = vpop.f32.mrb[2].mxu1 }
 0x343   :  { %v752_v63 = vadd.f32 %v751_v35, %v678_v32  ;;  %v858_v38 = vpop.f32.mrb[3].mxu1 }
 0x345   :  { %v762_v59 = vadd.f32 %v792_v37, %v752_v63 }
 0x347   :  { %764 = vst.msk [vmem:[#allocation3] sm:$0x3] %vm763_vm4, %v762_v59 }
 0x348   :  { %931 = shalt.err (!%p928_p4)
}
 0x349   :  { %s932_s30 = scalar_lea.hbm %s1227_s10, 32 }
 0x34a   :  { %p933_p5 = scmp.ne.s32.totalorder %s1227_s10, %s932_s30  ;;  %p936_p6 = scmp.lt.u32.totalorder %s932_s30, %s1227_s10 }
 0x34c   :  { %p938_p7 = pnand %p936_p6, %p933_p5 }
 0x34e   :  { %941 = shalt.err (!%p938_p7)
}
 0x34f   :  { %774 = dma.vmem_to_hbm [thread:$0]  %s772_s6, 32, %s1227_s10, [#allocation4]  }
 0x350   :  { %942 = dma.done.wait [#allocation4], 32  }
 0x351   :  { %943 = vsyncadd [#allocation4], 4294967264 }
 0x352   :  { %782 = vsyncpa [#allocation4], 1 }

// kernel: gru_attention_forward.3
= control target key start
LH: loop header
LB: loop body
LE: loop exit
PB: predicated region body
PF: predicated region fallthrough
CT: control target
= control target key end

     0   :  { %vm52_vm0 = vcmask 1043456   ;;  %vm45_vm1 = vcmask 31744   ;;  %v2487_v10 = vmov 0.0|0.0   ;;  %vm2488_vm2 = vmmov 0   ;;  %s2921_s1 = inlined_call_operand.vmem [shape: f32[4,96], index: 1, kind: input, shape index: {}]   ;;  %s2922_s0 = inlined_call_operand.vmem [shape: f32[16,4], index: 0, kind: input, shape index: {}]   ;;  %s2923_s2 = inlined_call_operand.vmem [shape: f32[4,96], index: 2, kind: input, shape index: {}]   ;;  %s2924_s3 = inlined_call_operand.vmem [shape: f32[32,96], index: 3, kind: input, shape index: {}]   ;;  %s2925_s4 = inlined_call_operand.vmem [shape: f32[32,96], index: 4, kind: input, shape index: {}]   ;;  %s2926_s7 = inlined_call_operand.vmem [shape: f32[1,32], index: 7, kind: input, shape index: {}]   ;;  %s2927_s8 = inlined_call_operand.vmem [shape: f32[1,32], index: 8, kind: input, shape index: {}]   ;;  %s2928_s5 = inlined_call_operand.vmem [shape: f32[1,96], index: 5, kind: input, shape index: {}]   ;;  %s2929_s6 = inlined_call_operand.vmem [shape: f32[1,96], index: 6, kind: input, shape index: {}]   ;;  %s2930_s9 = inlined_call_operand.vmem [shape: f32[8,2,32], index: 9, kind: output, shape index: {0}]   ;;  %s2931_s10 = inlined_call_operand.vmem [shape: f32[8,2,32], index: 10, kind: output, shape index: {1}]  }
   0x1   :  { %v36_v0 = vld [vmem:[%s2921_s1] sm:$0xf]  ;;  %v35_v2 = vld [vmem:[%s2922_s0 + $0x8] sm:$0xff]  ;;  %v223_v9 = vld [vmem:[%s2924_s3 + $0x10] sm:$0xff]  ;;  %v2489_v17 = vmov 0.0   ;;  %vm131_vm3 = vcmask 785408  }
   0x2   :  { %v34_v1 = vld [vmem:[%s2922_s0] sm:$0xff]  ;;  %2104 = vmatprep.subr.msk.mxu0 %vm52_vm0, %v36_v0  ;;  %v222_v5 = vld [vmem:[%s2924_s3 + $0x8] sm:$0xff]  ;;  %v224_v12 = vld [vmem:[%s2924_s3 + $0x18] sm:$0xff]  ;;  %vm452_vm4 = vcmask 254976   ;;  %vm241_vm5 = vcmask 261120  }
   0x3   :  { %2106 = vmatprep.mubr.msk.f32.mxu0 %vm45_vm1, %v34_v1  ;;  %v37_v3 = vld [vmem:[%s2923_s2] sm:$0xf]  ;;  %2105 = vmatpush3.msk.msra.mxu0 %vm52_vm0, %v36_v0  ;;  %v226_v8 = vld [vmem:[%s2925_s4 + $0x8] sm:$0xff]  ;;  %v227_v13 = vld [vmem:[%s2925_s4 + $0x10] sm:$0xff]  ;;  %v2597_v15 = vpack.c.bf16 %v224_v12, %v223_v9 }
   0x4   :  { %v221_v4 = vld [vmem:[%s2924_s3] sm:$0xff]  ;;  %2109 = vmatprep.subr.msk.mxu1 %vm52_vm0, %v37_v3  ;;  %2107 = vmatmul.mubr.msk.f32.vlgmr.msra.gmra.mrb[0].mxu0 %vm45_vm1, %v35_v2  ;;  %v228_v14 = vld [vmem:[%s2925_s4 + $0x18] sm:$0xff] }
   0x5   :  { %v2569_v6 = vpack.c.bf16 %v222_v5, %v221_v4  ;;  %v225_v7 = vld [vmem:[%s2925_s4] sm:$0xff]  ;;  %2290 = vmatprep.subr.bf16.mxu0 %v2487_v10  ;;  %2110 = vmatpush3.msk.msra.mxu1 %vm52_vm0, %v37_v3  ;;  %v2607_v18 = vpack.c.bf16 %v228_v14, %v227_v13  ;;  %s2490_s4 = smov 64  }
   0x6   :  { %v2582_v11 = vpack.c.bf16 %v226_v8, %v225_v7  ;;  %2111 = vmatprep.mubr.msk.f32.mxu1 %vm45_vm1, %v34_v1  ;;  %2296 = vmatprep.subr.bf16.mxu1 %v2487_v10  ;;  %v1972_v16 = vld [vmem:[%s2926_s7] ss:$0 sm:$0xff] }
   0x7   :  { %2292 = vmatpush3.bf16.msra.mxu0 %v2569_v6  ;;  %2112 = vmatmul.mubr.msk.f32.vlgmr.msra.gmra.mrb[0].mxu1 %vm45_vm1, %v35_v2  ;;  %v1973_v19 = vld [vmem:[%s2927_s8] ss:$0 sm:$0xff] }
   0x8   :  { %2293 = vmatprep.subr.bf16.mxu0 %v2487_v10  ;;  %2298 = vmatpush3.bf16.msra.mxu1 %v2582_v11  ;;  %v1964_v20 = vld [vmem:[%s2928_s5] ss:$0 sm:$0xff]  ;;  %s2491_s5 = smov 96  }
   0x9   :  { %2122 = vmatprep.mubr.msk.f32.mxu0 %vm2488_vm2, %v2489_v17  ;;  %2299 = vmatprep.subr.bf16.mxu1 %v2487_v10  ;;  %v1968_v22 = vld [vmem:[%s2929_s6] ss:$0 sm:$0xff] }
   0xa   :  { %2133 = vmatprep.mubr.msk.f32.mxu1 %vm2488_vm2, %v2489_v17  ;;  %395 = vrot.lane.b32.xlu0 %v1972_v16, %s2490_s4 }
   0xb   :  { %2295 = vmatpush3.bf16.msra.mxu0 %v2597_v15 }
   0xc   :  { %2302 = vmatprep.subr.bf16.mxu0 %v2487_v10  ;;  %2301 = vmatpush3.bf16.msra.mxu1 %v2607_v18 }
   0xd   :  { %2308 = vmatprep.subr.bf16.mxu1 %v2487_v10 }
   0xe   :  { %2123 = vmatmul.mubr.f32.vlgmr.msra.gmra.mrb[2].mxu0 %v2489_v17  ;;  %425 = vrot.lane.b32.xlu0 %v1973_v19, %s2490_s4 }
   0xf   :  { %2304 = vmatpush3.bf16.msra.mxu0 %v2569_v6  ;;  %2134 = vmatmul.mubr.f32.vlgmr.msra.gmra.mrb[2].mxu1 %v2489_v17 }
  0x10   :  { %2305 = vmatprep.subr.bf16.mxu0 %v2487_v10  ;;  %2310 = vmatpush3.bf16.msra.mxu1 %v2582_v11 }
  0x11   :  { %2144 = vmatprep.mubr.msk.f32.mxu0 %vm2488_vm2, %v2489_v17  ;;  %2311 = vmatprep.subr.bf16.mxu1 %v2487_v10 }
  0x12   :  { %2155 = vmatprep.mubr.msk.f32.mxu1 %vm2488_vm2, %v2489_v17 }
  0x13   :  { %2307 = vmatpush3.bf16.msra.mxu0 %v2597_v15 }
  0x14   :  { %2314 = vmatprep.subr.bf16.mxu0 %v2487_v10  ;;  %2313 = vmatpush3.bf16.msra.mxu1 %v2607_v18 }
  0x15   :  { %2320 = vmatprep.subr.bf16.mxu1 %v2487_v10 }
  0x7c   :  { %v2641_v29 = vpop.permute.xlu0 %395 }
  0x80   :  { %v2643_v32 = vpop.permute.xlu0 %425 }
  0xd7   :  { %v2108_v21 = vpop.f32.mrb[0].mxu0 }
  0xd8   :  { %v128_v23 = vadd.f32 %v2108_v21, %v1964_v20  ;;  %v122_v24 = vpop.f32.mrb[1].mxu0 }
  0xd9   :  { %v123_v25 = vadd.f32 %v1964_v20, %v122_v24 }
  0xda   :  { %v2113_v26 = vpop.f32.mrb[0].mxu1  ;;  %133 = vst.msk [vmem:[#allocation2 + $0x8] sm:$0xff] %vm131_vm3, %v128_v23 }
  0xdb   :  { %v216_v27 = vadd.f32 %v2113_v26, %v1968_v22  ;;  %v210_v28 = vpop.f32.mrb[1].mxu1  ;;  %132 = vst.msk [vmem:[#allocation2] sm:$0xff] %vm131_vm3, %v123_v25 }
  0xdc   :  { %v211_v30 = vadd.f32 %v1968_v22, %v210_v28 }
  0xdd   :  { %220 = vst.msk [vmem:[#allocation3 + $0x8] sm:$0xff] %vm131_vm3, %v216_v27 }
  0xde   :  { %219 = vst.msk [vmem:[#allocation3] sm:$0xff] %vm131_vm3, %v211_v30 }
  0xe1   :  { %v311_v31 = vpop.f32.mrb[2].mxu0 }
  0xe2   :  { %v2124_v33 = vpop.f32.mrb[3].mxu0  ;;  %v398_v34 = vadd.f32 %v2641_v29, %v311_v31  ;;  %v381_v35 = vpop.f32.mrb[2].mxu1  ;;  %v385_v38 = vld [vmem:[#allocation2] sm:$0x3]  ;;  %v605_v20 = vld [vmem:[#allocation2 + $0x2] sm:$0x3] }
  0xe3   :  { %v2135_v36 = vpop.f32.mrb[3].mxu1  ;;  %v428_v37 = vadd.f32 %v2643_v32, %v381_v35  ;;  %v388_v39 = vadd.f32 %v385_v38, %v311_v31 }
  0xe4   :  { %400 = vrot.lane.b32.xlu1 %v398_v34, %s2490_s4  ;;  %v387_v40 = vld [vmem:[#allocation3 + $0xe] sm:$0x3]  ;;  %v607_v22 = vld [vmem:[#allocation3 + $0xc] sm:$0x3] }
  0xe5   :  { %v1974_v41 = vmul.f32 -1.442695, %v388_v39  ;;  %v418_v42 = vadd.f32 %v387_v40, %v381_v35 }
  0xe7   :  { %2391 = vpow2.f32 %v1974_v41  ;;  %v1975_v43 = vmul.f32 -1.442695, %v418_v42 }
  0xe8   :  { %430 = vrot.lane.b32.xlu1 %v428_v37, %s2490_s4 }
  0xe9   :  { %2393 = vpow2.f32 %v1975_v43 }
  0xf1   :  { %v2392_v44 = vpop.eup %2391 }
  0xf2   :  { %v392_v45 = vadd.f32 1.0, %v2392_v44 }
  0xf3   :  { %v2394_v46 = vpop.eup %2393 }
  0xf4   :  { %2395 = vrcp.f32 %v392_v45  ;;  %v422_v47 = vadd.f32 1.0, %v2394_v46 }
  0xf6   :  { %2397 = vrcp.f32 %v422_v47 }
  0xfe   :  { %v2396_v48 = vpop.eup %2395 }
  0xff   :  { %v410_v60 = vsub.f32 1.0, %v2396_v48  ;;  %v416_v62 = vmul.f32 0.0, %v2396_v48 }
 0x100   :  { %v2398_v51 = vpop.eup %2397 }
 0x101   :  { %v440_v1 = vsub.f32 1.0, %v2398_v51  ;;  %v446_v3 = vmul.f32 0.0, %v2398_v51 }
 0x156   :  { %v401_v49 = vpop.permute.xlu1 %400 }
 0x157   :  { %v403_v50 = vmul.f32 %v2396_v48, %v401_v49 }
 0x159   :  { %405 = vrot.lane.b32.xlu0 %v403_v50, %s2490_s4 }
 0x15a   :  { %v431_v52 = vpop.permute.xlu1 %430 }
 0x15b   :  { %v433_v53 = vmul.f32 %v2398_v51, %v431_v52 }
 0x15d   :  { %435 = vrot.lane.b32.xlu1 %v433_v53, %s2490_s4 }
 0x1cb   :  { %v406_v54 = vpop.permute.xlu0 %405 }
 0x1cc   :  { %v408_v55 = vadd.f32 %v406_v54, %v385_v38 }
 0x1ce   :  { %2399 = vtanh.f32 %v408_v55 }
 0x1cf   :  { %v436_v56 = vpop.permute.xlu1 %435 }
 0x1d0   :  { %v438_v57 = vadd.f32 %v436_v56, %v387_v40 }
 0x1d2   :  { %2401 = vtanh.f32 %v438_v57 }
 0x1d8   :  { %v2400_v58 = vpop.eup %2399 }
 0x1d9   :  { %412 = vrot.lane.b32.xlu0 %v2400_v58, %s2491_s5 }
 0x1dc   :  { %v2402_v59 = vpop.eup %2401 }
 0x1dd   :  { %442 = vrot.lane.b32.xlu1 %v2402_v59, %s2491_s5 }
 0x24b   :  { %v413_v61 = vpop.permute.xlu0 %412 }
 0x24c   :  { %v415_v63 = vmul.f32 %v413_v61, %v410_v60 }
 0x24e   :  { %v2653_v0 = vadd.f32 %v416_v62, %v415_v63  ;;  %v819_v62 = vld [vmem:[#allocation2 + $0x4] sm:$0x3] }
 0x24f   :  { %v443_v2 = vpop.permute.xlu1 %442 }
 0x250   :  { %v445_v4 = vmul.f32 %v443_v2, %v440_v1  ;;  %449 = vrot.lane.b32.xlu0 %v2653_v0, %s2491_s5 }
 0x252   :  { %v2657_v5 = vadd.f32 %v446_v3, %v445_v4 }
 0x254   :  { %455 = vrot.lane.b32.xlu1 %v2657_v5, %s2491_s5 }
 0x2c2   :  { %v450_v7 = vpop.permute.xlu0 %449 }
 0x2c3   :  { %453 = vst.msk [vmem:[%s2930_s9] sm:$0x3] %vm452_vm4, %v450_v7  ;;  %2145 = vmatmul.mubr.msk.f32.vlgmr.msra.gmra.mrb[4].mxu0 %vm241_vm5, %v450_v7 }
 0x2c4   :  { %2316 = vmatpush3.bf16.msra.mxu0 %v2569_v6  ;;  %2166 = vmatprep.mubr.msk.f32.mxu0 %vm2488_vm2, %v2489_v17 }
 0x2c5   :  { %2317 = vmatprep.subr.bf16.mxu0 %v2487_v10 }
 0x2c6   :  { %v456_v8 = vpop.permute.xlu1 %455 }
 0x2c7   :  { %1976 = vst.msk [vmem:[%s2931_s10 + $0xe] sm:$0x3] %vm452_vm4, %v456_v8  ;;  %2156 = vmatmul.mubr.msk.f32.vlgmr.msra.gmra.mrb[4].mxu1 %vm241_vm5, %v456_v8 }
 0x2c8   :  { %2319 = vmatpush3.bf16.msra.mxu0 %v2597_v15  ;;  %2322 = vmatpush3.bf16.msra.mxu1 %v2582_v11 }
 0x2c9   :  { %2323 = vmatprep.subr.bf16.mxu1 %v2487_v10  ;;  %2177 = vmatprep.mubr.msk.f32.mxu1 %vm2488_vm2, %v2489_v17 }
 0x2ca   :  { %2326 = vmatprep.subr.bf16.mxu0 %v2487_v10 }
 0x2cc   :  { %2325 = vmatpush3.bf16.msra.mxu1 %v2607_v18 }
 0x2cd   :  { %2332 = vmatprep.subr.bf16.mxu1 %v2487_v10 }
 0x396   :  { %v528_v9 = vpop.f32.mrb[4].mxu0 }
 0x397   :  { %v615_v12 = vadd.f32 %v528_v9, %v2641_v29  ;;  %v2146_v13 = vpop.f32.mrb[5].mxu0  ;;  %v608_v21 = vadd.f32 %v605_v20, %v528_v9 }
 0x399   :  { %617 = vrot.lane.b32.xlu0 %v615_v12, %s2490_s4  ;;  %v1979_v23 = vmul.f32 -1.442695, %v608_v21 }
 0x39a   :  { %v600_v14 = vpop.f32.mrb[4].mxu1 }
 0x39b   :  { %v642_v16 = vadd.f32 %v600_v14, %v2643_v32  ;;  %v2157_v19 = vpop.f32.mrb[5].mxu1  ;;  %v635_v24 = vadd.f32 %v607_v22, %v600_v14  ;;  %2403 = vpow2.f32 %v1979_v23 }
 0x39d   :  { %644 = vrot.lane.b32.xlu1 %v642_v16, %s2490_s4  ;;  %v1980_v25 = vmul.f32 -1.442695, %v635_v24 }
 0x39f   :  { %2405 = vpow2.f32 %v1980_v25 }
 0x3a5   :  { %v2404_v26 = vpop.eup %2403 }
 0x3a6   :  { %v612_v27 = vadd.f32 1.0, %v2404_v26 }
 0x3a8   :  { %2407 = vrcp.f32 %v612_v27 }
 0x3a9   :  { %v2406_v28 = vpop.eup %2405 }
 0x3aa   :  { %v639_v30 = vadd.f32 1.0, %v2406_v28 }
 0x3ac   :  { %2409 = vrcp.f32 %v639_v30 }
 0x3b2   :  { %v2408_v31 = vpop.eup %2407 }
 0x3b3   :  { %v627_v44 = vsub.f32 1.0, %v2408_v31  ;;  %v633_v46 = vmul.f32 %v2408_v31, %v2653_v0  ;;  %v821_v0 = vld [vmem:[#allocation3 + $0xa] sm:$0x3] }
 0x3b6   :  { %v2410_v35 = vpop.eup %2409 }
 0x3b7   :  { %v654_v49 = vsub.f32 1.0, %v2410_v35  ;;  %v660_v51 = vmul.f32 %v2410_v35, %v2657_v5 }
 0x40b   :  { %v618_v33 = vpop.permute.xlu0 %617 }
 0x40c   :  { %v620_v34 = vmul.f32 %v2408_v31, %v618_v33 }
 0x40e   :  { %622 = vrot.lane.b32.xlu0 %v620_v34, %s2490_s4 }
 0x40f   :  { %v645_v36 = vpop.permute.xlu1 %644 }
 0x410   :  { %v647_v37 = vmul.f32 %v2410_v35, %v645_v36 }
 0x412   :  { %649 = vrot.lane.b32.xlu1 %v647_v37, %s2490_s4 }
 0x480   :  { %v623_v38 = vpop.permute.xlu0 %622 }
 0x481   :  { %v625_v39 = vadd.f32 %v623_v38, %v605_v20 }
 0x483   :  { %2411 = vtanh.f32 %v625_v39 }
 0x484   :  { %v650_v40 = vpop.permute.xlu1 %649 }
 0x485   :  { %v652_v41 = vadd.f32 %v650_v40, %v607_v22 }
 0x487   :  { %2413 = vtanh.f32 %v652_v41 }
 0x48d   :  { %v2412_v42 = vpop.eup %2411 }
 0x48e   :  { %629 = vrot.lane.b32.xlu0 %v2412_v42, %s2491_s5 }
 0x491   :  { %v2414_v43 = vpop.eup %2413 }
 0x492   :  { %656 = vrot.lane.b32.xlu1 %v2414_v43, %s2491_s5 }
 0x500   :  { %v630_v45 = vpop.permute.xlu0 %629 }
 0x501   :  { %v632_v47 = vmul.f32 %v630_v45, %v627_v44 }
 0x503   :  { %v2692_v48 = vadd.f32 %v633_v46, %v632_v47  ;;  %v1033_v46 = vld [vmem:[#allocation2 + $0x6] sm:$0x3] }
 0x504   :  { %v657_v50 = vpop.permute.xlu1 %656 }
 0x505   :  { %v659_v52 = vmul.f32 %v657_v50, %v654_v49  ;;  %663 = vrot.lane.b32.xlu0 %v2692_v48, %s2491_s5 }
 0x507   :  { %v2697_v53 = vadd.f32 %v660_v51, %v659_v52 }
 0x509   :  { %669 = vrot.lane.b32.xlu1 %v2697_v53, %s2491_s5 }
 0x577   :  { %v664_v54 = vpop.permute.xlu0 %663 }
 0x578   :  { %1981 = vst.msk [vmem:[%s2930_s9 + $0x2] sm:$0x3] %vm452_vm4, %v664_v54  ;;  %2167 = vmatmul.mubr.msk.f32.vlgmr.msra.gmra.mrb[6].mxu0 %vm241_vm5, %v664_v54 }
 0x579   :  { %2328 = vmatpush3.bf16.msra.mxu0 %v2569_v6  ;;  %2188 = vmatprep.mubr.msk.f32.mxu0 %vm2488_vm2, %v2489_v17 }
 0x57a   :  { %2329 = vmatprep.subr.bf16.mxu0 %v2487_v10 }
 0x57b   :  { %v670_v55 = vpop.permute.xlu1 %669 }
 0x57c   :  { %1982 = vst.msk [vmem:[%s2931_s10 + $0xc] sm:$0x3] %vm452_vm4, %v670_v55  ;;  %2178 = vmatmul.mubr.msk.f32.vlgmr.msra.gmra.mrb[6].mxu1 %vm241_vm5, %v670_v55 }
 0x57d   :  { %2331 = vmatpush3.bf16.msra.mxu0 %v2597_v15  ;;  %2334 = vmatpush3.bf16.msra.mxu1 %v2582_v11 }
 0x57e   :  { %2335 = vmatprep.subr.bf16.mxu1 %v2487_v10  ;;  %2199 = vmatprep.mubr.msk.f32.mxu1 %vm2488_vm2, %v2489_v17 }
 0x57f   :  { %2338 = vmatprep.subr.bf16.mxu0 %v2487_v10 }
 0x581   :  { %2337 = vmatpush3.bf16.msra.mxu1 %v2607_v18 }
 0x582   :  { %2344 = vmatprep.subr.bf16.mxu1 %v2487_v10 }
 0x64b   :  { %v742_v56 = vpop.f32.mrb[6].mxu0 }
 0x64c   :  { %v829_v57 = vadd.f32 %v742_v56, %v2641_v29  ;;  %v2168_v58 = vpop.f32.mrb[7].mxu0  ;;  %v822_v63 = vadd.f32 %v819_v62, %v742_v56 }
 0x64e   :  { %831 = vrot.lane.b32.xlu0 %v829_v57, %s2490_s4  ;;  %v1985_v1 = vmul.f32 -1.442695, %v822_v63 }
 0x64f   :  { %v814_v59 = vpop.f32.mrb[6].mxu1 }
 0x650   :  { %v856_v60 = vadd.f32 %v814_v59, %v2643_v32  ;;  %v2179_v61 = vpop.f32.mrb[7].mxu1  ;;  %v849_v2 = vadd.f32 %v821_v0, %v814_v59  ;;  %2415 = vpow2.f32 %v1985_v1 }
 0x652   :  { %858 = vrot.lane.b32.xlu1 %v856_v60, %s2490_s4  ;;  %v1986_v3 = vmul.f32 -1.442695, %v849_v2 }
 0x654   :  { %2417 = vpow2.f32 %v1986_v3 }
 0x65a   :  { %v2416_v4 = vpop.eup %2415 }
 0x65b   :  { %v826_v5 = vadd.f32 1.0, %v2416_v4 }
 0x65d   :  { %2419 = vrcp.f32 %v826_v5 }
 0x65e   :  { %v2418_v7 = vpop.eup %2417 }
 0x65f   :  { %v853_v8 = vadd.f32 1.0, %v2418_v7 }
 0x661   :  { %2421 = vrcp.f32 %v853_v8 }
 0x667   :  { %v2420_v9 = vpop.eup %2419 }
 0x668   :  { %v841_v26 = vsub.f32 1.0, %v2420_v9  ;;  %v847_v28 = vmul.f32 %v2420_v9, %v2692_v48  ;;  %v1035_v48 = vld [vmem:[#allocation3 + $0x8] sm:$0x3] }
 0x66b   :  { %v2422_v14 = vpop.eup %2421 }
 0x66c   :  { %v868_v33 = vsub.f32 1.0, %v2422_v14  ;;  %v874_v35 = vmul.f32 %v2422_v14, %v2697_v53 }
 0x6c0   :  { %v832_v12 = vpop.permute.xlu0 %831 }
 0x6c1   :  { %v834_v13 = vmul.f32 %v2420_v9, %v832_v12 }
 0x6c3   :  { %836 = vrot.lane.b32.xlu0 %v834_v13, %s2490_s4 }
 0x6c4   :  { %v859_v16 = vpop.permute.xlu1 %858 }
 0x6c5   :  { %v861_v19 = vmul.f32 %v2422_v14, %v859_v16 }
 0x6c7   :  { %863 = vrot.lane.b32.xlu1 %v861_v19, %s2490_s4 }
 0x735   :  { %v837_v20 = vpop.permute.xlu0 %836 }
 0x736   :  { %v839_v21 = vadd.f32 %v837_v20, %v819_v62 }
 0x738   :  { %2423 = vtanh.f32 %v839_v21 }
 0x739   :  { %v864_v22 = vpop.permute.xlu1 %863 }
 0x73a   :  { %v866_v23 = vadd.f32 %v864_v22, %v821_v0 }
 0x73c   :  { %2425 = vtanh.f32 %v866_v23 }
 0x742   :  { %v2424_v24 = vpop.eup %2423 }
 0x743   :  { %843 = vrot.lane.b32.xlu0 %v2424_v24, %s2491_s5 }
 0x746   :  { %v2426_v25 = vpop.eup %2425 }
 0x747   :  { %870 = vrot.lane.b32.xlu1 %v2426_v25, %s2491_s5 }
 0x7b5   :  { %v844_v27 = vpop.permute.xlu0 %843 }
 0x7b6   :  { %v846_v30 = vmul.f32 %v844_v27, %v841_v26 }
 0x7b8   :  { %v2732_v31 = vadd.f32 %v847_v28, %v846_v30  ;;  %v1247_v28 = vld [vmem:[#allocation2 + $0x8] sm:$0x3] }
 0x7b9   :  { %v871_v34 = vpop.permute.xlu1 %870 }
 0x7ba   :  { %v873_v36 = vmul.f32 %v871_v34, %v868_v33  ;;  %877 = vrot.lane.b32.xlu0 %v2732_v31, %s2491_s5 }
 0x7bc   :  { %v2737_v37 = vadd.f32 %v874_v35, %v873_v36 }
 0x7be   :  { %883 = vrot.lane.b32.xlu1 %v2737_v37, %s2491_s5 }
 0x82c   :  { %v878_v38 = vpop.permute.xlu0 %877 }
 0x82d   :  { %1987 = vst.msk [vmem:[%s2930_s9 + $0x4] sm:$0x3] %vm452_vm4, %v878_v38  ;;  %2189 = vmatmul.mubr.msk.f32.vlgmr.msra.gmra.mrb[8].mxu0 %vm241_vm5, %v878_v38 }
 0x82e   :  { %2340 = vmatpush3.bf16.msra.mxu0 %v2569_v6  ;;  %2210 = vmatprep.mubr.msk.f32.mxu0 %vm2488_vm2, %v2489_v17 }
 0x82f   :  { %2341 = vmatprep.subr.bf16.mxu0 %v2487_v10 }
 0x830   :  { %v884_v39 = vpop.permute.xlu1 %883 }
 0x831   :  { %1988 = vst.msk [vmem:[%s2931_s10 + $0xa] sm:$0x3] %vm452_vm4, %v884_v39  ;;  %2200 = vmatmul.mubr.msk.f32.vlgmr.msra.gmra.mrb[8].mxu1 %vm241_vm5, %v884_v39 }
 0x832   :  { %2343 = vmatpush3.bf16.msra.mxu0 %v2597_v15  ;;  %2346 = vmatpush3.bf16.msra.mxu1 %v2582_v11 }
 0x833   :  { %2347 = vmatprep.subr.bf16.mxu1 %v2487_v10  ;;  %2221 = vmatprep.mubr.msk.f32.mxu1 %vm2488_vm2, %v2489_v17 }
 0x834   :  { %2350 = vmatprep.subr.bf16.mxu0 %v2487_v10 }
 0x836   :  { %2349 = vmatpush3.bf16.msra.mxu1 %v2607_v18 }
 0x837   :  { %2356 = vmatprep.subr.bf16.mxu1 %v2487_v10 }
 0x900   :  { %v956_v40 = vpop.f32.mrb[8].mxu0 }
 0x901   :  { %v1043_v41 = vadd.f32 %v956_v40, %v2641_v29  ;;  %v2190_v42 = vpop.f32.mrb[9].mxu0  ;;  %v1036_v47 = vadd.f32 %v1033_v46, %v956_v40 }
 0x903   :  { %1045 = vrot.lane.b32.xlu0 %v1043_v41, %s2490_s4  ;;  %v1991_v49 = vmul.f32 -1.442695, %v1036_v47 }
 0x904   :  { %v1028_v43 = vpop.f32.mrb[8].mxu1 }
 0x905   :  { %v1070_v44 = vadd.f32 %v1028_v43, %v2643_v32  ;;  %v2201_v45 = vpop.f32.mrb[9].mxu1  ;;  %v1063_v50 = vadd.f32 %v1035_v48, %v1028_v43  ;;  %2427 = vpow2.f32 %v1991_v49 }
 0x907   :  { %1072 = vrot.lane.b32.xlu1 %v1070_v44, %s2490_s4  ;;  %v1992_v51 = vmul.f32 -1.442695, %v1063_v50 }
 0x909   :  { %2429 = vpow2.f32 %v1992_v51 }
 0x90f   :  { %v2428_v52 = vpop.eup %2427 }
 0x910   :  { %v1040_v53 = vadd.f32 1.0, %v2428_v52 }
 0x912   :  { %2431 = vrcp.f32 %v1040_v53 }
 0x913   :  { %v2430_v54 = vpop.eup %2429 }
 0x914   :  { %v1067_v55 = vadd.f32 1.0, %v2430_v54 }
 0x916   :  { %2433 = vrcp.f32 %v1067_v55 }
 0x91c   :  { %v2432_v56 = vpop.eup %2431 }
 0x91d   :  { %v1055_v4 = vsub.f32 1.0, %v2432_v56  ;;  %v1061_v7 = vmul.f32 %v2432_v56, %v2732_v31  ;;  %v1249_v31 = vld [vmem:[#allocation3 + $0x6] sm:$0x3] }
 0x920   :  { %v2434_v59 = vpop.eup %2433 }
 0x921   :  { %v1082_v12 = vsub.f32 1.0, %v2434_v59  ;;  %v1088_v14 = vmul.f32 %v2434_v59, %v2737_v37 }
 0x975   :  { %v1046_v57 = vpop.permute.xlu0 %1045 }
 0x976   :  { %v1048_v58 = vmul.f32 %v2432_v56, %v1046_v57 }
 0x978   :  { %1050 = vrot.lane.b32.xlu0 %v1048_v58, %s2490_s4 }
 0x979   :  { %v1073_v60 = vpop.permute.xlu1 %1072 }
 0x97a   :  { %v1075_v61 = vmul.f32 %v2434_v59, %v1073_v60 }
 0x97c   :  { %1077 = vrot.lane.b32.xlu1 %v1075_v61, %s2490_s4 }
 0x9ea   :  { %v1051_v62 = vpop.permute.xlu0 %1050 }
 0x9eb   :  { %v1053_v63 = vadd.f32 %v1051_v62, %v1033_v46 }
 0x9ed   :  { %2435 = vtanh.f32 %v1053_v63 }
 0x9ee   :  { %v1078_v0 = vpop.permute.xlu1 %1077 }
 0x9ef   :  { %v1080_v1 = vadd.f32 %v1078_v0, %v1035_v48 }
 0x9f1   :  { %2437 = vtanh.f32 %v1080_v1 }
 0x9f7   :  { %v2436_v2 = vpop.eup %2435 }
 0x9f8   :  { %1057 = vrot.lane.b32.xlu0 %v2436_v2, %s2491_s5 }
 0x9fb   :  { %v2438_v3 = vpop.eup %2437 }
 0x9fc   :  { %1084 = vrot.lane.b32.xlu1 %v2438_v3, %s2491_s5 }
 0xa6a   :  { %v1058_v5 = vpop.permute.xlu0 %1057 }
 0xa6b   :  { %v1060_v8 = vmul.f32 %v1058_v5, %v1055_v4 }
 0xa6d   :  { %v2772_v9 = vadd.f32 %v1061_v7, %v1060_v8  ;;  %v1461_v7 = vld [vmem:[#allocation2 + $0xa] sm:$0x3] }
 0xa6e   :  { %v1085_v13 = vpop.permute.xlu1 %1084 }
 0xa6f   :  { %v1087_v16 = vmul.f32 %v1085_v13, %v1082_v12  ;;  %1091 = vrot.lane.b32.xlu0 %v2772_v9, %s2491_s5 }
 0xa71   :  { %v2777_v19 = vadd.f32 %v1088_v14, %v1087_v16 }
 0xa73   :  { %1097 = vrot.lane.b32.xlu1 %v2777_v19, %s2491_s5 }
 0xae1   :  { %v1092_v20 = vpop.permute.xlu0 %1091 }
 0xae2   :  { %1993 = vst.msk [vmem:[%s2930_s9 + $0x6] sm:$0x3] %vm452_vm4, %v1092_v20  ;;  %2211 = vmatmul.mubr.msk.f32.vlgmr.msra.gmra.mrb[10].mxu0 %vm241_vm5, %v1092_v20 }
 0xae3   :  { %2352 = vmatpush3.bf16.msra.mxu0 %v2569_v6  ;;  %2232 = vmatprep.mubr.msk.f32.mxu0 %vm2488_vm2, %v2489_v17 }
 0xae4   :  { %2353 = vmatprep.subr.bf16.mxu0 %v2487_v10 }
 0xae5   :  { %v1098_v21 = vpop.permute.xlu1 %1097 }
 0xae6   :  { %1994 = vst.msk [vmem:[%s2931_s10 + $0x8] sm:$0x3] %vm452_vm4, %v1098_v21  ;;  %2222 = vmatmul.mubr.msk.f32.vlgmr.msra.gmra.mrb[10].mxu1 %vm241_vm5, %v1098_v21 }
 0xae7   :  { %2355 = vmatpush3.bf16.msra.mxu0 %v2597_v15  ;;  %2358 = vmatpush3.bf16.msra.mxu1 %v2582_v11 }
 0xae8   :  { %2359 = vmatprep.subr.bf16.mxu1 %v2487_v10  ;;  %2243 = vmatprep.mubr.msk.f32.mxu1 %vm2488_vm2, %v2489_v17 }
 0xae9   :  { %2362 = vmatprep.subr.bf16.mxu0 %v2487_v10 }
 0xaeb   :  { %2361 = vmatpush3.bf16.msra.mxu1 %v2607_v18 }
 0xaec   :  { %2368 = vmatprep.subr.bf16.mxu1 %v2487_v10 }
 0xbb5   :  { %v1170_v22 = vpop.f32.mrb[10].mxu0 }
 0xbb6   :  { %v1257_v23 = vadd.f32 %v1170_v22, %v2641_v29  ;;  %v2212_v24 = vpop.f32.mrb[11].mxu0  ;;  %v1250_v30 = vadd.f32 %v1247_v28, %v1170_v22 }
 0xbb8   :  { %1259 = vrot.lane.b32.xlu0 %v1257_v23, %s2490_s4  ;;  %v1997_v33 = vmul.f32 -1.442695, %v1250_v30 }
 0xbb9   :  { %v1242_v25 = vpop.f32.mrb[10].mxu1 }
 0xbba   :  { %v1284_v26 = vadd.f32 %v1242_v25, %v2643_v32  ;;  %v2223_v27 = vpop.f32.mrb[11].mxu1  ;;  %v1277_v34 = vadd.f32 %v1249_v31, %v1242_v25  ;;  %2439 = vpow2.f32 %v1997_v33 }
 0xbbc   :  { %1286 = vrot.lane.b32.xlu1 %v1284_v26, %s2490_s4  ;;  %v1998_v35 = vmul.f32 -1.442695, %v1277_v34 }
 0xbbe   :  { %2441 = vpow2.f32 %v1998_v35 }
 0xbc4   :  { %v2440_v36 = vpop.eup %2439 }
 0xbc5   :  { %v1254_v37 = vadd.f32 1.0, %v2440_v36 }
 0xbc7   :  { %2443 = vrcp.f32 %v1254_v37 }
 0xbc8   :  { %v2442_v38 = vpop.eup %2441 }
 0xbc9   :  { %v1281_v39 = vadd.f32 1.0, %v2442_v38 }
 0xbcb   :  { %2445 = vrcp.f32 %v1281_v39 }
 0xbd1   :  { %v2444_v40 = vpop.eup %2443 }
 0xbd2   :  { %v1269_v52 = vsub.f32 1.0, %v2444_v40  ;;  %v1275_v54 = vmul.f32 %v2444_v40, %v2772_v9  ;;  %v1463_v9 = vld [vmem:[#allocation3 + $0x4] sm:$0x3] }
 0xbd5   :  { %v2446_v43 = vpop.eup %2445 }
 0xbd6   :  { %v1296_v57 = vsub.f32 1.0, %v2446_v43  ;;  %v1302_v59 = vmul.f32 %v2446_v43, %v2777_v19 }
 0xc2a   :  { %v1260_v41 = vpop.permute.xlu0 %1259 }
 0xc2b   :  { %v1262_v42 = vmul.f32 %v2444_v40, %v1260_v41 }
 0xc2d   :  { %1264 = vrot.lane.b32.xlu0 %v1262_v42, %s2490_s4 }
 0xc2e   :  { %v1287_v44 = vpop.permute.xlu1 %1286 }
 0xc2f   :  { %v1289_v45 = vmul.f32 %v2446_v43, %v1287_v44 }
 0xc31   :  { %1291 = vrot.lane.b32.xlu1 %v1289_v45, %s2490_s4 }
 0xc9f   :  { %v1265_v46 = vpop.permute.xlu0 %1264 }
 0xca0   :  { %v1267_v47 = vadd.f32 %v1265_v46, %v1247_v28 }
 0xca2   :  { %2447 = vtanh.f32 %v1267_v47 }
 0xca3   :  { %v1292_v48 = vpop.permute.xlu1 %1291 }
 0xca4   :  { %v1294_v49 = vadd.f32 %v1292_v48, %v1249_v31 }
 0xca6   :  { %2449 = vtanh.f32 %v1294_v49 }
 0xcac   :  { %v2448_v50 = vpop.eup %2447 }
 0xcad   :  { %1271 = vrot.lane.b32.xlu0 %v2448_v50, %s2491_s5 }
 0xcb0   :  { %v2450_v51 = vpop.eup %2449 }
 0xcb1   :  { %1298 = vrot.lane.b32.xlu1 %v2450_v51, %s2491_s5 }
 0xd1f   :  { %v1272_v53 = vpop.permute.xlu0 %1271 }
 0xd20   :  { %v1274_v55 = vmul.f32 %v1272_v53, %v1269_v52 }
 0xd22   :  { %v2812_v56 = vadd.f32 %v1275_v54, %v1274_v55 }
 0xd23   :  { %v1299_v58 = vpop.permute.xlu1 %1298 }
 0xd24   :  { %v1301_v60 = vmul.f32 %v1299_v58, %v1296_v57  ;;  %1305 = vrot.lane.b32.xlu0 %v2812_v56, %s2491_s5 }
 0xd26   :  { %v2817_v61 = vadd.f32 %v1302_v59, %v1301_v60 }
 0xd28   :  { %1311 = vrot.lane.b32.xlu1 %v2817_v61, %s2491_s5 }
 0xd96   :  { %v1306_v62 = vpop.permute.xlu0 %1305 }
 0xd97   :  { %1999 = vst.msk [vmem:[%s2930_s9 + $0x8] sm:$0x3] %vm452_vm4, %v1306_v62  ;;  %2233 = vmatmul.mubr.msk.f32.vlgmr.msra.gmra.mrb[12].mxu0 %vm241_vm5, %v1306_v62 }
 0xd98   :  { %2364 = vmatpush3.bf16.msra.mxu0 %v2569_v6  ;;  %2254 = vmatprep.mubr.msk.f32.mxu0 %vm2488_vm2, %v2489_v17 }
 0xd99   :  { %2365 = vmatprep.subr.bf16.mxu0 %v2487_v10 }
 0xd9a   :  { %v1312_v63 = vpop.permute.xlu1 %1311 }
 0xd9b   :  { %2000 = vst.msk [vmem:[%s2931_s10 + $0x6] sm:$0x3] %vm452_vm4, %v1312_v63  ;;  %2244 = vmatmul.mubr.msk.f32.vlgmr.msra.gmra.mrb[12].mxu1 %vm241_vm5, %v1312_v63 }
 0xd9c   :  { %2367 = vmatpush3.bf16.msra.mxu0 %v2597_v15  ;;  %2370 = vmatpush3.bf16.msra.mxu1 %v2582_v11 }
 0xd9d   :  { %2371 = vmatprep.subr.bf16.mxu1 %v2487_v10  ;;  %2265 = vmatprep.mubr.msk.f32.mxu1 %vm2488_vm2, %v2489_v17 }
 0xd9e   :  { %2374 = vmatprep.subr.bf16.mxu0 %v2487_v10 }
 0xda0   :  { %2373 = vmatpush3.bf16.msra.mxu1 %v2607_v18 }
 0xda1   :  { %2380 = vmatprep.subr.bf16.mxu1 %v2487_v10 }
 0xe6a   :  { %v1384_v0 = vpop.f32.mrb[12].mxu0 }
 0xe6b   :  { %v1471_v1 = vadd.f32 %v1384_v0, %v2641_v29  ;;  %v2234_v2 = vpop.f32.mrb[13].mxu0  ;;  %v1464_v8 = vadd.f32 %v1461_v7, %v1384_v0 }
 0xe6d   :  { %1473 = vrot.lane.b32.xlu0 %v1471_v1, %s2490_s4  ;;  %v2003_v12 = vmul.f32 -1.442695, %v1464_v8 }
 0xe6e   :  { %v1456_v3 = vpop.f32.mrb[12].mxu1 }
 0xe6f   :  { %v1498_v4 = vadd.f32 %v1456_v3, %v2643_v32  ;;  %v2245_v5 = vpop.f32.mrb[13].mxu1  ;;  %v1491_v13 = vadd.f32 %v1463_v9, %v1456_v3  ;;  %2451 = vpow2.f32 %v2003_v12 }
 0xe71   :  { %1500 = vrot.lane.b32.xlu1 %v1498_v4, %s2490_s4  ;;  %v2004_v14 = vmul.f32 -1.442695, %v1491_v13 }
 0xe73   :  { %2453 = vpow2.f32 %v2004_v14 }
 0xe79   :  { %v2452_v16 = vpop.eup %2451 }
 0xe7a   :  { %v1468_v19 = vadd.f32 1.0, %v2452_v16 }
 0xe7c   :  { %2455 = vrcp.f32 %v1468_v19 }
 0xe7d   :  { %v2454_v20 = vpop.eup %2453 }
 0xe7e   :  { %v1495_v21 = vadd.f32 1.0, %v2454_v20 }
 0xe80   :  { %2457 = vrcp.f32 %v1495_v21 }
 0xe86   :  { %v2456_v22 = vpop.eup %2455 }
 0xe87   :  { %v1483_v36 = vsub.f32 1.0, %v2456_v22  ;;  %v1489_v38 = vmul.f32 %v2456_v22, %v2812_v56 }
 0xe8a   :  { %v2458_v25 = vpop.eup %2457 }
 0xe8b   :  { %v1510_v41 = vsub.f32 1.0, %v2458_v25  ;;  %v1516_v43 = vmul.f32 %v2458_v25, %v2817_v61 }
 0xedf   :  { %v1474_v23 = vpop.permute.xlu0 %1473 }
 0xee0   :  { %v1476_v24 = vmul.f32 %v2456_v22, %v1474_v23 }
 0xee2   :  { %1478 = vrot.lane.b32.xlu0 %v1476_v24, %s2490_s4 }
 0xee3   :  { %v1501_v26 = vpop.permute.xlu1 %1500 }
 0xee4   :  { %v1503_v27 = vmul.f32 %v2458_v25, %v1501_v26 }
 0xee6   :  { %1505 = vrot.lane.b32.xlu1 %v1503_v27, %s2490_s4 }
 0xf54   :  { %v1479_v28 = vpop.permute.xlu0 %1478 }
 0xf55   :  { %v1481_v30 = vadd.f32 %v1479_v28, %v1461_v7 }
 0xf57   :  { %2459 = vtanh.f32 %v1481_v30 }
 0xf58   :  { %v1506_v31 = vpop.permute.xlu1 %1505 }
 0xf59   :  { %v1508_v33 = vadd.f32 %v1506_v31, %v1463_v9  ;;  %v1889_v31 = vld [vmem:[#allocation2 + $0xe] sm:$0x3] }
 0xf5b   :  { %2461 = vtanh.f32 %v1508_v33 }
 0xf61   :  { %v2460_v34 = vpop.eup %2459 }
 0xf62   :  { %1485 = vrot.lane.b32.xlu0 %v2460_v34, %s2491_s5  ;;  %v1890_v34 = vld [vmem:[#allocation3] sm:$0x3] }
 0xf65   :  { %v2462_v35 = vpop.eup %2461 }
 0xf66   :  { %1512 = vrot.lane.b32.xlu1 %v2462_v35, %s2491_s5 }
 0xfd4   :  { %v1486_v37 = vpop.permute.xlu0 %1485 }
 0xfd5   :  { %v1488_v39 = vmul.f32 %v1486_v37, %v1483_v36 }
 0xfd7   :  { %v2852_v40 = vadd.f32 %v1489_v38, %v1488_v39 }
 0xfd8   :  { %v1513_v42 = vpop.permute.xlu1 %1512 }
 0xfd9   :  { %v1515_v44 = vmul.f32 %v1513_v42, %v1510_v41  ;;  %1519 = vrot.lane.b32.xlu0 %v2852_v40, %s2491_s5 }
 0xfdb   :  { %v2857_v45 = vadd.f32 %v1516_v43, %v1515_v44 }
 0xfdd   :  { %1525 = vrot.lane.b32.xlu1 %v2857_v45, %s2491_s5 }
0x104b   :  { %v1520_v46 = vpop.permute.xlu0 %1519 }
0x104c   :  { %2005 = vst.msk [vmem:[%s2930_s9 + $0xa] sm:$0x3] %vm452_vm4, %v1520_v46  ;;  %2255 = vmatmul.mubr.msk.f32.vlgmr.msra.gmra.mrb[14].mxu0 %vm241_vm5, %v1520_v46 }
0x104d   :  { %2376 = vmatpush3.bf16.msra.mxu0 %v2569_v6  ;;  %2276 = vmatprep.mubr.msk.f32.mxu0 %vm2488_vm2, %v2489_v17 }
0x104e   :  { %2377 = vmatprep.subr.bf16.mxu0 %v2487_v10 }
0x104f   :  { %v1526_v47 = vpop.permute.xlu1 %1525 }
0x1050   :  { %2006 = vst.msk [vmem:[%s2931_s10 + $0x4] sm:$0x3] %vm452_vm4, %v1526_v47  ;;  %2266 = vmatmul.mubr.msk.f32.vlgmr.msra.gmra.mrb[14].mxu1 %vm241_vm5, %v1526_v47 }
0x1051   :  { %2379 = vmatpush3.bf16.msra.mxu0 %v2597_v15  ;;  %2382 = vmatpush3.bf16.msra.mxu1 %v2582_v11  ;;  %v1675_v11 = vld [vmem:[#allocation2 + $0xc] sm:$0x3] }
0x1052   :  { %2383 = vmatprep.subr.bf16.mxu1 %v2487_v10  ;;  %2287 = vmatprep.mubr.msk.f32.mxu1 %vm2488_vm2, %v2489_v17  ;;  %v1677_v10 = vld [vmem:[#allocation3 + $0x2] sm:$0x3] }
0x1055   :  { %2385 = vmatpush3.bf16.msra.mxu1 %v2607_v18 }
0x111f   :  { %v1598_v6 = vpop.f32.mrb[14].mxu0 }
0x1120   :  { %v1685_v48 = vadd.f32 %v1598_v6, %v2641_v29  ;;  %v2256_v49 = vpop.f32.mrb[15].mxu0  ;;  %v1678_v15 = vadd.f32 %v1675_v11, %v1598_v6 }
0x1122   :  { %1687 = vrot.lane.b32.xlu0 %v1685_v48, %s2490_s4  ;;  %v2009_v53 = vmul.f32 -1.442695, %v1678_v15 }
0x1123   :  { %v1670_v50 = vpop.f32.mrb[14].mxu1 }
0x1124   :  { %v1712_v51 = vadd.f32 %v1670_v50, %v2643_v32  ;;  %v2267_v52 = vpop.f32.mrb[15].mxu1  ;;  %v1705_v54 = vadd.f32 %v1677_v10, %v1670_v50  ;;  %2463 = vpow2.f32 %v2009_v53 }
0x1126   :  { %1714 = vrot.lane.b32.xlu1 %v1712_v51, %s2490_s4  ;;  %v2010_v17 = vmul.f32 -1.442695, %v1705_v54 }
0x1128   :  { %2465 = vpow2.f32 %v2010_v17 }
0x112e   :  { %v2464_v18 = vpop.eup %2463 }
0x112f   :  { %v1682_v55 = vadd.f32 1.0, %v2464_v18 }
0x1131   :  { %2467 = vrcp.f32 %v1682_v55 }
0x1132   :  { %v2466_v56 = vpop.eup %2465 }
0x1133   :  { %v1709_v57 = vadd.f32 1.0, %v2466_v56 }
0x1135   :  { %2469 = vrcp.f32 %v1709_v57 }
0x113b   :  { %v2468_v58 = vpop.eup %2467 }
0x113c   :  { %v1697_v7 = vsub.f32 1.0, %v2468_v58  ;;  %v1703_v9 = vmul.f32 %v2468_v58, %v2852_v40 }
0x113f   :  { %v2470_v61 = vpop.eup %2469 }
0x1140   :  { %v1724_v14 = vsub.f32 1.0, %v2470_v61  ;;  %v1730_v19 = vmul.f32 %v2470_v61, %v2857_v45 }
0x1194   :  { %v1688_v59 = vpop.permute.xlu0 %1687 }
0x1195   :  { %v1690_v60 = vmul.f32 %v2468_v58, %v1688_v59 }
0x1197   :  { %1692 = vrot.lane.b32.xlu0 %v1690_v60, %s2490_s4 }
0x1198   :  { %v1715_v62 = vpop.permute.xlu1 %1714 }
0x1199   :  { %v1717_v63 = vmul.f32 %v2470_v61, %v1715_v62 }
0x119b   :  { %1719 = vrot.lane.b32.xlu1 %v1717_v63, %s2490_s4 }
0x1209   :  { %v1693_v0 = vpop.permute.xlu0 %1692 }
0x120a   :  { %v1695_v1 = vadd.f32 %v1693_v0, %v1675_v11 }
0x120c   :  { %2471 = vtanh.f32 %v1695_v1 }
0x120d   :  { %v1720_v2 = vpop.permute.xlu1 %1719 }
0x120e   :  { %v1722_v3 = vadd.f32 %v1720_v2, %v1677_v10 }
0x1210   :  { %2473 = vtanh.f32 %v1722_v3 }
0x1216   :  { %v2472_v4 = vpop.eup %2471 }
0x1217   :  { %1699 = vrot.lane.b32.xlu0 %v2472_v4, %s2491_s5 }
0x121a   :  { %v2474_v5 = vpop.eup %2473 }
0x121b   :  { %1726 = vrot.lane.b32.xlu1 %v2474_v5, %s2491_s5 }
0x1289   :  { %v1700_v8 = vpop.permute.xlu0 %1699 }
0x128a   :  { %v1702_v12 = vmul.f32 %v1700_v8, %v1697_v7 }
0x128c   :  { %v1704_v13 = vadd.f32 %v1703_v9, %v1702_v12 }
0x128d   :  { %v1727_v16 = vpop.permute.xlu1 %1726 }
0x128e   :  { %v1729_v20 = vmul.f32 %v1727_v16, %v1724_v14  ;;  %1733 = vrot.lane.b32.xlu0 %v1704_v13, %s2491_s5 }
0x1290   :  { %v1731_v21 = vadd.f32 %v1730_v19, %v1729_v20 }
0x1292   :  { %1739 = vrot.lane.b32.xlu1 %v1731_v21, %s2491_s5 }
0x1300   :  { %v1734_v22 = vpop.permute.xlu0 %1733 }
0x1301   :  { %2011 = vst.msk [vmem:[%s2930_s9 + $0xc] sm:$0x3] %vm452_vm4, %v1734_v22  ;;  %2277 = vmatmul.mubr.msk.f32.vlgmr.msra.gmra.mrb[16].mxu0 %vm241_vm5, %v1734_v22 }
0x1304   :  { %v1740_v23 = vpop.permute.xlu1 %1739 }
0x1305   :  { %2012 = vst.msk [vmem:[%s2931_s10 + $0x2] sm:$0x3] %vm452_vm4, %v1740_v23  ;;  %2288 = vmatmul.mubr.msk.f32.vlgmr.msra.gmra.mrb[16].mxu1 %vm241_vm5, %v1740_v23 }
0x13d4   :  { %v1812_v24 = vpop.f32.mrb[16].mxu0 }
0x13d5   :  { %v1898_v25 = vadd.f32 %v1812_v24, %v2641_v29  ;;  %v2278_v26 = vpop.f32.mrb[17].mxu0  ;;  %v1891_v33 = vadd.f32 %v1889_v31, %v1812_v24 }
0x13d7   :  { %1900 = vrot.lane.b32.xlu0 %v1898_v25, %s2490_s4  ;;  %v2015_v35 = vmul.f32 -1.442695, %v1891_v33 }
0x13d8   :  { %v1884_v27 = vpop.f32.mrb[16].mxu1 }
0x13d9   :  { %v1925_v28 = vadd.f32 %v1884_v27, %v2643_v32  ;;  %v2289_v30 = vpop.f32.mrb[17].mxu1  ;;  %v1918_v36 = vadd.f32 %v1890_v34, %v1884_v27  ;;  %2475 = vpow2.f32 %v2015_v35 }
0x13db   :  { %1927 = vrot.lane.b32.xlu1 %v1925_v28, %s2490_s4  ;;  %v2016_v37 = vmul.f32 -1.442695, %v1918_v36 }
0x13dd   :  { %2477 = vpow2.f32 %v2016_v37 }
0x13e3   :  { %v2476_v38 = vpop.eup %2475 }
0x13e4   :  { %v1895_v39 = vadd.f32 1.0, %v2476_v38 }
0x13e6   :  { %2479 = vrcp.f32 %v1895_v39 }
0x13e7   :  { %v2478_v29 = vpop.eup %2477 }
0x13e8   :  { %v1922_v40 = vadd.f32 1.0, %v2478_v29 }
0x13ea   :  { %2481 = vrcp.f32 %v1922_v40 }
0x13f0   :  { %v2480_v41 = vpop.eup %2479 }
0x13f1   :  { %v1910_v51 = vsub.f32 1.0, %v2480_v41  ;;  %v1916_v11 = vmul.f32 %v2480_v41, %v1704_v13 }
0x13f4   :  { %v2482_v43 = vpop.eup %2481 }
0x13f5   :  { %v1937_v53 = vsub.f32 1.0, %v2482_v43  ;;  %v1943_v17 = vmul.f32 %v2482_v43, %v1731_v21 }
0x1449   :  { %v1901_v42 = vpop.permute.xlu0 %1900 }
0x144a   :  { %v1903_v32 = vmul.f32 %v2480_v41, %v1901_v42 }
0x144c   :  { %1905 = vrot.lane.b32.xlu0 %v1903_v32, %s2490_s4 }
0x144d   :  { %v1928_v44 = vpop.permute.xlu1 %1927 }
0x144e   :  { %v1930_v45 = vmul.f32 %v2482_v43, %v1928_v44 }
0x1450   :  { %1932 = vrot.lane.b32.xlu1 %v1930_v45, %s2490_s4 }
0x14be   :  { %v1906_v46 = vpop.permute.xlu0 %1905 }
0x14bf   :  { %v1908_v47 = vadd.f32 %v1906_v46, %v1889_v31 }
0x14c1   :  { %2483 = vtanh.f32 %v1908_v47 }
0x14c2   :  { %v1933_v6 = vpop.permute.xlu1 %1932 }
0x14c3   :  { %v1935_v48 = vadd.f32 %v1933_v6, %v1890_v34 }
0x14c5   :  { %2485 = vtanh.f32 %v1935_v48 }
0x14cb   :  { %v2484_v49 = vpop.eup %2483 }
0x14cc   :  { %1912 = vrot.lane.b32.xlu0 %v2484_v49, %s2491_s5 }
0x14cf   :  { %v2486_v50 = vpop.eup %2485 }
0x14d0   :  { %1939 = vrot.lane.b32.xlu1 %v2486_v50, %s2491_s5 }
0x153e   :  { %v1913_v52 = vpop.permute.xlu0 %1912 }
0x153f   :  { %v1915_v15 = vmul.f32 %v1913_v52, %v1910_v51 }
0x1541   :  { %v1917_v10 = vadd.f32 %v1916_v11, %v1915_v15 }
0x1542   :  { %v1940_v54 = vpop.permute.xlu1 %1939 }
0x1543   :  { %v1942_v18 = vmul.f32 %v1940_v54, %v1937_v53  ;;  %1946 = vrot.lane.b32.xlu0 %v1917_v10, %s2491_s5 }
0x1545   :  { %v1944_v55 = vadd.f32 %v1943_v17, %v1942_v18 }
0x1547   :  { %1952 = vrot.lane.b32.xlu1 %v1944_v55, %s2491_s5 }
0x15b5   :  { %v1947_v56 = vpop.permute.xlu0 %1946 }
0x15b6   :  { %2017 = vst.msk [vmem:[%s2930_s9 + $0xe] sm:$0x3] %vm452_vm4, %v1947_v56 }
0x15b9   :  { %v1953_v57 = vpop.permute.xlu1 %1952 }
0x15ba   :  { %1955 = vst.msk [vmem:[%s2931_s10] sm:$0x3] %vm452_vm4, %v1953_v57 }

// kernel: gru_attention_forward.4
= control target key start
LH: loop header
LB: loop body
LE: loop exit
PB: predicated region body
PF: predicated region fallthrough
CT: control target
= control target key end

     0   :  { %vm59_vm0 = vcmask 261120   ;;  %v2755_v35 = vmov 0.0|0.0   ;;  %vm2756_vm1 = vmmov 0   ;;  %v2757_v43 = vmov 0.0   ;;  %s3251_s3 = inlined_call_operand.vmem [shape: f32[32,96], index: 3, kind: input, shape index: {}]   ;;  %s3252_s5 = inlined_call_operand.vmem [shape: f32[32,96], index: 5, kind: input, shape index: {}]   ;;  %s3253_s1 = inlined_call_operand.vmem [shape: f32[16,32], index: 1, kind: input, shape index: {}]   ;;  %s3254_s2 = inlined_call_operand.vmem [shape: f32[32,96], index: 2, kind: input, shape index: {}]   ;;  %s3255_s4 = inlined_call_operand.vmem [shape: f32[32,96], index: 4, kind: input, shape index: {}]   ;;  %s3256_s10 = inlined_call_operand.vmem [shape: f32[1,32], index: 10, kind: input, shape index: {}]   ;;  %s3257_s0 = inlined_call_operand.vmem [shape: f32[16,32], index: 0, kind: input, shape index: {}]   ;;  %s3258_s11 = inlined_call_operand.vmem [shape: f32[1,32], index: 11, kind: input, shape index: {}]   ;;  %s3259_s6 = inlined_call_operand.vmem [shape: f32[32,96], index: 6, kind: input, shape index: {}]   ;;  %s3260_s7 = inlined_call_operand.vmem [shape: f32[32,96], index: 7, kind: input, shape index: {}]   ;;  %s3261_s8 = inlined_call_operand.vmem [shape: f32[1,96], index: 8, kind: input, shape index: {}]   ;;  %s3262_s9 = inlined_call_operand.vmem [shape: f32[1,96], index: 9, kind: input, shape index: {}]   ;;  %s3263_s12 = inlined_call_operand.vmem [shape: f32[8,2,32], index: 12, kind: output, shape index: {0}]   ;;  %s3264_s13 = inlined_call_operand.vmem [shape: f32[8,2,32], index: 13, kind: output, shape index: {1}]  }
   0x1   :  { %v55_v0 = vld [vmem:[%s3251_s3] sm:$0xff]  ;;  %v56_v1 = vld [vmem:[%s3251_s3 + $0x8] sm:$0xff]  ;;  %v57_v5 = vld [vmem:[%s3251_s3 + $0x10] sm:$0xff]  ;;  %vm385_vm2 = vcmask 785408   ;;  %vm629_vm3 = vcmask 254976  }
   0x2   :  { %v222_v2 = vld [vmem:[%s3252_s5] sm:$0xff]  ;;  %v2521_v3 = vpack.c.bf16 %v56_v1, %v55_v0  ;;  %v223_v4 = vld [vmem:[%s3252_s5 + $0x8] sm:$0xff]  ;;  %v58_v6 = vld [vmem:[%s3251_s3 + $0x18] sm:$0xff] }
   0x3   :  { %v2537_v7 = vpack.c.bf16 %v223_v4, %v222_v2  ;;  %v2525_v8 = vpack.c.bf16 %v58_v6, %v57_v5  ;;  %v224_v9 = vld [vmem:[%s3252_s5 + $0x10] sm:$0xff]  ;;  %v225_v10 = vld [vmem:[%s3252_s5 + $0x18] sm:$0xff]  ;;  %v53_v11 = vld [vmem:[%s3253_s1] sm:$0xff] }
   0x4   :  { %2522 = vmatprep.subr.bf16.mxu0 %v2521_v3  ;;  %v2541_v12 = vpack.c.bf16 %v225_v10, %v224_v9  ;;  %2309 = vmatprep.mubr.msk.f32.mxu0 %vm59_vm0, %v53_v11  ;;  %v45_v13 = vld [vmem:[%s3254_s2] sm:$0xff]  ;;  %v46_v14 = vld [vmem:[%s3254_s2 + $0x8] sm:$0xff]  ;;  %v47_v19 = vld [vmem:[%s3254_s2 + $0x10] sm:$0xff] }
   0x5   :  { %2538 = vmatprep.subr.bf16.mxu1 %v2537_v7  ;;  %2524 = vmatpush3.bf16.msra.mxu0 %v2521_v3  ;;  %v49_v15 = vld [vmem:[%s3255_s4] sm:$0xff]  ;;  %v50_v16 = vld [vmem:[%s3255_s4 + $0x8] sm:$0xff]  ;;  %v2529_v17 = vpack.c.bf16 %v46_v14, %v45_v13  ;;  %v48_v20 = vld [vmem:[%s3254_s2 + $0x18] sm:$0xff]  ;;  %s2754_s2 = smov 64  }
   0x6   :  { %2540 = vmatpush3.bf16.msra.mxu1 %v2537_v7  ;;  %2526 = vmatprep.subr.bf16.mxu0 %v2525_v8  ;;  %v2545_v18 = vpack.c.bf16 %v50_v16, %v49_v15  ;;  %v51_v21 = vld [vmem:[%s3255_s4 + $0x10] sm:$0xff]  ;;  %v52_v22 = vld [vmem:[%s3255_s4 + $0x18] sm:$0xff]  ;;  %v54_v23 = vld [vmem:[%s3253_s1 + $0x8] sm:$0xff]  ;;  %v2533_v24 = vpack.c.bf16 %v48_v20, %v47_v19 }
   0x7   :  { %2542 = vmatprep.subr.bf16.mxu1 %v2541_v12  ;;  %2331 = vmatprep.mubr.msk.f32.mxu1 %vm59_vm0, %v53_v11  ;;  %v2151_v25 = vld [vmem:[%s3256_s10] ss:$0 sm:$0xff]  ;;  %v2549_v26 = vpack.c.bf16 %v52_v22, %v51_v21  ;;  %v400_v30 = vld [vmem:[%s3259_s6 + $0x8] sm:$0xff]  ;;  %v401_v37 = vld [vmem:[%s3259_s6 + $0x10] sm:$0xff] }
   0x8   :  { %572 = vrot.lane.b32.xlu0 %v2151_v25, %s2754_s2  ;;  %v43_v27 = vld [vmem:[%s3257_s0] sm:$0xff]  ;;  %v404_v32 = vld [vmem:[%s3260_s7 + $0x8] sm:$0xff]  ;;  %v402_v38 = vld [vmem:[%s3259_s6 + $0x18] sm:$0xff] }
   0x9   :  { %2528 = vmatpush3.bf16.msra.mxu0 %v2525_v8  ;;  %v2152_v28 = vld [vmem:[%s3258_s11] ss:$0 sm:$0xff]  ;;  %v44_v33 = vld [vmem:[%s3257_s0 + $0x8] sm:$0xff]  ;;  %v405_v39 = vld [vmem:[%s3260_s7 + $0x10] sm:$0xff]  ;;  %v2936_v41 = vpack.c.bf16 %v402_v38, %v401_v37 }
   0xa   :  { %2544 = vmatpush3.bf16.msra.mxu1 %v2541_v12  ;;  %2530 = vmatprep.subr.bf16.mxu0 %v2529_v17  ;;  %v399_v29 = vld [vmem:[%s3259_s6] sm:$0xff]  ;;  %v406_v40 = vld [vmem:[%s3260_s7 + $0x18] sm:$0xff] }
   0xb   :  { %2546 = vmatprep.subr.bf16.mxu1 %v2545_v18  ;;  %v403_v31 = vld [vmem:[%s3260_s7] sm:$0xff]  ;;  %v2915_v34 = vpack.c.bf16 %v400_v30, %v399_v29  ;;  %v2940_v42 = vpack.c.bf16 %v406_v40, %v405_v39 }
   0xc   :  { %2310 = vmatmul.mubr.msk.f32.vlgmr.msra.gmra.mrb[0].mxu0 %vm59_vm0, %v54_v23  ;;  %602 = vrot.lane.b32.xlu0 %v2152_v28, %s2754_s2  ;;  %v2918_v36 = vpack.c.bf16 %v404_v32, %v403_v31  ;;  %v2149_v44 = vld [vmem:[%s3261_s8] ss:$0 sm:$0xff]  ;;  %s2758_s8 = smov 96  }
   0xd   :  { %2332 = vmatmul.mubr.msk.f32.vlgmr.msra.gmra.mrb[0].mxu1 %vm59_vm0, %v54_v23  ;;  %2532 = vmatpush3.bf16.msra.mxu0 %v2529_v17  ;;  %v2150_v45 = vld [vmem:[%s3262_s9] ss:$0 sm:$0xff] }
   0xe   :  { %2548 = vmatpush3.bf16.msra.mxu1 %v2545_v18  ;;  %2534 = vmatprep.subr.bf16.mxu0 %v2533_v24 }
   0xf   :  { %2550 = vmatprep.subr.bf16.mxu1 %v2549_v26  ;;  %2320 = vmatprep.mubr.msk.f32.mxu0 %vm59_vm0, %v43_v27 }
  0x10   :  { %2342 = vmatprep.mubr.msk.f32.mxu1 %vm59_vm0, %v43_v27 }
  0x11   :  { %2536 = vmatpush3.bf16.msra.mxu0 %v2533_v24 }
  0x12   :  { %2552 = vmatpush3.bf16.msra.mxu1 %v2549_v26  ;;  %2553 = vmatprep.subr.bf16.mxu0 %v2755_v35 }
  0x13   :  { %2559 = vmatprep.subr.bf16.mxu1 %v2755_v35 }
  0x14   :  { %2321 = vmatmul.mubr.msk.f32.vlgmr.msra.gmra.mrb[0].mxu0 %vm59_vm0, %v44_v33 }
  0x15   :  { %2343 = vmatmul.mubr.msk.f32.vlgmr.msra.gmra.mrb[0].mxu1 %vm59_vm0, %v44_v33  ;;  %2555 = vmatpush3.bf16.msra.mxu0 %v2915_v34 }
  0x16   :  { %2561 = vmatpush3.bf16.msra.mxu1 %v2918_v36  ;;  %2556 = vmatprep.subr.bf16.mxu0 %v2755_v35 }
  0x17   :  { %2562 = vmatprep.subr.bf16.mxu1 %v2755_v35  ;;  %2353 = vmatprep.mubr.msk.f32.mxu0 %vm2756_vm1, %v2757_v43 }
  0x18   :  { %2364 = vmatprep.mubr.msk.f32.mxu1 %vm2756_vm1, %v2757_v43 }
  0x19   :  { %2558 = vmatpush3.bf16.msra.mxu0 %v2936_v41 }
  0x1a   :  { %2564 = vmatpush3.bf16.msra.mxu1 %v2940_v42  ;;  %2565 = vmatprep.subr.bf16.mxu0 %v2755_v35 }
  0x1b   :  { %2571 = vmatprep.subr.bf16.mxu1 %v2755_v35 }
  0x1c   :  { %2354 = vmatmul.mubr.f32.vlgmr.msra.gmra.mrb[2].mxu0 %v2757_v43 }
  0x1d   :  { %2365 = vmatmul.mubr.f32.vlgmr.msra.gmra.mrb[2].mxu1 %v2757_v43  ;;  %2567 = vmatpush3.bf16.msra.mxu0 %v2915_v34 }
  0x1e   :  { %2568 = vmatprep.subr.bf16.mxu0 %v2755_v35  ;;  %2573 = vmatpush3.bf16.msra.mxu1 %v2918_v36 }
  0x1f   :  { %2375 = vmatprep.mubr.msk.f32.mxu0 %vm2756_vm1, %v2757_v43  ;;  %2574 = vmatprep.subr.bf16.mxu1 %v2755_v35 }
  0x20   :  { %2386 = vmatprep.mubr.msk.f32.mxu1 %vm2756_vm1, %v2757_v43 }
  0x21   :  { %2570 = vmatpush3.bf16.msra.mxu0 %v2936_v41 }
  0x22   :  { %2576 = vmatpush3.bf16.msra.mxu1 %v2940_v42  ;;  %2577 = vmatprep.subr.bf16.mxu0 %v2755_v35 }
  0x23   :  { %2583 = vmatprep.subr.bf16.mxu1 %v2755_v35 }
  0x7a   :  { %v2971_v53 = vpop.permute.xlu0 %572 }
  0x7e   :  { %v2973_v56 = vpop.permute.xlu0 %602 }
  0xe7   :  { %v2322_v46 = vpop.f32.mrb[0].mxu0 }
  0xe8   :  { %v384_v47 = vadd.f32 %v2322_v46, %v2149_v44  ;;  %v2344_v48 = vpop.f32.mrb[0].mxu1  ;;  %v213_v49 = vpop.f32.mrb[1].mxu0 }
  0xe9   :  { %v396_v50 = vadd.f32 %v2344_v48, %v2150_v45  ;;  %v383_v51 = vadd.f32 %v2149_v44, %v213_v49  ;;  %v367_v52 = vpop.f32.mrb[1].mxu1 }
  0xea   :  { %387 = vst.msk [vmem:[#allocation2 + $0x8] sm:$0xff] %vm385_vm2, %v384_v47  ;;  %v395_v54 = vadd.f32 %v2150_v45, %v367_v52 }
  0xeb   :  { %398 = vst.msk [vmem:[#allocation3 + $0x8] sm:$0xff] %vm385_vm2, %v396_v50  ;;  %386 = vst.msk [vmem:[#allocation2] sm:$0xff] %vm385_vm2, %v383_v51 }
  0xec   :  { %397 = vst.msk [vmem:[#allocation3] sm:$0xff] %vm385_vm2, %v395_v54 }
  0xef   :  { %v488_v55 = vpop.f32.mrb[2].mxu0 }
  0xf0   :  { %v2355_v57 = vpop.f32.mrb[3].mxu0  ;;  %v558_v58 = vpop.f32.mrb[2].mxu1  ;;  %v575_v59 = vadd.f32 %v2971_v53, %v488_v55 }
  0xf1   :  { %v2366_v60 = vpop.f32.mrb[3].mxu1  ;;  %v605_v61 = vadd.f32 %v2973_v56, %v558_v58 }
  0xf2   :  { %577 = vrot.lane.b32.xlu1 %v575_v59, %s2754_s2  ;;  %v562_v62 = vld [vmem:[#allocation2] sm:$0x3]  ;;  %v564_v0 = vld [vmem:[#allocation3 + $0xe] sm:$0x3]  ;;  %v782_v44 = vld [vmem:[#allocation2 + $0x2] sm:$0x3] }
  0xf3   :  { %v565_v63 = vadd.f32 %v562_v62, %v488_v55  ;;  %v595_v2 = vadd.f32 %v564_v0, %v558_v58  ;;  %v784_v46 = vld [vmem:[#allocation3 + $0xc] sm:$0x3] }
  0xf5   :  { %v2153_v1 = vmul.f32 -1.442695, %v565_v63  ;;  %v2154_v3 = vmul.f32 -1.442695, %v595_v2 }
  0xf6   :  { %607 = vrot.lane.b32.xlu1 %v605_v61, %s2754_s2 }
  0xf7   :  { %2658 = vpow2.f32 %v2153_v1 }
  0xf8   :  { %2660 = vpow2.f32 %v2154_v3 }
 0x101   :  { %v2659_v4 = vpop.eup %2658 }
 0x102   :  { %v569_v5 = vadd.f32 1.0, %v2659_v4  ;;  %v2661_v6 = vpop.eup %2660 }
 0x103   :  { %v599_v7 = vadd.f32 1.0, %v2661_v6 }
 0x104   :  { %2662 = vrcp.f32 %v569_v5 }
 0x105   :  { %2664 = vrcp.f32 %v599_v7 }
 0x10e   :  { %v2663_v8 = vpop.eup %2662 }
 0x10f   :  { %v2665_v11 = vpop.eup %2664  ;;  %v587_v20 = vsub.f32 1.0, %v2663_v8  ;;  %v593_v22 = vmul.f32 0.0, %v2663_v8 }
 0x110   :  { %v617_v25 = vsub.f32 1.0, %v2665_v11  ;;  %v623_v27 = vmul.f32 0.0, %v2665_v11 }
 0x164   :  { %v578_v9 = vpop.permute.xlu1 %577 }
 0x165   :  { %v580_v10 = vmul.f32 %v2663_v8, %v578_v9 }
 0x167   :  { %582 = vrot.lane.b32.xlu0 %v580_v10, %s2754_s2 }
 0x168   :  { %v608_v12 = vpop.permute.xlu1 %607 }
 0x169   :  { %v610_v13 = vmul.f32 %v2665_v11, %v608_v12 }
 0x16b   :  { %612 = vrot.lane.b32.xlu1 %v610_v13, %s2754_s2 }
 0x1d9   :  { %v583_v14 = vpop.permute.xlu0 %582 }
 0x1da   :  { %v585_v15 = vadd.f32 %v583_v14, %v562_v62 }
 0x1dc   :  { %2666 = vtanh.f32 %v585_v15 }
 0x1dd   :  { %v613_v16 = vpop.permute.xlu1 %612 }
 0x1de   :  { %v615_v17 = vadd.f32 %v613_v16, %v564_v0 }
 0x1e0   :  { %2668 = vtanh.f32 %v615_v17 }
 0x1e6   :  { %v2667_v18 = vpop.eup %2666 }
 0x1e7   :  { %589 = vrot.lane.b32.xlu0 %v2667_v18, %s2758_s8 }
 0x1ea   :  { %v2669_v19 = vpop.eup %2668 }
 0x1eb   :  { %619 = vrot.lane.b32.xlu1 %v2669_v19, %s2758_s8 }
 0x259   :  { %v590_v21 = vpop.permute.xlu0 %589 }
 0x25a   :  { %v592_v23 = vmul.f32 %v590_v21, %v587_v20 }
 0x25c   :  { %v2983_v24 = vadd.f32 %v593_v22, %v592_v23  ;;  %v996_v22 = vld [vmem:[#allocation2 + $0x4] sm:$0x3] }
 0x25d   :  { %v620_v26 = vpop.permute.xlu1 %619 }
 0x25e   :  { %v622_v28 = vmul.f32 %v620_v26, %v617_v25  ;;  %626 = vrot.lane.b32.xlu0 %v2983_v24, %s2758_s8 }
 0x260   :  { %v2987_v29 = vadd.f32 %v623_v27, %v622_v28 }
 0x262   :  { %632 = vrot.lane.b32.xlu1 %v2987_v29, %s2758_s8 }
 0x2d0   :  { %v627_v30 = vpop.permute.xlu0 %626 }
 0x2d1   :  { %630 = vst.msk [vmem:[%s3263_s12] sm:$0x3] %vm629_vm3, %v627_v30  ;;  %2376 = vmatmul.mubr.msk.f32.vlgmr.msra.gmra.mrb[4].mxu0 %vm59_vm0, %v627_v30 }
 0x2d2   :  { %2579 = vmatpush3.bf16.msra.mxu0 %v2915_v34  ;;  %2397 = vmatprep.mubr.msk.f32.mxu0 %vm2756_vm1, %v2757_v43 }
 0x2d3   :  { %2580 = vmatprep.subr.bf16.mxu0 %v2755_v35 }
 0x2d4   :  { %v633_v31 = vpop.permute.xlu1 %632 }
 0x2d5   :  { %2155 = vst.msk [vmem:[%s3264_s13 + $0xe] sm:$0x3] %vm629_vm3, %v633_v31  ;;  %2387 = vmatmul.mubr.msk.f32.vlgmr.msra.gmra.mrb[4].mxu1 %vm59_vm0, %v633_v31 }
 0x2d6   :  { %2582 = vmatpush3.bf16.msra.mxu0 %v2936_v41  ;;  %2585 = vmatpush3.bf16.msra.mxu1 %v2918_v36 }
 0x2d7   :  { %2586 = vmatprep.subr.bf16.mxu1 %v2755_v35  ;;  %2408 = vmatprep.mubr.msk.f32.mxu1 %vm2756_vm1, %v2757_v43 }
 0x2d8   :  { %2589 = vmatprep.subr.bf16.mxu0 %v2755_v35 }
 0x2da   :  { %2588 = vmatpush3.bf16.msra.mxu1 %v2940_v42 }
 0x2db   :  { %2595 = vmatprep.subr.bf16.mxu1 %v2755_v35 }
 0x3a4   :  { %v705_v32 = vpop.f32.mrb[4].mxu0 }
 0x3a5   :  { %v792_v33 = vadd.f32 %v705_v32, %v2971_v53  ;;  %v2377_v37 = vpop.f32.mrb[5].mxu0  ;;  %v785_v45 = vadd.f32 %v782_v44, %v705_v32 }
 0x3a7   :  { %794 = vrot.lane.b32.xlu0 %v792_v33, %s2754_s2  ;;  %v2158_v47 = vmul.f32 -1.442695, %v785_v45 }
 0x3a8   :  { %v777_v38 = vpop.f32.mrb[4].mxu1 }
 0x3a9   :  { %v819_v39 = vadd.f32 %v777_v38, %v2973_v56  ;;  %v2388_v40 = vpop.f32.mrb[5].mxu1  ;;  %v812_v48 = vadd.f32 %v784_v46, %v777_v38  ;;  %2670 = vpow2.f32 %v2158_v47 }
 0x3ab   :  { %821 = vrot.lane.b32.xlu1 %v819_v39, %s2754_s2  ;;  %v2159_v49 = vmul.f32 -1.442695, %v812_v48 }
 0x3ad   :  { %2672 = vpow2.f32 %v2159_v49 }
 0x3b3   :  { %v2671_v50 = vpop.eup %2670 }
 0x3b4   :  { %v789_v51 = vadd.f32 1.0, %v2671_v50 }
 0x3b6   :  { %2674 = vrcp.f32 %v789_v51 }
 0x3b7   :  { %v2673_v52 = vpop.eup %2672 }
 0x3b8   :  { %v816_v54 = vadd.f32 1.0, %v2673_v52 }
 0x3ba   :  { %2676 = vrcp.f32 %v816_v54 }
 0x3c0   :  { %v2675_v55 = vpop.eup %2674 }
 0x3c1   :  { %v804_v4 = vsub.f32 1.0, %v2675_v55  ;;  %v810_v6 = vmul.f32 %v2675_v55, %v2983_v24  ;;  %v998_v24 = vld [vmem:[#allocation3 + $0xa] sm:$0x3] }
 0x3c4   :  { %v2677_v59 = vpop.eup %2676 }
 0x3c5   :  { %v831_v9 = vsub.f32 1.0, %v2677_v59  ;;  %v837_v11 = vmul.f32 %v2677_v59, %v2987_v29 }
 0x419   :  { %v795_v57 = vpop.permute.xlu0 %794 }
 0x41a   :  { %v797_v58 = vmul.f32 %v2675_v55, %v795_v57 }
 0x41c   :  { %799 = vrot.lane.b32.xlu0 %v797_v58, %s2754_s2 }
 0x41d   :  { %v822_v60 = vpop.permute.xlu1 %821 }
 0x41e   :  { %v824_v61 = vmul.f32 %v2677_v59, %v822_v60 }
 0x420   :  { %826 = vrot.lane.b32.xlu1 %v824_v61, %s2754_s2 }
 0x48e   :  { %v800_v62 = vpop.permute.xlu0 %799 }
 0x48f   :  { %v802_v63 = vadd.f32 %v800_v62, %v782_v44 }
 0x491   :  { %2678 = vtanh.f32 %v802_v63 }
 0x492   :  { %v827_v0 = vpop.permute.xlu1 %826 }
 0x493   :  { %v829_v1 = vadd.f32 %v827_v0, %v784_v46 }
 0x495   :  { %2680 = vtanh.f32 %v829_v1 }
 0x49b   :  { %v2679_v2 = vpop.eup %2678 }
 0x49c   :  { %806 = vrot.lane.b32.xlu0 %v2679_v2, %s2758_s8 }
 0x49f   :  { %v2681_v3 = vpop.eup %2680 }
 0x4a0   :  { %833 = vrot.lane.b32.xlu1 %v2681_v3, %s2758_s8 }
 0x50e   :  { %v807_v5 = vpop.permute.xlu0 %806 }
 0x50f   :  { %v809_v7 = vmul.f32 %v807_v5, %v804_v4 }
 0x511   :  { %v3022_v8 = vadd.f32 %v810_v6, %v809_v7  ;;  %v1210_v6 = vld [vmem:[#allocation2 + $0x6] sm:$0x3] }
 0x512   :  { %v834_v10 = vpop.permute.xlu1 %833 }
 0x513   :  { %v836_v12 = vmul.f32 %v834_v10, %v831_v9  ;;  %840 = vrot.lane.b32.xlu0 %v3022_v8, %s2758_s8 }
 0x515   :  { %v3027_v13 = vadd.f32 %v837_v11, %v836_v12 }
 0x517   :  { %846 = vrot.lane.b32.xlu1 %v3027_v13, %s2758_s8 }
 0x585   :  { %v841_v14 = vpop.permute.xlu0 %840 }
 0x586   :  { %2160 = vst.msk [vmem:[%s3263_s12 + $0x2] sm:$0x3] %vm629_vm3, %v841_v14  ;;  %2398 = vmatmul.mubr.msk.f32.vlgmr.msra.gmra.mrb[6].mxu0 %vm59_vm0, %v841_v14 }
 0x587   :  { %2591 = vmatpush3.bf16.msra.mxu0 %v2915_v34  ;;  %2419 = vmatprep.mubr.msk.f32.mxu0 %vm2756_vm1, %v2757_v43 }
 0x588   :  { %2592 = vmatprep.subr.bf16.mxu0 %v2755_v35 }
 0x589   :  { %v847_v15 = vpop.permute.xlu1 %846 }
 0x58a   :  { %2161 = vst.msk [vmem:[%s3264_s13 + $0xc] sm:$0x3] %vm629_vm3, %v847_v15  ;;  %2409 = vmatmul.mubr.msk.f32.vlgmr.msra.gmra.mrb[6].mxu1 %vm59_vm0, %v847_v15 }
 0x58b   :  { %2594 = vmatpush3.bf16.msra.mxu0 %v2936_v41  ;;  %2597 = vmatpush3.bf16.msra.mxu1 %v2918_v36 }
 0x58c   :  { %2598 = vmatprep.subr.bf16.mxu1 %v2755_v35  ;;  %2430 = vmatprep.mubr.msk.f32.mxu1 %vm2756_vm1, %v2757_v43 }
 0x58d   :  { %2601 = vmatprep.subr.bf16.mxu0 %v2755_v35 }
 0x58f   :  { %2600 = vmatpush3.bf16.msra.mxu1 %v2940_v42 }
 0x590   :  { %2607 = vmatprep.subr.bf16.mxu1 %v2755_v35 }
 0x659   :  { %v919_v16 = vpop.f32.mrb[6].mxu0 }
 0x65a   :  { %v1006_v17 = vadd.f32 %v919_v16, %v2971_v53  ;;  %v2399_v18 = vpop.f32.mrb[7].mxu0  ;;  %v999_v23 = vadd.f32 %v996_v22, %v919_v16 }
 0x65c   :  { %1008 = vrot.lane.b32.xlu0 %v1006_v17, %s2754_s2  ;;  %v2164_v25 = vmul.f32 -1.442695, %v999_v23 }
 0x65d   :  { %v991_v19 = vpop.f32.mrb[6].mxu1 }
 0x65e   :  { %v1033_v20 = vadd.f32 %v991_v19, %v2973_v56  ;;  %v2410_v21 = vpop.f32.mrb[7].mxu1  ;;  %v1026_v26 = vadd.f32 %v998_v24, %v991_v19  ;;  %2682 = vpow2.f32 %v2164_v25 }
 0x660   :  { %1035 = vrot.lane.b32.xlu1 %v1033_v20, %s2754_s2  ;;  %v2165_v27 = vmul.f32 -1.442695, %v1026_v26 }
 0x662   :  { %2684 = vpow2.f32 %v2165_v27 }
 0x668   :  { %v2683_v28 = vpop.eup %2682 }
 0x669   :  { %v1003_v29 = vadd.f32 1.0, %v2683_v28 }
 0x66b   :  { %2686 = vrcp.f32 %v1003_v29 }
 0x66c   :  { %v2685_v30 = vpop.eup %2684 }
 0x66d   :  { %v1030_v31 = vadd.f32 1.0, %v2685_v30 }
 0x66f   :  { %2688 = vrcp.f32 %v1030_v31 }
 0x675   :  { %v2687_v32 = vpop.eup %2686 }
 0x676   :  { %v1018_v50 = vsub.f32 1.0, %v2687_v32  ;;  %v1024_v52 = vmul.f32 %v2687_v32, %v3022_v8  ;;  %v1212_v8 = vld [vmem:[#allocation3 + $0x8] sm:$0x3] }
 0x679   :  { %v2689_v38 = vpop.eup %2688 }
 0x67a   :  { %v1045_v57 = vsub.f32 1.0, %v2689_v38  ;;  %v1051_v59 = vmul.f32 %v2689_v38, %v3027_v13 }
 0x6ce   :  { %v1009_v33 = vpop.permute.xlu0 %1008 }
 0x6cf   :  { %v1011_v37 = vmul.f32 %v2687_v32, %v1009_v33 }
 0x6d1   :  { %1013 = vrot.lane.b32.xlu0 %v1011_v37, %s2754_s2 }
 0x6d2   :  { %v1036_v39 = vpop.permute.xlu1 %1035 }
 0x6d3   :  { %v1038_v40 = vmul.f32 %v2689_v38, %v1036_v39 }
 0x6d5   :  { %1040 = vrot.lane.b32.xlu1 %v1038_v40, %s2754_s2 }
 0x743   :  { %v1014_v44 = vpop.permute.xlu0 %1013 }
 0x744   :  { %v1016_v45 = vadd.f32 %v1014_v44, %v996_v22 }
 0x746   :  { %2690 = vtanh.f32 %v1016_v45 }
 0x747   :  { %v1041_v46 = vpop.permute.xlu1 %1040 }
 0x748   :  { %v1043_v47 = vadd.f32 %v1041_v46, %v998_v24 }
 0x74a   :  { %2692 = vtanh.f32 %v1043_v47 }
 0x750   :  { %v2691_v48 = vpop.eup %2690 }
 0x751   :  { %1020 = vrot.lane.b32.xlu0 %v2691_v48, %s2758_s8 }
 0x754   :  { %v2693_v49 = vpop.eup %2692 }
 0x755   :  { %1047 = vrot.lane.b32.xlu1 %v2693_v49, %s2758_s8 }
 0x7c3   :  { %v1021_v51 = vpop.permute.xlu0 %1020 }
 0x7c4   :  { %v1023_v54 = vmul.f32 %v1021_v51, %v1018_v50 }
 0x7c6   :  { %v3062_v55 = vadd.f32 %v1024_v52, %v1023_v54  ;;  %v1424_v52 = vld [vmem:[#allocation2 + $0x8] sm:$0x3] }
 0x7c7   :  { %v1048_v58 = vpop.permute.xlu1 %1047 }
 0x7c8   :  { %v1050_v60 = vmul.f32 %v1048_v58, %v1045_v57  ;;  %1054 = vrot.lane.b32.xlu0 %v3062_v55, %s2758_s8 }
 0x7ca   :  { %v3067_v61 = vadd.f32 %v1051_v59, %v1050_v60 }
 0x7cc   :  { %1060 = vrot.lane.b32.xlu1 %v3067_v61, %s2758_s8 }
 0x83a   :  { %v1055_v62 = vpop.permute.xlu0 %1054 }
 0x83b   :  { %2166 = vst.msk [vmem:[%s3263_s12 + $0x4] sm:$0x3] %vm629_vm3, %v1055_v62  ;;  %2420 = vmatmul.mubr.msk.f32.vlgmr.msra.gmra.mrb[8].mxu0 %vm59_vm0, %v1055_v62 }
 0x83c   :  { %2603 = vmatpush3.bf16.msra.mxu0 %v2915_v34  ;;  %2441 = vmatprep.mubr.msk.f32.mxu0 %vm2756_vm1, %v2757_v43 }
 0x83d   :  { %2604 = vmatprep.subr.bf16.mxu0 %v2755_v35 }
 0x83e   :  { %v1061_v63 = vpop.permute.xlu1 %1060 }
 0x83f   :  { %2167 = vst.msk [vmem:[%s3264_s13 + $0xa] sm:$0x3] %vm629_vm3, %v1061_v63  ;;  %2431 = vmatmul.mubr.msk.f32.vlgmr.msra.gmra.mrb[8].mxu1 %vm59_vm0, %v1061_v63 }
 0x840   :  { %2606 = vmatpush3.bf16.msra.mxu0 %v2936_v41  ;;  %2609 = vmatpush3.bf16.msra.mxu1 %v2918_v36 }
 0x841   :  { %2610 = vmatprep.subr.bf16.mxu1 %v2755_v35  ;;  %2452 = vmatprep.mubr.msk.f32.mxu1 %vm2756_vm1, %v2757_v43 }
 0x842   :  { %2613 = vmatprep.subr.bf16.mxu0 %v2755_v35 }
 0x844   :  { %2612 = vmatpush3.bf16.msra.mxu1 %v2940_v42 }
 0x845   :  { %2619 = vmatprep.subr.bf16.mxu1 %v2755_v35 }
 0x90e   :  { %v1133_v0 = vpop.f32.mrb[8].mxu0 }
 0x90f   :  { %v1220_v1 = vadd.f32 %v1133_v0, %v2971_v53  ;;  %v2421_v2 = vpop.f32.mrb[9].mxu0  ;;  %v1213_v7 = vadd.f32 %v1210_v6, %v1133_v0 }
 0x911   :  { %1222 = vrot.lane.b32.xlu0 %v1220_v1, %s2754_s2  ;;  %v2170_v9 = vmul.f32 -1.442695, %v1213_v7 }
 0x912   :  { %v1205_v3 = vpop.f32.mrb[8].mxu1 }
 0x913   :  { %v1247_v4 = vadd.f32 %v1205_v3, %v2973_v56  ;;  %v2432_v5 = vpop.f32.mrb[9].mxu1  ;;  %v1240_v10 = vadd.f32 %v1212_v8, %v1205_v3  ;;  %2694 = vpow2.f32 %v2170_v9 }
 0x915   :  { %1249 = vrot.lane.b32.xlu1 %v1247_v4, %s2754_s2  ;;  %v2171_v11 = vmul.f32 -1.442695, %v1240_v10 }
 0x917   :  { %2696 = vpow2.f32 %v2171_v11 }
 0x91d   :  { %v2695_v12 = vpop.eup %2694 }
 0x91e   :  { %v1217_v13 = vadd.f32 1.0, %v2695_v12 }
 0x920   :  { %2698 = vrcp.f32 %v1217_v13 }
 0x921   :  { %v2697_v14 = vpop.eup %2696 }
 0x922   :  { %v1244_v15 = vadd.f32 1.0, %v2697_v14 }
 0x924   :  { %2700 = vrcp.f32 %v1244_v15 }
 0x92a   :  { %v2699_v16 = vpop.eup %2698 }
 0x92b   :  { %v1232_v28 = vsub.f32 1.0, %v2699_v16  ;;  %v1238_v30 = vmul.f32 %v2699_v16, %v3062_v55  ;;  %v1426_v55 = vld [vmem:[#allocation3 + $0x6] sm:$0x3] }
 0x92e   :  { %v2701_v19 = vpop.eup %2700 }
 0x92f   :  { %v1259_v33 = vsub.f32 1.0, %v2701_v19  ;;  %v1265_v38 = vmul.f32 %v2701_v19, %v3067_v61 }
 0x983   :  { %v1223_v17 = vpop.permute.xlu0 %1222 }
 0x984   :  { %v1225_v18 = vmul.f32 %v2699_v16, %v1223_v17 }
 0x986   :  { %1227 = vrot.lane.b32.xlu0 %v1225_v18, %s2754_s2 }
 0x987   :  { %v1250_v20 = vpop.permute.xlu1 %1249 }
 0x988   :  { %v1252_v21 = vmul.f32 %v2701_v19, %v1250_v20 }
 0x98a   :  { %1254 = vrot.lane.b32.xlu1 %v1252_v21, %s2754_s2 }
 0x9f8   :  { %v1228_v22 = vpop.permute.xlu0 %1227 }
 0x9f9   :  { %v1230_v23 = vadd.f32 %v1228_v22, %v1210_v6 }
 0x9fb   :  { %2702 = vtanh.f32 %v1230_v23 }
 0x9fc   :  { %v1255_v24 = vpop.permute.xlu1 %1254 }
 0x9fd   :  { %v1257_v25 = vadd.f32 %v1255_v24, %v1212_v8 }
 0x9ff   :  { %2704 = vtanh.f32 %v1257_v25 }
 0xa05   :  { %v2703_v26 = vpop.eup %2702 }
 0xa06   :  { %1234 = vrot.lane.b32.xlu0 %v2703_v26, %s2758_s8 }
 0xa09   :  { %v2705_v27 = vpop.eup %2704 }
 0xa0a   :  { %1261 = vrot.lane.b32.xlu1 %v2705_v27, %s2758_s8 }
 0xa78   :  { %v1235_v29 = vpop.permute.xlu0 %1234 }
 0xa79   :  { %v1237_v31 = vmul.f32 %v1235_v29, %v1232_v28 }
 0xa7b   :  { %v3102_v32 = vadd.f32 %v1238_v30, %v1237_v31  ;;  %v1638_v30 = vld [vmem:[#allocation2 + $0xa] sm:$0x3] }
 0xa7c   :  { %v1262_v37 = vpop.permute.xlu1 %1261 }
 0xa7d   :  { %v1264_v39 = vmul.f32 %v1262_v37, %v1259_v33  ;;  %1268 = vrot.lane.b32.xlu0 %v3102_v32, %s2758_s8 }
 0xa7f   :  { %v3107_v40 = vadd.f32 %v1265_v38, %v1264_v39 }
 0xa81   :  { %1274 = vrot.lane.b32.xlu1 %v3107_v40, %s2758_s8 }
 0xaef   :  { %v1269_v44 = vpop.permute.xlu0 %1268 }
 0xaf0   :  { %2172 = vst.msk [vmem:[%s3263_s12 + $0x6] sm:$0x3] %vm629_vm3, %v1269_v44  ;;  %2442 = vmatmul.mubr.msk.f32.vlgmr.msra.gmra.mrb[10].mxu0 %vm59_vm0, %v1269_v44 }
 0xaf1   :  { %2615 = vmatpush3.bf16.msra.mxu0 %v2915_v34  ;;  %2463 = vmatprep.mubr.msk.f32.mxu0 %vm2756_vm1, %v2757_v43 }
 0xaf2   :  { %2616 = vmatprep.subr.bf16.mxu0 %v2755_v35 }
 0xaf3   :  { %v1275_v45 = vpop.permute.xlu1 %1274 }
 0xaf4   :  { %2173 = vst.msk [vmem:[%s3264_s13 + $0x8] sm:$0x3] %vm629_vm3, %v1275_v45  ;;  %2453 = vmatmul.mubr.msk.f32.vlgmr.msra.gmra.mrb[10].mxu1 %vm59_vm0, %v1275_v45 }
 0xaf5   :  { %2618 = vmatpush3.bf16.msra.mxu0 %v2936_v41  ;;  %2621 = vmatpush3.bf16.msra.mxu1 %v2918_v36 }
 0xaf6   :  { %2622 = vmatprep.subr.bf16.mxu1 %v2755_v35  ;;  %2474 = vmatprep.mubr.msk.f32.mxu1 %vm2756_vm1, %v2757_v43 }
 0xaf7   :  { %2625 = vmatprep.subr.bf16.mxu0 %v2755_v35 }
 0xaf9   :  { %2624 = vmatpush3.bf16.msra.mxu1 %v2940_v42 }
 0xafa   :  { %2631 = vmatprep.subr.bf16.mxu1 %v2755_v35 }
 0xbc3   :  { %v1347_v46 = vpop.f32.mrb[10].mxu0 }
 0xbc4   :  { %v1434_v47 = vadd.f32 %v1347_v46, %v2971_v53  ;;  %v2443_v48 = vpop.f32.mrb[11].mxu0  ;;  %v1427_v54 = vadd.f32 %v1424_v52, %v1347_v46 }
 0xbc6   :  { %1436 = vrot.lane.b32.xlu0 %v1434_v47, %s2754_s2  ;;  %v2176_v57 = vmul.f32 -1.442695, %v1427_v54 }
 0xbc7   :  { %v1419_v49 = vpop.f32.mrb[10].mxu1 }
 0xbc8   :  { %v1461_v50 = vadd.f32 %v1419_v49, %v2973_v56  ;;  %v2454_v51 = vpop.f32.mrb[11].mxu1  ;;  %v1454_v58 = vadd.f32 %v1426_v55, %v1419_v49  ;;  %2706 = vpow2.f32 %v2176_v57 }
 0xbca   :  { %1463 = vrot.lane.b32.xlu1 %v1461_v50, %s2754_s2  ;;  %v2177_v59 = vmul.f32 -1.442695, %v1454_v58 }
 0xbcc   :  { %2708 = vpow2.f32 %v2177_v59 }
 0xbd2   :  { %v2707_v60 = vpop.eup %2706 }
 0xbd3   :  { %v1431_v61 = vadd.f32 1.0, %v2707_v60 }
 0xbd5   :  { %2710 = vrcp.f32 %v1431_v61 }
 0xbd6   :  { %v2709_v62 = vpop.eup %2708 }
 0xbd7   :  { %v1458_v63 = vadd.f32 1.0, %v2709_v62 }
 0xbd9   :  { %2712 = vrcp.f32 %v1458_v63 }
 0xbdf   :  { %v2711_v0 = vpop.eup %2710 }
 0xbe0   :  { %v1446_v12 = vsub.f32 1.0, %v2711_v0  ;;  %v1452_v14 = vmul.f32 %v2711_v0, %v3102_v32  ;;  %v1640_v32 = vld [vmem:[#allocation3 + $0x4] sm:$0x3] }
 0xbe3   :  { %v2713_v3 = vpop.eup %2712 }
 0xbe4   :  { %v1473_v17 = vsub.f32 1.0, %v2713_v3  ;;  %v1479_v19 = vmul.f32 %v2713_v3, %v3107_v40 }
 0xc38   :  { %v1437_v1 = vpop.permute.xlu0 %1436 }
 0xc39   :  { %v1439_v2 = vmul.f32 %v2711_v0, %v1437_v1 }
 0xc3b   :  { %1441 = vrot.lane.b32.xlu0 %v1439_v2, %s2754_s2 }
 0xc3c   :  { %v1464_v4 = vpop.permute.xlu1 %1463 }
 0xc3d   :  { %v1466_v5 = vmul.f32 %v2713_v3, %v1464_v4 }
 0xc3f   :  { %1468 = vrot.lane.b32.xlu1 %v1466_v5, %s2754_s2 }
 0xcad   :  { %v1442_v6 = vpop.permute.xlu0 %1441 }
 0xcae   :  { %v1444_v7 = vadd.f32 %v1442_v6, %v1424_v52 }
 0xcb0   :  { %2714 = vtanh.f32 %v1444_v7 }
 0xcb1   :  { %v1469_v8 = vpop.permute.xlu1 %1468 }
 0xcb2   :  { %v1471_v9 = vadd.f32 %v1469_v8, %v1426_v55 }
 0xcb4   :  { %2716 = vtanh.f32 %v1471_v9 }
 0xcba   :  { %v2715_v10 = vpop.eup %2714 }
 0xcbb   :  { %1448 = vrot.lane.b32.xlu0 %v2715_v10, %s2758_s8 }
 0xcbe   :  { %v2717_v11 = vpop.eup %2716 }
 0xcbf   :  { %1475 = vrot.lane.b32.xlu1 %v2717_v11, %s2758_s8 }
 0xd2d   :  { %v1449_v13 = vpop.permute.xlu0 %1448 }
 0xd2e   :  { %v1451_v15 = vmul.f32 %v1449_v13, %v1446_v12 }
 0xd30   :  { %v3142_v16 = vadd.f32 %v1452_v14, %v1451_v15 }
 0xd31   :  { %v1476_v18 = vpop.permute.xlu1 %1475 }
 0xd32   :  { %v1478_v20 = vmul.f32 %v1476_v18, %v1473_v17  ;;  %1482 = vrot.lane.b32.xlu0 %v3142_v16, %s2758_s8 }
 0xd34   :  { %v3147_v21 = vadd.f32 %v1479_v19, %v1478_v20 }
 0xd36   :  { %1488 = vrot.lane.b32.xlu1 %v3147_v21, %s2758_s8 }
 0xda4   :  { %v1483_v22 = vpop.permute.xlu0 %1482 }
 0xda5   :  { %2178 = vst.msk [vmem:[%s3263_s12 + $0x8] sm:$0x3] %vm629_vm3, %v1483_v22  ;;  %2464 = vmatmul.mubr.msk.f32.vlgmr.msra.gmra.mrb[12].mxu0 %vm59_vm0, %v1483_v22 }
 0xda6   :  { %2627 = vmatpush3.bf16.msra.mxu0 %v2915_v34  ;;  %2485 = vmatprep.mubr.msk.f32.mxu0 %vm2756_vm1, %v2757_v43 }
 0xda7   :  { %2628 = vmatprep.subr.bf16.mxu0 %v2755_v35 }
 0xda8   :  { %v1489_v23 = vpop.permute.xlu1 %1488 }
 0xda9   :  { %2179 = vst.msk [vmem:[%s3264_s13 + $0x6] sm:$0x3] %vm629_vm3, %v1489_v23  ;;  %2475 = vmatmul.mubr.msk.f32.vlgmr.msra.gmra.mrb[12].mxu1 %vm59_vm0, %v1489_v23 }
 0xdaa   :  { %2630 = vmatpush3.bf16.msra.mxu0 %v2936_v41  ;;  %2633 = vmatpush3.bf16.msra.mxu1 %v2918_v36 }
 0xdab   :  { %2634 = vmatprep.subr.bf16.mxu1 %v2755_v35  ;;  %2496 = vmatprep.mubr.msk.f32.mxu1 %vm2756_vm1, %v2757_v43 }
 0xdac   :  { %2637 = vmatprep.subr.bf16.mxu0 %v2755_v35 }
 0xdae   :  { %2636 = vmatpush3.bf16.msra.mxu1 %v2940_v42 }
 0xdaf   :  { %2643 = vmatprep.subr.bf16.mxu1 %v2755_v35 }
 0xe78   :  { %v1561_v24 = vpop.f32.mrb[12].mxu0 }
 0xe79   :  { %v1648_v25 = vadd.f32 %v1561_v24, %v2971_v53  ;;  %v2465_v26 = vpop.f32.mrb[13].mxu0  ;;  %v1641_v31 = vadd.f32 %v1638_v30, %v1561_v24 }
 0xe7b   :  { %1650 = vrot.lane.b32.xlu0 %v1648_v25, %s2754_s2  ;;  %v2182_v33 = vmul.f32 -1.442695, %v1641_v31 }
 0xe7c   :  { %v1633_v27 = vpop.f32.mrb[12].mxu1 }
 0xe7d   :  { %v1675_v28 = vadd.f32 %v1633_v27, %v2973_v56  ;;  %v2476_v29 = vpop.f32.mrb[13].mxu1  ;;  %v1668_v37 = vadd.f32 %v1640_v32, %v1633_v27  ;;  %2718 = vpow2.f32 %v2182_v33 }
 0xe7f   :  { %1677 = vrot.lane.b32.xlu1 %v1675_v28, %s2754_s2  ;;  %v2183_v38 = vmul.f32 -1.442695, %v1668_v37 }
 0xe81   :  { %2720 = vpow2.f32 %v2183_v38 }
 0xe87   :  { %v2719_v39 = vpop.eup %2718 }
 0xe88   :  { %v1645_v40 = vadd.f32 1.0, %v2719_v39 }
 0xe8a   :  { %2722 = vrcp.f32 %v1645_v40 }
 0xe8b   :  { %v2721_v44 = vpop.eup %2720 }
 0xe8c   :  { %v1672_v45 = vadd.f32 1.0, %v2721_v44 }
 0xe8e   :  { %2724 = vrcp.f32 %v1672_v45 }
 0xe94   :  { %v2723_v46 = vpop.eup %2722 }
 0xe95   :  { %v1660_v60 = vsub.f32 1.0, %v2723_v46  ;;  %v1666_v62 = vmul.f32 %v2723_v46, %v3142_v16 }
 0xe98   :  { %v2725_v49 = vpop.eup %2724 }
 0xe99   :  { %v1687_v1 = vsub.f32 1.0, %v2725_v49  ;;  %v1693_v3 = vmul.f32 %v2725_v49, %v3147_v21 }
 0xeed   :  { %v1651_v47 = vpop.permute.xlu0 %1650 }
 0xeee   :  { %v1653_v48 = vmul.f32 %v2723_v46, %v1651_v47 }
 0xef0   :  { %1655 = vrot.lane.b32.xlu0 %v1653_v48, %s2754_s2 }
 0xef1   :  { %v1678_v50 = vpop.permute.xlu1 %1677 }
 0xef2   :  { %v1680_v51 = vmul.f32 %v2725_v49, %v1678_v50 }
 0xef4   :  { %1682 = vrot.lane.b32.xlu1 %v1680_v51, %s2754_s2 }
 0xf62   :  { %v1656_v52 = vpop.permute.xlu0 %1655 }
 0xf63   :  { %v1658_v54 = vadd.f32 %v1656_v52, %v1638_v30 }
 0xf65   :  { %2726 = vtanh.f32 %v1658_v54 }
 0xf66   :  { %v1683_v55 = vpop.permute.xlu1 %1682 }
 0xf67   :  { %v1685_v57 = vadd.f32 %v1683_v55, %v1640_v32  ;;  %v2066_v55 = vld [vmem:[#allocation2 + $0xe] sm:$0x3] }
 0xf69   :  { %2728 = vtanh.f32 %v1685_v57 }
 0xf6f   :  { %v2727_v58 = vpop.eup %2726 }
 0xf70   :  { %1662 = vrot.lane.b32.xlu0 %v2727_v58, %s2758_s8  ;;  %v2067_v58 = vld [vmem:[#allocation3] sm:$0x3] }
 0xf73   :  { %v2729_v59 = vpop.eup %2728 }
 0xf74   :  { %1689 = vrot.lane.b32.xlu1 %v2729_v59, %s2758_s8 }
 0xfe2   :  { %v1663_v61 = vpop.permute.xlu0 %1662 }
 0xfe3   :  { %v1665_v63 = vmul.f32 %v1663_v61, %v1660_v60 }
 0xfe5   :  { %v3182_v0 = vadd.f32 %v1666_v62, %v1665_v63 }
 0xfe6   :  { %v1690_v2 = vpop.permute.xlu1 %1689 }
 0xfe7   :  { %v1692_v4 = vmul.f32 %v1690_v2, %v1687_v1  ;;  %1696 = vrot.lane.b32.xlu0 %v3182_v0, %s2758_s8 }
 0xfe9   :  { %v3187_v5 = vadd.f32 %v1693_v3, %v1692_v4 }
 0xfeb   :  { %1702 = vrot.lane.b32.xlu1 %v3187_v5, %s2758_s8 }
0x1059   :  { %v1697_v6 = vpop.permute.xlu0 %1696 }
0x105a   :  { %2184 = vst.msk [vmem:[%s3263_s12 + $0xa] sm:$0x3] %vm629_vm3, %v1697_v6  ;;  %2486 = vmatmul.mubr.msk.f32.vlgmr.msra.gmra.mrb[14].mxu0 %vm59_vm0, %v1697_v6 }
0x105b   :  { %2639 = vmatpush3.bf16.msra.mxu0 %v2915_v34  ;;  %2507 = vmatprep.mubr.msk.f32.mxu0 %vm2756_vm1, %v2757_v43 }
0x105c   :  { %2640 = vmatprep.subr.bf16.mxu0 %v2755_v35 }
0x105d   :  { %v1703_v7 = vpop.permute.xlu1 %1702 }
0x105e   :  { %2185 = vst.msk [vmem:[%s3264_s13 + $0x4] sm:$0x3] %vm629_vm3, %v1703_v7  ;;  %2497 = vmatmul.mubr.msk.f32.vlgmr.msra.gmra.mrb[14].mxu1 %vm59_vm0, %v1703_v7 }
0x105f   :  { %2642 = vmatpush3.bf16.msra.mxu0 %v2936_v41  ;;  %2645 = vmatpush3.bf16.msra.mxu1 %v2918_v36  ;;  %v1852_v36 = vld [vmem:[#allocation2 + $0xc] sm:$0x3] }
0x1060   :  { %2646 = vmatprep.subr.bf16.mxu1 %v2755_v35  ;;  %2518 = vmatprep.mubr.msk.f32.mxu1 %vm2756_vm1, %v2757_v43  ;;  %v1854_v35 = vld [vmem:[#allocation3 + $0x2] sm:$0x3] }
0x1063   :  { %2648 = vmatpush3.bf16.msra.mxu1 %v2940_v42 }
0x112d   :  { %v1775_v34 = vpop.f32.mrb[14].mxu0 }
0x112e   :  { %v1862_v8 = vadd.f32 %v1775_v34, %v2971_v53  ;;  %v2487_v9 = vpop.f32.mrb[15].mxu0  ;;  %v1855_v41 = vadd.f32 %v1852_v36, %v1775_v34 }
0x1130   :  { %1864 = vrot.lane.b32.xlu0 %v1862_v8, %s2754_s2  ;;  %v2188_v13 = vmul.f32 -1.442695, %v1855_v41 }
0x1131   :  { %v1847_v10 = vpop.f32.mrb[14].mxu1 }
0x1132   :  { %v1889_v11 = vadd.f32 %v1847_v10, %v2973_v56  ;;  %v2498_v12 = vpop.f32.mrb[15].mxu1  ;;  %v1882_v14 = vadd.f32 %v1854_v35, %v1847_v10  ;;  %2730 = vpow2.f32 %v2188_v13 }
0x1134   :  { %1891 = vrot.lane.b32.xlu1 %v1889_v11, %s2754_s2  ;;  %v2189_v43 = vmul.f32 -1.442695, %v1882_v14 }
0x1136   :  { %2732 = vpow2.f32 %v2189_v43 }
0x113c   :  { %v2731_v42 = vpop.eup %2730 }
0x113d   :  { %v1859_v15 = vadd.f32 1.0, %v2731_v42 }
0x113f   :  { %2734 = vrcp.f32 %v1859_v15 }
0x1140   :  { %v2733_v16 = vpop.eup %2732 }
0x1141   :  { %v1886_v17 = vadd.f32 1.0, %v2733_v16 }
0x1143   :  { %2736 = vrcp.f32 %v1886_v17 }
0x1149   :  { %v2735_v18 = vpop.eup %2734 }
0x114a   :  { %v1874_v30 = vsub.f32 1.0, %v2735_v18  ;;  %v1880_v32 = vmul.f32 %v2735_v18, %v3182_v0 }
0x114d   :  { %v2737_v21 = vpop.eup %2736 }
0x114e   :  { %v1901_v38 = vsub.f32 1.0, %v2737_v21  ;;  %v1907_v40 = vmul.f32 %v2737_v21, %v3187_v5 }
0x11a2   :  { %v1865_v19 = vpop.permute.xlu0 %1864 }
0x11a3   :  { %v1867_v20 = vmul.f32 %v2735_v18, %v1865_v19 }
0x11a5   :  { %1869 = vrot.lane.b32.xlu0 %v1867_v20, %s2754_s2 }
0x11a6   :  { %v1892_v22 = vpop.permute.xlu1 %1891 }
0x11a7   :  { %v1894_v23 = vmul.f32 %v2737_v21, %v1892_v22 }
0x11a9   :  { %1896 = vrot.lane.b32.xlu1 %v1894_v23, %s2754_s2 }
0x1217   :  { %v1870_v24 = vpop.permute.xlu0 %1869 }
0x1218   :  { %v1872_v25 = vadd.f32 %v1870_v24, %v1852_v36 }
0x121a   :  { %2738 = vtanh.f32 %v1872_v25 }
0x121b   :  { %v1897_v26 = vpop.permute.xlu1 %1896 }
0x121c   :  { %v1899_v27 = vadd.f32 %v1897_v26, %v1854_v35 }
0x121e   :  { %2740 = vtanh.f32 %v1899_v27 }
0x1224   :  { %v2739_v28 = vpop.eup %2738 }
0x1225   :  { %1876 = vrot.lane.b32.xlu0 %v2739_v28, %s2758_s8 }
0x1228   :  { %v2741_v29 = vpop.eup %2740 }
0x1229   :  { %1903 = vrot.lane.b32.xlu1 %v2741_v29, %s2758_s8 }
0x1297   :  { %v1877_v31 = vpop.permute.xlu0 %1876 }
0x1298   :  { %v1879_v33 = vmul.f32 %v1877_v31, %v1874_v30 }
0x129a   :  { %v1881_v37 = vadd.f32 %v1880_v32, %v1879_v33 }
0x129b   :  { %v1904_v39 = vpop.permute.xlu1 %1903 }
0x129c   :  { %v1906_v44 = vmul.f32 %v1904_v39, %v1901_v38  ;;  %1910 = vrot.lane.b32.xlu0 %v1881_v37, %s2758_s8 }
0x129e   :  { %v1908_v45 = vadd.f32 %v1907_v40, %v1906_v44 }
0x12a0   :  { %1916 = vrot.lane.b32.xlu1 %v1908_v45, %s2758_s8 }
0x130e   :  { %v1911_v46 = vpop.permute.xlu0 %1910 }
0x130f   :  { %2190 = vst.msk [vmem:[%s3263_s12 + $0xc] sm:$0x3] %vm629_vm3, %v1911_v46  ;;  %2508 = vmatmul.mubr.msk.f32.vlgmr.msra.gmra.mrb[16].mxu0 %vm59_vm0, %v1911_v46 }
0x1312   :  { %v1917_v47 = vpop.permute.xlu1 %1916 }
0x1313   :  { %2191 = vst.msk [vmem:[%s3264_s13 + $0x2] sm:$0x3] %vm629_vm3, %v1917_v47  ;;  %2519 = vmatmul.mubr.msk.f32.vlgmr.msra.gmra.mrb[16].mxu1 %vm59_vm0, %v1917_v47 }
0x13e2   :  { %v1989_v48 = vpop.f32.mrb[16].mxu0 }
0x13e3   :  { %v2075_v49 = vadd.f32 %v1989_v48, %v2971_v53  ;;  %v2509_v50 = vpop.f32.mrb[17].mxu0  ;;  %v2068_v57 = vadd.f32 %v2066_v55, %v1989_v48 }
0x13e5   :  { %2077 = vrot.lane.b32.xlu0 %v2075_v49, %s2754_s2  ;;  %v2194_v59 = vmul.f32 -1.442695, %v2068_v57 }
0x13e6   :  { %v2061_v51 = vpop.f32.mrb[16].mxu1 }
0x13e7   :  { %v2102_v52 = vadd.f32 %v2061_v51, %v2973_v56  ;;  %v2520_v54 = vpop.f32.mrb[17].mxu1  ;;  %v2095_v60 = vadd.f32 %v2067_v58, %v2061_v51  ;;  %2742 = vpow2.f32 %v2194_v59 }
0x13e9   :  { %2104 = vrot.lane.b32.xlu1 %v2102_v52, %s2754_s2  ;;  %v2195_v61 = vmul.f32 -1.442695, %v2095_v60 }
0x13eb   :  { %2744 = vpow2.f32 %v2195_v61 }
0x13f1   :  { %v2743_v62 = vpop.eup %2742 }
0x13f2   :  { %v2072_v63 = vadd.f32 1.0, %v2743_v62 }
0x13f4   :  { %2746 = vrcp.f32 %v2072_v63 }
0x13f5   :  { %v2745_v53 = vpop.eup %2744 }
0x13f6   :  { %v2099_v0 = vadd.f32 1.0, %v2745_v53 }
0x13f8   :  { %2748 = vrcp.f32 %v2099_v0 }
0x13fe   :  { %v2747_v1 = vpop.eup %2746 }
0x13ff   :  { %v2087_v11 = vsub.f32 1.0, %v2747_v1  ;;  %v2093_v36 = vmul.f32 %v2747_v1, %v1881_v37 }
0x1402   :  { %v2749_v3 = vpop.eup %2748 }
0x1403   :  { %v2114_v13 = vsub.f32 1.0, %v2749_v3  ;;  %v2120_v43 = vmul.f32 %v2749_v3, %v1908_v45 }
0x1457   :  { %v2078_v2 = vpop.permute.xlu0 %2077 }
0x1458   :  { %v2080_v56 = vmul.f32 %v2747_v1, %v2078_v2 }
0x145a   :  { %2082 = vrot.lane.b32.xlu0 %v2080_v56, %s2754_s2 }
0x145b   :  { %v2105_v4 = vpop.permute.xlu1 %2104 }
0x145c   :  { %v2107_v5 = vmul.f32 %v2749_v3, %v2105_v4 }
0x145e   :  { %2109 = vrot.lane.b32.xlu1 %v2107_v5, %s2754_s2 }
0x14cc   :  { %v2083_v6 = vpop.permute.xlu0 %2082 }
0x14cd   :  { %v2085_v7 = vadd.f32 %v2083_v6, %v2066_v55 }
0x14cf   :  { %2750 = vtanh.f32 %v2085_v7 }
0x14d0   :  { %v2110_v34 = vpop.permute.xlu1 %2109 }
0x14d1   :  { %v2112_v8 = vadd.f32 %v2110_v34, %v2067_v58 }
0x14d3   :  { %2752 = vtanh.f32 %v2112_v8 }
0x14d9   :  { %v2751_v9 = vpop.eup %2750 }
0x14da   :  { %2089 = vrot.lane.b32.xlu0 %v2751_v9, %s2758_s8 }
0x14dd   :  { %v2753_v10 = vpop.eup %2752 }
0x14de   :  { %2116 = vrot.lane.b32.xlu1 %v2753_v10, %s2758_s8 }
0x154c   :  { %v2090_v12 = vpop.permute.xlu0 %2089 }
0x154d   :  { %v2092_v41 = vmul.f32 %v2090_v12, %v2087_v11 }
0x154f   :  { %v2094_v35 = vadd.f32 %v2093_v36, %v2092_v41 }
0x1550   :  { %v2117_v14 = vpop.permute.xlu1 %2116 }
0x1551   :  { %v2119_v42 = vmul.f32 %v2117_v14, %v2114_v13  ;;  %2123 = vrot.lane.b32.xlu0 %v2094_v35, %s2758_s8 }
0x1553   :  { %v2121_v15 = vadd.f32 %v2120_v43, %v2119_v42 }
0x1555   :  { %2129 = vrot.lane.b32.xlu1 %v2121_v15, %s2758_s8 }
0x15c3   :  { %v2124_v16 = vpop.permute.xlu0 %2123 }
0x15c4   :  { %2196 = vst.msk [vmem:[%s3263_s12 + $0xe] sm:$0x3] %vm629_vm3, %v2124_v16 }
0x15c7   :  { %v2130_v17 = vpop.permute.xlu1 %2129 }
0x15c8   :  { %2132 = vst.msk [vmem:[%s3264_s13] sm:$0x3] %vm629_vm3, %v2130_v17 }

</bundles_post_ra>
